<compile_context>
chip_gen: v5e
topology: v5e:2x2
jax: 0.10.0
libtpu: 0.0.40
codegen_flags: <defaults>
</compile_context>

<pallas_src>
import jax
import jax.numpy as jnp
from jax.experimental import pallas as pl
from jax.experimental.pallas import tpu as pltpu

# ----------------------- model hyper-parameters ------------------------------
VOCAB = 8192          # toy vocab (multiple of 128); spec default is 32000
HIDDEN = 128
SEQ = 8
BATCH = 2


# ----------------------------- Pallas kernel ---------------------------------
def value_head_kernel(h_ref, w_head_ref, w_ln_ref, b_ref, o_ref):
    """value = Linear_bf16(V->1)(h_last @ W_lmhead), single step, full vocab.

    h_ref:      (B, H)  bf16 last-position hidden states       (VMEM)
    w_head_ref: (H, V)  bf16 lm_head weight (whole, resident)  (VMEM)
    w_ln_ref:   (1, V)  bf16 value-head weight row             (VMEM)
    b_ref:      (1, 1)  f32 value-head bias                    (SMEM)
    o_ref:      (B, 1)  bf16 value output                      (VMEM)
    """
    # MXU matmul with f32 accumulation: (B, H) x (H, V) -> (B, V) logits.
    logits = jnp.dot(
        h_ref[...], w_head_ref[...], preferred_element_type=jnp.float32
    )
    # nn.Linear(V, 1, dtype=bf16): bf16 operands, f32 accumulate, scalar bias.
    logits_bf16 = logits.astype(jnp.bfloat16)
    prod = logits_bf16.astype(jnp.float32) * w_ln_ref[...].astype(jnp.float32)
    val = jnp.sum(prod, axis=-1, keepdims=True) + b_ref[0, 0]
    o_ref[...] = val.astype(o_ref.dtype)


def value_head(h_last: jax.Array, w_head: jax.Array,
               w_ln: jax.Array, b_ln: jax.Array) -> jax.Array:
    """(h_last @ W_lmhead) @ w_ln^T + b  via one Pallas call. Returns [B] bf16."""
    B, H = h_last.shape
    H2, V = w_head.shape
    assert H == H2 and w_ln.shape == (1, V)
    # Whole-weight single step: bf16 weight block (+ inputs/outputs) must fit
    # scoped VMEM (16 MiB default on v5e). Re-tile over V if scaled to real
    # Llama sizes (pick TV so 2 * H * TV * dtype_bytes <= ~8-16 MiB).
    assert 2 * H * V * 2 <= 12 * 1024 * 1024, "re-tile the vocab axis"

    h_bf16 = h_last.astype(jnp.bfloat16)
    w_head_bf16 = w_head.astype(jnp.bfloat16)
    w_ln_bf16 = w_ln.astype(jnp.bfloat16)
    b_smem = b_ln.astype(jnp.float32).reshape(1, 1)

    out = pl.pallas_call(
        value_head_kernel,
        out_shape=jax.ShapeDtypeStruct((B, 1), jnp.bfloat16),
        in_specs=[
            pl.BlockSpec(memory_space=pltpu.MemorySpace.VMEM),   # h_last
            pl.BlockSpec(memory_space=pltpu.MemorySpace.VMEM),   # lm_head W
            pl.BlockSpec(memory_space=pltpu.MemorySpace.VMEM),   # value-head W
            pl.BlockSpec(memory_space=pltpu.MemorySpace.SMEM),   # bias scalar
        ],
        out_specs=pl.BlockSpec(memory_space=pltpu.MemorySpace.VMEM),
    )(h_bf16, w_head_bf16, w_ln_bf16, b_smem)
    return out[:, 0]


# -------------------- synthetic deterministic "base model" -------------------
def init_params(key):
    k_emb, k_mlp1, k_mlp2, k_head, k_ln = jax.random.split(key, 5)
    return {
        "emb": 0.02 * jax.random.normal(k_emb, (VOCAB, HIDDEN), jnp.float32),
        "w_mlp1": 0.05 * jax.random.normal(k_mlp1, (HIDDEN, HIDDEN), jnp.float32),
        "w_mlp2": 0.05 * jax.random.normal(k_mlp2, (HIDDEN, HIDDEN), jnp.float32),
        # lm_head stored in bf16 (halves streamed HBM bytes, native MXU path).
        "w_head": (0.05 * jax.random.normal(k_head, (HIDDEN, VOCAB),
                                            jnp.float32)).astype(jnp.bfloat16),
        # nn.Linear(V, 1, dtype=bf16): weight row (1, V) + scalar bias.
        "w_ln": (jax.random.normal(k_ln, (1, VOCAB), jnp.float32)
                 / jnp.sqrt(VOCAB)).astype(jnp.bfloat16),
        "b_ln": jnp.asarray(0.01, jnp.bfloat16),
    }


def base_model_hidden(params, input_ids, attention_mask):
    """Tiny deterministic Llama-ish base model -> last-position hidden [B, H]."""
    x = params["emb"][input_ids]                                   # [B, S, H]
    mask = attention_mask.astype(jnp.float32)[..., None]           # [B, S, 1]
    x = x * mask
    # Causal masked mean mixing (stand-in for attention; uses attention_mask).
    num = jnp.cumsum(x, axis=1)                                    # [B, S, H]
    den = jnp.maximum(jnp.cumsum(mask, axis=1), 1.0)               # [B, S, 1]
    h = num / den
    # SiLU MLP with residual.
    h = h + jax.nn.silu(h @ params["w_mlp1"]) @ params["w_mlp2"]
    # RMSNorm.
    h = h * jax.lax.rsqrt(jnp.mean(h * h, axis=-1, keepdims=True) + 1e-6)
    return h[:, -1, :]                                             # [B, H]


@jax.jit
def llama_vm_forward(params, input_ids, attention_mask):
    h_last = base_model_hidden(params, input_ids, attention_mask)  # glue (JAX)
    return value_head(h_last, params["w_head"],                    # hot path
                      params["w_ln"], params["b_ln"])              # (Pallas)


def llama_vm_forward_ref(params, input_ids, attention_mask):
    """Pure-JAX reference of the same forward (correctness check)."""
    h_last = base_model_hidden(params, input_ids, attention_mask)
    logits = jnp.dot(h_last.astype(jnp.bfloat16), params["w_head"],
                     preferred_element_type=jnp.float32)
    logits_bf16 = logits.astype(jnp.bfloat16)
    val = jnp.sum(logits_bf16.astype(jnp.float32)
                  * params["w_ln"].astype(jnp.float32), axis=-1)
    val = val + params["b_ln"].astype(jnp.float32)
    return val.astype(jnp.bfloat16)


# ----------------------------------- main ------------------------------------
if __name__ == "__main__":
    key = jax.random.PRNGKey(0)
    k_params, k_ids = jax.random.split(key)

    params = init_params(k_params)
    input_ids = jax.random.randint(k_ids, (BATCH, SEQ), 0, VOCAB, dtype=jnp.int32)
    attention_mask = jnp.ones((BATCH, SEQ), dtype=jnp.int32).at[0, 0].set(0)

    out = llama_vm_forward(params, input_ids, attention_mask)
    out = jax.block_until_ready(out)

    ref = llama_vm_forward_ref(params, input_ids, attention_mask)
    assert out.shape == (BATCH,)
    assert out.dtype == jnp.bfloat16
    # bf16 operands with f32 accumulation -> loosened tolerance (per review).
    assert jnp.allclose(out.astype(jnp.float32), ref.astype(jnp.float32),
                        atol=2e-2, rtol=2e-2), (out, ref)

    print("KERNEL_OK")
</pallas_src>

<mosaic_0001>
module attributes {stable_mosaic.version = 11 : i64} {
  func.func @value_head_kernel(%arg0: memref<2x128xbf16, #tpu.memory_space<vmem>>, %arg1: memref<128x8192xbf16, #tpu.memory_space<vmem>>, %arg2: memref<1x8192xbf16, #tpu.memory_space<vmem>>, %arg3: memref<1x1xf32, #tpu.memory_space<smem>>, %arg4: memref<2x1xbf16, #tpu.memory_space<vmem>>) attributes {dimension_semantics = [], scalar_prefetch = 0 : i64, scratch_operands = 0 : i64, tpu.core_type = #tpu.core_type<tc>} {
    %c0 = arith.constant 0 : index
    %c0_0 = arith.constant 0 : index
    %0 = vector.load %arg0[%c0, %c0_0] : memref<2x128xbf16, #tpu.memory_space<vmem>>, vector<2x128xbf16>
    %c0_1 = arith.constant 0 : index
    %c0_2 = arith.constant 0 : index
    %1 = vector.load %arg1[%c0_1, %c0_2] : memref<128x8192xbf16, #tpu.memory_space<vmem>>, vector<128x8192xbf16>
    %cst = arith.constant dense<0.000000e+00> : vector<2x8192xf32>
    %2 = tpu.matmul %0, %1, %cst {dimension_numbers = #tpu.dot_dimension_numbers<[1], [0], [0], [1], [0, 0, 1, 1], [], []>} : vector<2x128xbf16>, vector<128x8192xbf16>, vector<2x8192xf32> -> vector<2x8192xf32>
    %3 = arith.truncf %2 : vector<2x8192xf32> to vector<2x8192xbf16>
    %4 = arith.extf %3 : vector<2x8192xbf16> to vector<2x8192xf32>
    %c0_3 = arith.constant 0 : index
    %c0_4 = arith.constant 0 : index
    %5 = vector.load %arg2[%c0_3, %c0_4] : memref<1x8192xbf16, #tpu.memory_space<vmem>>, vector<1x8192xbf16>
    %6 = arith.extf %5 : vector<1x8192xbf16> to vector<1x8192xf32>
    %7 = vector.broadcast %6 : vector<1x8192xf32> to vector<2x8192xf32>
    %8 = arith.mulf %4, %7 : vector<2x8192xf32>
    %cst_5 = arith.constant dense<0.000000e+00> : vector<2xf32>
    %9 = vector.multi_reduction <add>, %8, %cst_5 [1] : vector<2x8192xf32> to vector<2xf32>
    %10 = vector.shape_cast %9 : vector<2xf32> to vector<2x1xf32>
    %c0_6 = arith.constant 0 : index
    %c0_7 = arith.constant 0 : index
    %11 = memref.load %arg3[%c0_6, %c0_7] : memref<1x1xf32, #tpu.memory_space<smem>>
    %12 = vector.broadcast %11 : f32 to vector<2x1xf32>
    %13 = arith.addf %10, %12 : vector<2x1xf32>
    %14 = arith.truncf %13 : vector<2x1xf32> to vector<2x1xbf16>
    %c0_8 = arith.constant 0 : index
    %c0_9 = arith.constant 0 : index
    %15 = vector.load %arg4[%c0_8, %c0_9] : memref<2x1xbf16, #tpu.memory_space<vmem>>, vector<2x1xbf16>
    tpu.vector_store %arg4[%c0_8, %c0_9], %14 {strides = array<i32>} : memref<2x1xbf16, #tpu.memory_space<vmem>>, vector<2x1xbf16>,
    return
  }
}

</mosaic_0001>

<bundles_post_ra>
// kernel: llama_vm_forward.1
= control target key start
LH: loop header
LB: loop body
LE: loop exit
PB: predicated region body
PF: predicated region fallthrough
CT: control target
= control target key end

     0   :  { %10 = vsyncpa [#allocation4], 0  ;;  %s7421_s0 = inlined_call_operand.vmem [shape: bf16[2,128], index: 0, kind: input, shape index: {}]   ;;  %s7422_s1 = inlined_call_operand.hbm [shape: bf16[128,8192], index: 1, kind: input, shape index: {}]   ;;  %s7423_s2 = inlined_call_operand.hbm [shape: bf16[1,8192], index: 2, kind: input, shape index: {}]   ;;  %s7424_s3 = inlined_call_operand.<no memory space> [shape: f32[1,1], index: 3, kind: input, shape index: {}]   ;;  %s7425_s4 = inlined_call_operand.vmem [shape: bf16[2,1], index: 4, kind: output, shape index: {}]  }
   0x1   :  { %s18_s17 = sshll.u32 %s7422_s1, 4  ;;  %s19_s17 = int_to_ptr.hbm [resolvable:$true] %s18_s17 }
   0x2   :  { %11 = vsyncpa [#allocation6], 0  ;;  %s7107_s18 = smov [#allocation3]   ;;  %s32_s22 = sshll.u32 %s7423_s2, 4  ;;  %s33_s22 = int_to_ptr.hbm [resolvable:$true] %s32_s22 }
   0x3   :  { %s20_s19 = sshll.u32 %s7107_s18, 4  ;;  %s7108_s23 = smov 4096   ;;  %s21_s19 = int_to_ptr.vmem [resolvable:$true] %s20_s19 }
   0x4   :  { %s7109_s24 = smov 256   ;;  %s7110_s25 = smov [#allocation5]  }
   0x5   :  { %26 = dma.hbm_to_vmem [thread:$0]  %s19_s17, 65536, %s21_s19, [#allocation4], %s7108_s23, %s7108_s23, %s7109_s24  }
   0x6   :  { %s34_s26 = sshll.u32 %s7110_s25, 4  ;;  %s35_s26 = int_to_ptr.vmem [resolvable:$true] %s34_s26 }
   0x7   :  { %37 = dma.hbm_to_vmem [thread:$0]  %s33_s22, 1024, %s35_s26, [#allocation6]  }
   0x8   :  { %7103 = dma.done.wait [#allocation4], 65536  }
   0x9   :  { %7104 = vsyncadd [#allocation4], 4294901760 }
   0xa   :  { %7105 = dma.done.wait [#allocation6], 1024  }
   0xb   :  { %7106 = vsyncadd [#allocation6], 4294966272  ;;  %v6281_v0 = vld [vmem:[#allocation3 + $0xe00] sm:$0xf]  ;;  %v6983_v2 = vld [vmem:[#allocation3 + $0xe04] sm:$0xf] }
   0xc   :  { %v7015_v1 = vld [vmem:[#allocation3 + $0xefc] sm:$0xf0]  ;;  %v6283_v4 = vld [vmem:[#allocation3 + $0xf00] sm:$0xf0]  ;;  %v6289_v5 = vld [vmem:[#allocation3 + $0xe08] sm:$0xf] }
   0xd   :  { %v6282_v3 = vor.u32 %v7015_v1, %v6281_v0  ;;  %v7016_v6 = vld [vmem:[#allocation3 + $0xf04] sm:$0xf0]  ;;  %v6286_v7 = vor.u32 %v6983_v2, %v6283_v4  ;;  %v6984_v9 = vld [vmem:[#allocation3 + $0xe0c] sm:$0xf]  ;;  %v6025_v11 = vld [vmem:[#allocation3 + $0xc00] sm:$0xf] }
   0xe   :  { %v6290_v8 = vor.u32 %v7016_v6, %v6289_v5  ;;  %v6291_v10 = vld [vmem:[#allocation3 + $0xf08] sm:$0xf0]  ;;  %v6951_v13 = vld [vmem:[#allocation3 + $0xcfc] sm:$0xf0]  ;;  %v6919_v14 = vld [vmem:[#allocation3 + $0xc04] sm:$0xf] }
   0xf   :  { %3121 = vmatpush.bf16.msra.mxu0 %v6282_v3  ;;  %v6294_v12 = vor.u32 %v6984_v9, %v6291_v10  ;;  %v6027_v15 = vld [vmem:[#allocation3 + $0xd00] sm:$0xf0]  ;;  %3134 = vmatpush.bf16.msra.mxu1 %v6286_v7  ;;  %v6026_v16 = vor.u32 %v6951_v13, %v6025_v11  ;;  %v6033_v18 = vld [vmem:[#allocation3 + $0xc08] sm:$0xf]  ;;  %v6920_v20 = vld [vmem:[#allocation3 + $0xc0c] sm:$0xf] }
  0x10   :  { %3147 = vmatpush.bf16.msra.mxu2 %v6290_v8  ;;  %v6030_v17 = vor.u32 %v6919_v14, %v6027_v15  ;;  %v6952_v19 = vld [vmem:[#allocation3 + $0xd04] sm:$0xf0]  ;;  %v6035_v22 = vld [vmem:[#allocation3 + $0xd08] sm:$0xf0]  ;;  %v5769_v23 = vld [vmem:[#allocation3 + $0xa00] sm:$0xf] }
  0x11   :  { %3160 = vmatpush.bf16.msra.mxu3 %v6294_v12  ;;  %v6034_v21 = vor.u32 %v6952_v19, %v6033_v18  ;;  %v6887_v24 = vld [vmem:[#allocation3 + $0xafc] sm:$0xf0]  ;;  %v6038_v25 = vor.u32 %v6920_v20, %v6035_v22  ;;  %v6855_v26 = vld [vmem:[#allocation3 + $0xa04] sm:$0xf]  ;;  %v5777_v28 = vld [vmem:[#allocation3 + $0xa08] sm:$0xf] }
  0x12   :  { %v5771_v27 = vld [vmem:[#allocation3 + $0xb00] sm:$0xf0]  ;;  %v5770_v29 = vor.u32 %v6887_v24, %v5769_v23  ;;  %v6888_v30 = vld [vmem:[#allocation3 + $0xb04] sm:$0xf0]  ;;  %v6856_v31 = vld [vmem:[#allocation3 + $0xa0c] sm:$0xf] }
  0x13   :  { %3122 = vmatpush.bf16.msra.mxu0 %v6026_v16  ;;  %v5779_v32 = vld [vmem:[#allocation3 + $0xb08] sm:$0xf0]  ;;  %3135 = vmatpush.bf16.msra.mxu1 %v6030_v17  ;;  %v5774_v33 = vor.u32 %v6855_v26, %v5771_v27  ;;  %v5778_v34 = vor.u32 %v6888_v30, %v5777_v28  ;;  %v5513_v35 = vld [vmem:[#allocation3 + $0x800] sm:$0xf]  ;;  %v6791_v37 = vld [vmem:[#allocation3 + $0x804] sm:$0xf] }
  0x14   :  { %3148 = vmatpush.bf16.msra.mxu2 %v6034_v21  ;;  %v6823_v36 = vld [vmem:[#allocation3 + $0x8fc] sm:$0xf0]  ;;  %v5782_v38 = vor.u32 %v6856_v31, %v5779_v32  ;;  %v5515_v39 = vld [vmem:[#allocation3 + $0x900] sm:$0xf0]  ;;  %v5521_v40 = vld [vmem:[#allocation3 + $0x808] sm:$0xf] }
  0x15   :  { %3161 = vmatpush.bf16.msra.mxu3 %v6038_v25  ;;  %v6824_v41 = vld [vmem:[#allocation3 + $0x904] sm:$0xf0]  ;;  %v6792_v42 = vld [vmem:[#allocation3 + $0x80c] sm:$0xf]  ;;  %v5514_v44 = vor.u32 %v6823_v36, %v5513_v35  ;;  %v5518_v45 = vor.u32 %v6791_v37, %v5515_v39  ;;  %v5257_v47 = vld [vmem:[#allocation3 + $0x600] sm:$0xf] }
  0x16   :  { %v5523_v43 = vld [vmem:[#allocation3 + $0x908] sm:$0xf0]  ;;  %v5522_v46 = vor.u32 %v6824_v41, %v5521_v40  ;;  %v6759_v48 = vld [vmem:[#allocation3 + $0x6fc] sm:$0xf0]  ;;  %v6727_v49 = vld [vmem:[#allocation3 + $0x604] sm:$0xf] }
  0x17   :  { %3123 = vmatpush.bf16.msra.mxu0 %v5770_v29  ;;  %3136 = vmatpush.bf16.msra.mxu1 %v5774_v33  ;;  %v5526_v50 = vor.u32 %v6792_v42, %v5523_v43  ;;  %v5259_v51 = vld [vmem:[#allocation3 + $0x700] sm:$0xf0]  ;;  %v5265_v52 = vld [vmem:[#allocation3 + $0x608] sm:$0xf]  ;;  %v6728_v54 = vld [vmem:[#allocation3 + $0x60c] sm:$0xf]  ;;  %v5258_v56 = vor.u32 %v6759_v48, %v5257_v47 }
  0x18   :  { %3149 = vmatpush.bf16.msra.mxu2 %v5778_v34  ;;  %v6760_v53 = vld [vmem:[#allocation3 + $0x704] sm:$0xf0]  ;;  %v5267_v55 = vld [vmem:[#allocation3 + $0x708] sm:$0xf0]  ;;  %v5262_v57 = vor.u32 %v6727_v49, %v5259_v51  ;;  %v5001_v59 = vld [vmem:[#allocation3 + $0x400] sm:$0xf] }
  0x19   :  { %3162 = vmatpush.bf16.msra.mxu3 %v5782_v38  ;;  %v5266_v58 = vor.u32 %v6760_v53, %v5265_v52  ;;  %v6695_v60 = vld [vmem:[#allocation3 + $0x4fc] sm:$0xf0]  ;;  %v6663_v61 = vld [vmem:[#allocation3 + $0x404] sm:$0xf]  ;;  %v5270_v62 = vor.u32 %v6728_v54, %v5267_v55  ;;  %v5009_v0 = vld [vmem:[#allocation3 + $0x408] sm:$0xf] }
  0x1a   :  { %v5003_v63 = vld [vmem:[#allocation3 + $0x500] sm:$0xf0]  ;;  %v6696_v1 = vld [vmem:[#allocation3 + $0x504] sm:$0xf0]  ;;  %v6664_v2 = vld [vmem:[#allocation3 + $0x40c] sm:$0xf]  ;;  %v5002_v4 = vor.u32 %v6695_v60, %v5001_v59 }
  0x1b   :  { %3124 = vmatpush.bf16.msra.mxu0 %v5514_v44  ;;  %3137 = vmatpush.bf16.msra.mxu1 %v5518_v45  ;;  %v5011_v3 = vld [vmem:[#allocation3 + $0x508] sm:$0xf0]  ;;  %v5006_v5 = vor.u32 %v6663_v61, %v5003_v63  ;;  %v5010_v6 = vor.u32 %v6696_v1, %v5009_v0  ;;  %v4745_v7 = vld [vmem:[#allocation3 + $0x200] sm:$0xf]  ;;  %v6599_v9 = vld [vmem:[#allocation3 + $0x204] sm:$0xf] }
  0x1c   :  { %3150 = vmatpush.bf16.msra.mxu2 %v5522_v46  ;;  %v6631_v8 = vld [vmem:[#allocation3 + $0x2fc] sm:$0xf0]  ;;  %v5014_v10 = vor.u32 %v6664_v2, %v5011_v3  ;;  %v4747_v11 = vld [vmem:[#allocation3 + $0x300] sm:$0xf0]  ;;  %v4753_v12 = vld [vmem:[#allocation3 + $0x208] sm:$0xf] }
  0x1d   :  { %3163 = vmatpush.bf16.msra.mxu3 %v5526_v50  ;;  %v6632_v13 = vld [vmem:[#allocation3 + $0x304] sm:$0xf0]  ;;  %v6600_v14 = vld [vmem:[#allocation3 + $0x20c] sm:$0xf]  ;;  %v4746_v16 = vor.u32 %v6631_v8, %v4745_v7  ;;  %v4489_v17 = vld [vmem:[#allocation3] sm:$0xf]  ;;  %v4750_v19 = vor.u32 %v6599_v9, %v4747_v11 }
  0x1e   :  { %v4755_v15 = vld [vmem:[#allocation3 + $0x308] sm:$0xf0]  ;;  %v6567_v18 = vld [vmem:[#allocation3 + $0xfc] sm:$0xf0]  ;;  %v4754_v20 = vor.u32 %v6632_v13, %v4753_v12  ;;  %v6535_v21 = vld [vmem:[#allocation3 + $0x4] sm:$0xf] }
  0x1f   :  { %3125 = vmatpush.bf16.msra.mxu0 %v5258_v56  ;;  %3138 = vmatpush.bf16.msra.mxu1 %v5262_v57  ;;  %v4491_v22 = vld [vmem:[#allocation3 + $0x100] sm:$0xf0]  ;;  %v4497_v23 = vld [vmem:[#allocation3 + $0x8] sm:$0xf]  ;;  %v4758_v24 = vor.u32 %v6600_v14, %v4755_v15  ;;  %v6536_v26 = vld [vmem:[#allocation3 + $0xc] sm:$0xf]  ;;  %v4490_v31 = vor.u32 %v6567_v18, %v4489_v17 }
  0x20   :  { %3151 = vmatpush.bf16.msra.mxu2 %v5266_v58  ;;  %v6568_v25 = vld [vmem:[#allocation3 + $0x104] sm:$0xf0]  ;;  %v4499_v27 = vld [vmem:[#allocation3 + $0x108] sm:$0xf0]  ;;  %v6297_v28 = vld [vmem:[#allocation3 + $0xe10] sm:$0xf]  ;;  %v4494_v35 = vor.u32 %v6535_v21, %v4491_v22 }
  0x21   :  { %3164 = vmatpush.bf16.msra.mxu3 %v5270_v62  ;;  %v7017_v29 = vld [vmem:[#allocation3 + $0xf0c] sm:$0xf0]  ;;  %v6985_v30 = vld [vmem:[#allocation3 + $0xe14] sm:$0xf]  ;;  %v6305_v33 = vld [vmem:[#allocation3 + $0xe18] sm:$0xf]  ;;  %v4498_v36 = vor.u32 %v6568_v25, %v4497_v23  ;;  %v4502_v39 = vor.u32 %v6536_v26, %v4499_v27 }
  0x22   :  { %v6299_v32 = vld [vmem:[#allocation3 + $0xf10] sm:$0xf0]  ;;  %v7018_v34 = vld [vmem:[#allocation3 + $0xf14] sm:$0xf0]  ;;  %v6986_v37 = vld [vmem:[#allocation3 + $0xe1c] sm:$0xf]  ;;  %v6298_v40 = vor.u32 %v7017_v29, %v6297_v28 }
  0x23   :  { %3126 = vmatpush.bf16.msra.mxu0 %v5002_v4  ;;  %3139 = vmatpush.bf16.msra.mxu1 %v5006_v5  ;;  %v6307_v38 = vld [vmem:[#allocation3 + $0xf18] sm:$0xf0]  ;;  %v6302_v41 = vor.u32 %v6985_v30, %v6299_v32  ;;  %v6306_v42 = vor.u32 %v7018_v34, %v6305_v33  ;;  %v6041_v43 = vld [vmem:[#allocation3 + $0xc10] sm:$0xf]  ;;  %v6921_v45 = vld [vmem:[#allocation3 + $0xc14] sm:$0xf] }
  0x24   :  { %3152 = vmatpush.bf16.msra.mxu2 %v5010_v6  ;;  %v6953_v44 = vld [vmem:[#allocation3 + $0xd0c] sm:$0xf0]  ;;  %v6310_v46 = vor.u32 %v6986_v37, %v6307_v38  ;;  %v6043_v47 = vld [vmem:[#allocation3 + $0xd10] sm:$0xf0]  ;;  %v6049_v48 = vld [vmem:[#allocation3 + $0xc18] sm:$0xf] }
  0x25   :  { %3165 = vmatpush.bf16.msra.mxu3 %v5014_v10  ;;  %v6954_v49 = vld [vmem:[#allocation3 + $0xd14] sm:$0xf0]  ;;  %v6922_v50 = vld [vmem:[#allocation3 + $0xc1c] sm:$0xf]  ;;  %v6042_v52 = vor.u32 %v6953_v44, %v6041_v43  ;;  %v5785_v53 = vld [vmem:[#allocation3 + $0xa10] sm:$0xf]  ;;  %v6046_v54 = vor.u32 %v6921_v45, %v6043_v47 }
  0x26   :  { %v6051_v51 = vld [vmem:[#allocation3 + $0xd18] sm:$0xf0]  ;;  %v6050_v55 = vor.u32 %v6954_v49, %v6049_v48  ;;  %v6889_v56 = vld [vmem:[#allocation3 + $0xb0c] sm:$0xf0]  ;;  %v6857_v57 = vld [vmem:[#allocation3 + $0xa14] sm:$0xf] }
  0x27   :  { %3127 = vmatpush.bf16.msra.mxu0 %v4746_v16  ;;  %3140 = vmatpush.bf16.msra.mxu1 %v4750_v19  ;;  %v7145_v58 = vld [vmem:[%s7421_s0] sm:$0x1]  ;;  %v6054_v59 = vor.u32 %v6922_v50, %v6051_v51  ;;  %v5787_v60 = vld [vmem:[#allocation3 + $0xb10] sm:$0xf0]  ;;  %v5793_v61 = vld [vmem:[#allocation3 + $0xa18] sm:$0xf]  ;;  %v5786_v1 = vor.u32 %v6889_v56, %v5785_v53 }
  0x28   :  { %3153 = vmatpush.bf16.msra.mxu2 %v4754_v20  ;;  %v6890_v62 = vld [vmem:[#allocation3 + $0xb14] sm:$0xf0]  ;;  %v6858_v63 = vld [vmem:[#allocation3 + $0xa1c] sm:$0xf]  ;;  %v5790_v2 = vor.u32 %v6857_v57, %v5787_v60  ;;  %v5529_v4 = vld [vmem:[#allocation3 + $0x810] sm:$0xf] }
  0x29   :  { %3166 = vmatpush.bf16.msra.mxu3 %v4758_v24  ;;  %v5795_v0 = vld [vmem:[#allocation3 + $0xb18] sm:$0xf0]  ;;  %v5794_v3 = vor.u32 %v6890_v62, %v5793_v61  ;;  %v6825_v5 = vld [vmem:[#allocation3 + $0x90c] sm:$0xf0]  ;;  %v6793_v6 = vld [vmem:[#allocation3 + $0x814] sm:$0xf] }
  0x2a   :  { %v5798_v7 = vor.u32 %v6858_v63, %v5795_v0  ;;  %v5531_v8 = vld [vmem:[#allocation3 + $0x910] sm:$0xf0]  ;;  %v5537_v9 = vld [vmem:[#allocation3 + $0x818] sm:$0xf]  ;;  %v6794_v11 = vld [vmem:[#allocation3 + $0x81c] sm:$0xf]  ;;  %v5530_v13 = vor.u32 %v6825_v5, %v5529_v4 }
  0x2b   :  { %3128 = vmatpush.bf16.msra.mxu0 %v4490_v31  ;;  %3141 = vmatpush.bf16.msra.mxu1 %v4494_v35  ;;  %v6826_v10 = vld [vmem:[#allocation3 + $0x914] sm:$0xf0]  ;;  %v5539_v12 = vld [vmem:[#allocation3 + $0x918] sm:$0xf0]  ;;  %v5534_v14 = vor.u32 %v6793_v6, %v5531_v8  ;;  %v5273_v16 = vld [vmem:[#allocation3 + $0x610] sm:$0xf] }
  0x2c   :  { %3154 = vmatpush.bf16.msra.mxu2 %v4498_v36  ;;  %v5538_v15 = vor.u32 %v6826_v10, %v5537_v9  ;;  %v6761_v17 = vld [vmem:[#allocation3 + $0x70c] sm:$0xf0]  ;;  %v6729_v18 = vld [vmem:[#allocation3 + $0x614] sm:$0xf]  ;;  %v5542_v19 = vor.u32 %v6794_v11, %v5539_v12  ;;  %v5281_v21 = vld [vmem:[#allocation3 + $0x618] sm:$0xf] }
  0x2d   :  { %3167 = vmatpush.bf16.msra.mxu3 %v4502_v39  ;;  %v5275_v20 = vld [vmem:[#allocation3 + $0x710] sm:$0xf0]  ;;  %v6762_v22 = vld [vmem:[#allocation3 + $0x714] sm:$0xf0]  ;;  %v6730_v23 = vld [vmem:[#allocation3 + $0x61c] sm:$0xf]  ;;  %v5274_v25 = vor.u32 %v6761_v17, %v5273_v16 }
  0x2e   :  { %3129 = vmatmul.bf16.vlgmr.msra.gmra.mxu0 %v7145_v58  ;;  %3142 = vmatmul.bf16.vlgmr.msra.gmra.mxu1 %v7145_v58  ;;  %v5283_v24 = vld [vmem:[#allocation3 + $0x718] sm:$0xf0]  ;;  %v5278_v26 = vor.u32 %v6729_v18, %v5275_v20  ;;  %v5282_v27 = vor.u32 %v6762_v22, %v5281_v21  ;;  %v5017_v28 = vld [vmem:[#allocation3 + $0x410] sm:$0xf]  ;;  %v6665_v30 = vld [vmem:[#allocation3 + $0x414] sm:$0xf] }
  0x2f   :  { %3173 = vmatpush.bf16.msrb.mxu0 %v6298_v40  ;;  %3186 = vmatpush.bf16.msrb.mxu1 %v6302_v41  ;;  %v6697_v29 = vld [vmem:[#allocation3 + $0x50c] sm:$0xf0]  ;;  %v5286_v31 = vor.u32 %v6730_v23, %v5283_v24  ;;  %v5019_v32 = vld [vmem:[#allocation3 + $0x510] sm:$0xf0]  ;;  %v5025_v33 = vld [vmem:[#allocation3 + $0x418] sm:$0xf] }
  0x30   :  { %3199 = vmatpush.bf16.msrb.mxu2 %v6306_v42  ;;  %3168 = vmatmul.bf16.vlgmr.msra.gmra.mxu3 %v7145_v58  ;;  %v6698_v34 = vld [vmem:[#allocation3 + $0x514] sm:$0xf0]  ;;  %v6666_v35 = vld [vmem:[#allocation3 + $0x41c] sm:$0xf]  ;;  %v5018_v37 = vor.u32 %v6697_v29, %v5017_v28  ;;  %v5022_v38 = vor.u32 %v6665_v30, %v5019_v32  ;;  %v4761_v40 = vld [vmem:[#allocation3 + $0x210] sm:$0xf] }
  0x31   :  { %3212 = vmatpush.bf16.msrb.mxu3 %v6310_v46  ;;  %3155 = vmatmul.bf16.vlgmr.msra.gmra.mxu2 %v7145_v58  ;;  %v5027_v36 = vld [vmem:[#allocation3 + $0x518] sm:$0xf0]  ;;  %v5026_v39 = vor.u32 %v6698_v34, %v5025_v33  ;;  %v6633_v41 = vld [vmem:[#allocation3 + $0x30c] sm:$0xf0]  ;;  %v6601_v42 = vld [vmem:[#allocation3 + $0x214] sm:$0xf] }
  0x32   :  { %v5030_v43 = vor.u32 %v6666_v35, %v5027_v36  ;;  %v4763_v44 = vld [vmem:[#allocation3 + $0x310] sm:$0xf0]  ;;  %v4769_v45 = vld [vmem:[#allocation3 + $0x218] sm:$0xf]  ;;  %v6602_v47 = vld [vmem:[#allocation3 + $0x21c] sm:$0xf]  ;;  %v4762_v49 = vor.u32 %v6633_v41, %v4761_v40 }
  0x33   :  { %3174 = vmatpush.bf16.msrb.mxu0 %v6042_v52  ;;  %3187 = vmatpush.bf16.msrb.mxu1 %v6046_v54  ;;  %v6634_v46 = vld [vmem:[#allocation3 + $0x314] sm:$0xf0]  ;;  %v4771_v48 = vld [vmem:[#allocation3 + $0x318] sm:$0xf0]  ;;  %v4505_v50 = vld [vmem:[#allocation3 + $0x10] sm:$0xf]  ;;  %v4766_v52 = vor.u32 %v6601_v42, %v4763_v44 }
  0x34   :  { %3200 = vmatpush.bf16.msrb.mxu2 %v6050_v55  ;;  %v6569_v51 = vld [vmem:[#allocation3 + $0x10c] sm:$0xf0]  ;;  %v4770_v53 = vor.u32 %v6634_v46, %v4769_v45  ;;  %v6537_v54 = vld [vmem:[#allocation3 + $0x14] sm:$0xf]  ;;  %v4513_v56 = vld [vmem:[#allocation3 + $0x18] sm:$0xf]  ;;  %v4774_v57 = vor.u32 %v6602_v47, %v4771_v48 }
  0x35   :  { %3213 = vmatpush.bf16.msrb.mxu3 %v6054_v59  ;;  %v4507_v55 = vld [vmem:[#allocation3 + $0x110] sm:$0xf0]  ;;  %v6570_v59 = vld [vmem:[#allocation3 + $0x114] sm:$0xf0]  ;;  %v6538_v60 = vld [vmem:[#allocation3 + $0x1c] sm:$0xf] }
  0x36   :  { %v4515_v61 = vld [vmem:[#allocation3 + $0x118] sm:$0xf0]  ;;  %v6313_v62 = vld [vmem:[#allocation3 + $0xe20] sm:$0xf]  ;;  %v6987_v0 = vld [vmem:[#allocation3 + $0xe24] sm:$0xf]  ;;  %v4510_v5 = vor.u32 %v6537_v54, %v4507_v55  ;;  %v4514_v6 = vor.u32 %v6570_v59, %v4513_v56 }
  0x37   :  { %3175 = vmatpush.bf16.msrb.mxu0 %v5786_v1  ;;  %3188 = vmatpush.bf16.msrb.mxu1 %v5790_v2  ;;  %v7019_v63 = vld [vmem:[#allocation3 + $0xf1c] sm:$0xf0]  ;;  %v4506_v1 = vor.u32 %v6569_v51, %v4505_v50  ;;  %v6315_v2 = vld [vmem:[#allocation3 + $0xf20] sm:$0xf0]  ;;  %v7020_v4 = vld [vmem:[#allocation3 + $0xf24] sm:$0xf0]  ;;  %v4518_v9 = vor.u32 %v6538_v60, %v4515_v61 }
  0x38   :  { %3201 = vmatpush.bf16.msrb.mxu2 %v5794_v3  ;;  %v6321_v3 = vld [vmem:[#allocation3 + $0xe28] sm:$0xf]  ;;  %v6323_v8 = vld [vmem:[#allocation3 + $0xf28] sm:$0xf0]  ;;  %v6314_v10 = vor.u32 %v7019_v63, %v6313_v62  ;;  %v6318_v11 = vor.u32 %v6987_v0, %v6315_v2  ;;  %v6059_v17 = vld [vmem:[#allocation3 + $0xd20] sm:$0xf0] }
  0x39   :  { %3214 = vmatpush.bf16.msrb.mxu3 %v5798_v7  ;;  %v6988_v7 = vld [vmem:[#allocation3 + $0xe2c] sm:$0xf]  ;;  %v6322_v12 = vor.u32 %v7020_v4, %v6321_v3  ;;  %v6065_v18 = vld [vmem:[#allocation3 + $0xc28] sm:$0xf]  ;;  %v5803_v29 = vld [vmem:[#allocation3 + $0xb20] sm:$0xf0] }
  0x3a   :  { %v6326_v16 = vor.u32 %v6988_v7, %v6323_v8  ;;  %v6924_v20 = vld [vmem:[#allocation3 + $0xc2c] sm:$0xf]  ;;  %v5809_v30 = vld [vmem:[#allocation3 + $0xa28] sm:$0xf]  ;;  %v5547_v41 = vld [vmem:[#allocation3 + $0x920] sm:$0xf0] }
  0x3b   :  { %3176 = vmatpush.bf16.msrb.mxu0 %v5530_v13  ;;  %3189 = vmatpush.bf16.msrb.mxu1 %v5534_v14  ;;  %v6057_v13 = vld [vmem:[#allocation3 + $0xc20] sm:$0xf]  ;;  %v6067_v21 = vld [vmem:[#allocation3 + $0xd28] sm:$0xf0]  ;;  %v5553_v42 = vld [vmem:[#allocation3 + $0x828] sm:$0xf] }
  0x3c   :  { %3202 = vmatpush.bf16.msrb.mxu2 %v5538_v15  ;;  %v6955_v14 = vld [vmem:[#allocation3 + $0xd1c] sm:$0xf0]  ;;  %v6923_v15 = vld [vmem:[#allocation3 + $0xc24] sm:$0xf]  ;;  %v6070_v28 = vor.u32 %v6924_v20, %v6067_v21  ;;  %v6860_v32 = vld [vmem:[#allocation3 + $0xa2c] sm:$0xf] }
  0x3d   :  { %3215 = vmatpush.bf16.msrb.mxu3 %v5542_v19  ;;  %v6956_v19 = vld [vmem:[#allocation3 + $0xd24] sm:$0xf0]  ;;  %v6058_v22 = vor.u32 %v6955_v14, %v6057_v13  ;;  %v6062_v23 = vor.u32 %v6923_v15, %v6059_v17  ;;  %v5811_v33 = vld [vmem:[#allocation3 + $0xb28] sm:$0xf0]  ;;  %v6763_v50 = vld [vmem:[#allocation3 + $0x71c] sm:$0xf0] }
  0x3e   :  { %v6066_v24 = vor.u32 %v6956_v19, %v6065_v18  ;;  %v5814_v40 = vor.u32 %v6860_v32, %v5811_v33  ;;  %v6796_v44 = vld [vmem:[#allocation3 + $0x82c] sm:$0xf]  ;;  %v6731_v51 = vld [vmem:[#allocation3 + $0x624] sm:$0xf]  ;;  %v5297_v54 = vld [vmem:[#allocation3 + $0x628] sm:$0xf] }
  0x3f   :  { %3177 = vmatpush.bf16.msrb.mxu0 %v5274_v25  ;;  %3190 = vmatpush.bf16.msrb.mxu1 %v5278_v26  ;;  %v5801_v25 = vld [vmem:[#allocation3 + $0xa20] sm:$0xf]  ;;  %v5555_v45 = vld [vmem:[#allocation3 + $0x928] sm:$0xf0]  ;;  %v6764_v55 = vld [vmem:[#allocation3 + $0x724] sm:$0xf0] }
  0x40   :  { %3203 = vmatpush.bf16.msrb.mxu2 %v5282_v27  ;;  %v6891_v26 = vld [vmem:[#allocation3 + $0xb1c] sm:$0xf0]  ;;  %v6859_v27 = vld [vmem:[#allocation3 + $0xa24] sm:$0xf]  ;;  %v6732_v56 = vld [vmem:[#allocation3 + $0x62c] sm:$0xf]  ;;  %v5298_v61 = vor.u32 %v6764_v55, %v5297_v54 }
  0x41   :  { %3216 = vmatpush.bf16.msrb.mxu3 %v5286_v31  ;;  %v6892_v31 = vld [vmem:[#allocation3 + $0xb24] sm:$0xf0]  ;;  %v5802_v34 = vor.u32 %v6891_v26, %v5801_v25  ;;  %v5806_v35 = vor.u32 %v6859_v27, %v5803_v29  ;;  %v5033_v62 = vld [vmem:[#allocation3 + $0x420] sm:$0xf]  ;;  %v6667_v0 = vld [vmem:[#allocation3 + $0x424] sm:$0xf] }
  0x42   :  { %v5810_v36 = vor.u32 %v6892_v31, %v5809_v30  ;;  %v6699_v63 = vld [vmem:[#allocation3 + $0x51c] sm:$0xf0]  ;;  %v5035_v2 = vld [vmem:[#allocation3 + $0x520] sm:$0xf0]  ;;  %v5041_v3 = vld [vmem:[#allocation3 + $0x428] sm:$0xf] }
  0x43   :  { %3178 = vmatpush.bf16.msrb.mxu0 %v5018_v37  ;;  %3191 = vmatpush.bf16.msrb.mxu1 %v5022_v38  ;;  %v5545_v37 = vld [vmem:[#allocation3 + $0x820] sm:$0xf]  ;;  %v6700_v4 = vld [vmem:[#allocation3 + $0x524] sm:$0xf0]  ;;  %v5034_v7 = vor.u32 %v6699_v63, %v5033_v62  ;;  %v5038_v8 = vor.u32 %v6667_v0, %v5035_v2  ;;  %v4779_v14 = vld [vmem:[#allocation3 + $0x320] sm:$0xf0] }
  0x44   :  { %3204 = vmatpush.bf16.msrb.mxu2 %v5026_v39  ;;  %v6827_v38 = vld [vmem:[#allocation3 + $0x91c] sm:$0xf0]  ;;  %v6795_v39 = vld [vmem:[#allocation3 + $0x824] sm:$0xf]  ;;  %v4785_v15 = vld [vmem:[#allocation3 + $0x228] sm:$0xf] }
  0x45   :  { %3217 = vmatpush.bf16.msrb.mxu3 %v5030_v43  ;;  %v6828_v43 = vld [vmem:[#allocation3 + $0x924] sm:$0xf0]  ;;  %v5546_v46 = vor.u32 %v6827_v38, %v5545_v37  ;;  %v5550_v47 = vor.u32 %v6795_v39, %v5547_v41  ;;  %v6604_v17 = vld [vmem:[#allocation3 + $0x22c] sm:$0xf]  ;;  %v4521_v20 = vld [vmem:[#allocation3 + $0x20] sm:$0xf] }
  0x46   :  { %v5554_v48 = vor.u32 %v6828_v43, %v5553_v42  ;;  %v4787_v18 = vld [vmem:[#allocation3 + $0x328] sm:$0xf0]  ;;  %v6571_v21 = vld [vmem:[#allocation3 + $0x11c] sm:$0xf0]  ;;  %v4523_v25 = vld [vmem:[#allocation3 + $0x120] sm:$0xf0] }
  0x47   :  { %3179 = vmatpush.bf16.msrb.mxu0 %v4762_v49  ;;  %3192 = vmatpush.bf16.msrb.mxu1 %v4766_v52  ;;  %v5289_v49 = vld [vmem:[#allocation3 + $0x620] sm:$0xf]  ;;  %v5558_v52 = vor.u32 %v6796_v44, %v5555_v45  ;;  %v4529_v26 = vld [vmem:[#allocation3 + $0x28] sm:$0xf]  ;;  %v4790_v27 = vor.u32 %v6604_v17, %v4787_v18  ;;  %v6540_v29 = vld [vmem:[#allocation3 + $0x2c] sm:$0xf] }
  0x48   :  { %3205 = vmatpush.bf16.msrb.mxu2 %v4770_v53  ;;  %v5291_v53 = vld [vmem:[#allocation3 + $0x720] sm:$0xf0]  ;;  %v5290_v59 = vor.u32 %v6763_v50, %v5289_v49  ;;  %v4531_v30 = vld [vmem:[#allocation3 + $0x128] sm:$0xf0]  ;;  %v6329_v31 = vld [vmem:[#allocation3 + $0xe30] sm:$0xf] }
  0x49   :  { %3218 = vmatpush.bf16.msrb.mxu3 %v4774_v57  ;;  %v5299_v57 = vld [vmem:[#allocation3 + $0x728] sm:$0xf0]  ;;  %v5294_v60 = vor.u32 %v6731_v51, %v5291_v53  ;;  %v7021_v32 = vld [vmem:[#allocation3 + $0xf2c] sm:$0xf0]  ;;  %v6989_v33 = vld [vmem:[#allocation3 + $0xe34] sm:$0xf]  ;;  %v4534_v42 = vor.u32 %v6540_v29, %v4531_v30 }
  0x4a   :  { %v7022_v37 = vld [vmem:[#allocation3 + $0xf34] sm:$0xf0]  ;;  %v6339_v41 = vld [vmem:[#allocation3 + $0xf38] sm:$0xf0]  ;;  %v6330_v43 = vor.u32 %v7021_v32, %v6329_v31  ;;  %v6075_v50 = vld [vmem:[#allocation3 + $0xd30] sm:$0xf0] }
  0x4b   :  { %3180 = vmatpush.bf16.msrb.mxu0 %v4506_v1  ;;  %3193 = vmatpush.bf16.msrb.mxu1 %v4510_v5  ;;  %v5302_v1 = vor.u32 %v6732_v56, %v5299_v57  ;;  %v6668_v5 = vld [vmem:[#allocation3 + $0x42c] sm:$0xf]  ;;  %v6081_v51 = vld [vmem:[#allocation3 + $0xc38] sm:$0xf]  ;;  %v6926_v53 = vld [vmem:[#allocation3 + $0xc3c] sm:$0xf] }
  0x4c   :  { %3206 = vmatpush.bf16.msrb.mxu2 %v4514_v6  ;;  %v5043_v6 = vld [vmem:[#allocation3 + $0x528] sm:$0xf0]  ;;  %v6083_v54 = vld [vmem:[#allocation3 + $0xd38] sm:$0xf0]  ;;  %v5819_v63 = vld [vmem:[#allocation3 + $0xb30] sm:$0xf0] }
  0x4d   :  { %3219 = vmatpush.bf16.msrb.mxu3 %v4518_v9  ;;  %v5042_v9 = vor.u32 %v6700_v4, %v5041_v3  ;;  %v5046_v13 = vor.u32 %v6668_v5, %v5043_v6  ;;  %v6086_v62 = vor.u32 %v6926_v53, %v6083_v54  ;;  %v5825_v0 = vld [vmem:[#allocation3 + $0xa38] sm:$0xf]  ;;  %v6862_v2 = vld [vmem:[#allocation3 + $0xa3c] sm:$0xf]  ;;  %v5049_v31 = vld [vmem:[#allocation3 + $0x430] sm:$0xf] }
  0x4e   :  { %3181 = vmatmul.bf16.vlgmr.msrb.gmra.mxu0 %v7145_v58  ;;  %3194 = vmatmul.bf16.vlgmr.msrb.gmra.mxu1 %v7145_v58  ;;  %v5827_v3 = vld [vmem:[#allocation3 + $0xb38] sm:$0xf0]  ;;  %v6701_v32 = vld [vmem:[#allocation3 + $0x52c] sm:$0xf0]  ;;  %vm4345_vm0 = vcmask 1041408   ;;  %vm4479_vm1 = vcmask 0  }
  0x4f   :  { %3225 = vmatpush.bf16.msra.mxu0 %v6314_v10  ;;  %3238 = vmatpush.bf16.msra.mxu1 %v6318_v11  ;;  %v4777_v10 = vld [vmem:[#allocation3 + $0x220] sm:$0xf]  ;;  %v4537_v53 = vld [vmem:[#allocation3 + $0x30] sm:$0xf] }
  0x50   :  { %3251 = vmatpush.bf16.msra.mxu2 %v6322_v12  ;;  %3220 = vmatmul.bf16.vlgmr.msrb.gmra.mxu3 %v7145_v58  ;;  %v6635_v11 = vld [vmem:[#allocation3 + $0x31c] sm:$0xf0]  ;;  %v6603_v12 = vld [vmem:[#allocation3 + $0x224] sm:$0xf]  ;;  %v6573_v54 = vld [vmem:[#allocation3 + $0x12c] sm:$0xf0] }
  0x51   :  { %3264 = vmatpush.bf16.msra.mxu3 %v6326_v16  ;;  %3207 = vmatmul.bf16.vlgmr.msrb.gmra.mxu2 %v7145_v58  ;;  %v6636_v16 = vld [vmem:[#allocation3 + $0x324] sm:$0xf0]  ;;  %v4778_v19 = vor.u32 %v6635_v11, %v4777_v10  ;;  %v5830_v10 = vor.u32 %v6862_v2, %v5827_v3  ;;  %v5563_v11 = vld [vmem:[#allocation3 + $0x930] sm:$0xf0]  ;;  %v7023_v2 = vld [vmem:[#allocation3 + $0xf3c] sm:$0xf0] }
  0x52   :  { %v6991_v3 = vld [vmem:[#allocation3 + $0xe44] sm:$0xf] }
  0x53   :  { %3226 = vmatpush.bf16.msra.mxu0 %v6058_v22  ;;  %3239 = vmatpush.bf16.msra.mxu1 %v6062_v23  ;;  %v4782_v22 = vor.u32 %v6603_v12, %v4779_v14  ;;  %v4786_v23 = vor.u32 %v6636_v16, %v4785_v15  ;;  %v5569_v12 = vld [vmem:[#allocation3 + $0x838] sm:$0xf]  ;;  %v6798_v14 = vld [vmem:[#allocation3 + $0x83c] sm:$0xf] }
  0x54   :  { %3252 = vmatpush.bf16.msra.mxu2 %v6066_v24  ;;  %v6539_v24 = vld [vmem:[#allocation3 + $0x24] sm:$0xf]  ;;  %v5571_v15 = vld [vmem:[#allocation3 + $0x938] sm:$0xf0] }
  0x55   :  { %3265 = vmatpush.bf16.msra.mxu3 %v6070_v28  ;;  %v6572_v28 = vld [vmem:[#allocation3 + $0x124] sm:$0xf0]  ;;  %v4526_v38 = vor.u32 %v6539_v24, %v4523_v25  ;;  %v5313_v24 = vld [vmem:[#allocation3 + $0x638] sm:$0xf] }
  0x56   :  { %v4530_v39 = vor.u32 %v6572_v28, %v4529_v26  ;;  %v6766_v25 = vld [vmem:[#allocation3 + $0x734] sm:$0xf0]  ;;  %v6734_v26 = vld [vmem:[#allocation3 + $0x63c] sm:$0xf] }
  0x57   :  { %3227 = vmatpush.bf16.msra.mxu0 %v5802_v34  ;;  %3240 = vmatpush.bf16.msra.mxu1 %v5806_v35  ;;  %v4522_v34 = vor.u32 %v6571_v21, %v4521_v20  ;;  %v6331_v35 = vld [vmem:[#allocation3 + $0xf30] sm:$0xf0]  ;;  %v6765_v20 = vld [vmem:[#allocation3 + $0x72c] sm:$0xf0]  ;;  %v5314_v30 = vor.u32 %v6766_v25, %v5313_v24  ;;  %v6099_v24 = vld [vmem:[#allocation3 + $0xd48] sm:$0xf0] }
  0x58   :  { %3253 = vmatpush.bf16.msra.mxu2 %v5810_v36  ;;  %v6337_v36 = vld [vmem:[#allocation3 + $0xe38] sm:$0xf]  ;;  %v6334_v44 = vor.u32 %v6989_v33, %v6331_v35  ;;  %v6733_v21 = vld [vmem:[#allocation3 + $0x634] sm:$0xf] }
  0x59   :  { %3266 = vmatpush.bf16.msra.mxu3 %v5814_v40  ;;  %v6990_v40 = vld [vmem:[#allocation3 + $0xe3c] sm:$0xf]  ;;  %v6338_v45 = vor.u32 %v7022_v37, %v6337_v36  ;;  %v6669_v33 = vld [vmem:[#allocation3 + $0x434] sm:$0xf]  ;;  %v5057_v36 = vld [vmem:[#allocation3 + $0x438] sm:$0xf] }
  0x5a   :  { %v6342_v49 = vor.u32 %v6990_v40, %v6339_v41  ;;  %v5051_v35 = vld [vmem:[#allocation3 + $0x530] sm:$0xf0]  ;;  %v6702_v37 = vld [vmem:[#allocation3 + $0x534] sm:$0xf0]  ;;  %v5050_v40 = vor.u32 %v6701_v32, %v5049_v31  ;;  %v5835_v32 = vld [vmem:[#allocation3 + $0xb40] sm:$0xf0] }
  0x5b   :  { %3228 = vmatpush.bf16.msra.mxu0 %v5546_v46  ;;  %3241 = vmatpush.bf16.msra.mxu1 %v5550_v47  ;;  %v6073_v46 = vld [vmem:[#allocation3 + $0xc30] sm:$0xf]  ;;  %v5054_v41 = vor.u32 %v6669_v33, %v5051_v35  ;;  %v5841_v33 = vld [vmem:[#allocation3 + $0xa48] sm:$0xf]  ;;  %v6864_v35 = vld [vmem:[#allocation3 + $0xa4c] sm:$0xf] }
  0x5c   :  { %3254 = vmatpush.bf16.msra.mxu2 %v5554_v48  ;;  %v6957_v47 = vld [vmem:[#allocation3 + $0xd2c] sm:$0xf0]  ;;  %v6925_v48 = vld [vmem:[#allocation3 + $0xc34] sm:$0xf] }
  0x5d   :  { %3267 = vmatpush.bf16.msra.mxu3 %v5558_v52  ;;  %v6958_v52 = vld [vmem:[#allocation3 + $0xd34] sm:$0xf0]  ;;  %v6074_v55 = vor.u32 %v6957_v47, %v6073_v46  ;;  %v6078_v56 = vor.u32 %v6925_v48, %v6075_v50  ;;  %v4795_v47 = vld [vmem:[#allocation3 + $0x330] sm:$0xf0]  ;;  %v6606_v50 = vld [vmem:[#allocation3 + $0x23c] sm:$0xf] }
  0x5e   :  { %v6082_v57 = vor.u32 %v6958_v52, %v6081_v51  ;;  %v4801_v48 = vld [vmem:[#allocation3 + $0x238] sm:$0xf]  ;;  %v4803_v51 = vld [vmem:[#allocation3 + $0x338] sm:$0xf0] }
  0x5f   :  { %3229 = vmatpush.bf16.msra.mxu0 %v5290_v59  ;;  %3242 = vmatpush.bf16.msra.mxu1 %v5294_v60  ;;  %v5817_v59 = vld [vmem:[#allocation3 + $0xa30] sm:$0xf] }
  0x60   :  { %3255 = vmatpush.bf16.msra.mxu2 %v5298_v61  ;;  %v6893_v60 = vld [vmem:[#allocation3 + $0xb2c] sm:$0xf0]  ;;  %v6861_v61 = vld [vmem:[#allocation3 + $0xa34] sm:$0xf] }
  0x61   :  { %3268 = vmatpush.bf16.msra.mxu3 %v5302_v1  ;;  %v6894_v1 = vld [vmem:[#allocation3 + $0xb34] sm:$0xf0]  ;;  %v5818_v4 = vor.u32 %v6893_v60, %v5817_v59  ;;  %v5822_v5 = vor.u32 %v6861_v61, %v5819_v63  ;;  %v4539_v59 = vld [vmem:[#allocation3 + $0x130] sm:$0xf0]  ;;  %v4806_v61 = vor.u32 %v6606_v50, %v4803_v51  ;;  %v6542_v63 = vld [vmem:[#allocation3 + $0x3c] sm:$0xf] }
  0x62   :  { %v5826_v6 = vor.u32 %v6894_v1, %v5825_v0  ;;  %v4545_v60 = vld [vmem:[#allocation3 + $0x38] sm:$0xf]  ;;  %v4547_v0 = vld [vmem:[#allocation3 + $0x138] sm:$0xf0]  ;;  %v6345_v1 = vld [vmem:[#allocation3 + $0xe40] sm:$0xf] }
  0x63   :  { %3230 = vmatpush.bf16.msra.mxu0 %v5034_v7  ;;  %3243 = vmatpush.bf16.msra.mxu1 %v5038_v8  ;;  %v5561_v7 = vld [vmem:[#allocation3 + $0x830] sm:$0xf]  ;;  %v5321_v51 = vld [vmem:[#allocation3 + $0x640] sm:$0xf] }
  0x64   :  { %3256 = vmatpush.bf16.msra.mxu2 %v5042_v9  ;;  %v6829_v8 = vld [vmem:[#allocation3 + $0x92c] sm:$0xf0]  ;;  %v6797_v9 = vld [vmem:[#allocation3 + $0x834] sm:$0xf] }
  0x65   :  { %3269 = vmatpush.bf16.msra.mxu3 %v5046_v13  ;;  %v6830_v13 = vld [vmem:[#allocation3 + $0x934] sm:$0xf0]  ;;  %v5562_v16 = vor.u32 %v6829_v8, %v5561_v7  ;;  %v5566_v17 = vor.u32 %v6797_v9, %v5563_v11  ;;  %v7024_v7 = vld [vmem:[#allocation3 + $0xf44] sm:$0xf0]  ;;  %v6355_v11 = vld [vmem:[#allocation3 + $0xf48] sm:$0xf0] }
  0x66   :  { %v5570_v18 = vor.u32 %v6830_v13, %v5569_v12  ;;  %v4550_v12 = vor.u32 %v6542_v63, %v4547_v0  ;;  %v6346_v13 = vor.u32 %v7023_v2, %v6345_v1  ;;  %v5065_v0 = vld [vmem:[#allocation3 + $0x440] sm:$0xf]  ;;  %v6671_v2 = vld [vmem:[#allocation3 + $0x444] sm:$0xf] }
  0x67   :  { %3231 = vmatpush.bf16.msra.mxu0 %v4778_v19  ;;  %3244 = vmatpush.bf16.msra.mxu1 %v4782_v22  ;;  %v5305_v19 = vld [vmem:[#allocation3 + $0x630] sm:$0xf]  ;;  %v5574_v22 = vor.u32 %v6798_v14, %v5571_v15  ;;  %v6703_v1 = vld [vmem:[#allocation3 + $0x53c] sm:$0xf0] }
  0x68   :  { %3257 = vmatpush.bf16.msra.mxu2 %v4786_v23  ;;  %v5307_v23 = vld [vmem:[#allocation3 + $0x730] sm:$0xf0]  ;;  %v5306_v28 = vor.u32 %v6765_v20, %v5305_v19  ;;  %v6091_v20 = vld [vmem:[#allocation3 + $0xd40] sm:$0xf0] }
  0x69   :  { %3270 = vmatpush.bf16.msra.mxu3 %v4790_v27  ;;  %v5315_v27 = vld [vmem:[#allocation3 + $0x738] sm:$0xf0]  ;;  %v5310_v29 = vor.u32 %v6733_v21, %v5307_v23  ;;  %v6097_v21 = vld [vmem:[#allocation3 + $0xc48] sm:$0xf]  ;;  %v6928_v23 = vld [vmem:[#allocation3 + $0xc4c] sm:$0xf] }
  0x6a   :  { %v6102_v31 = vor.u32 %v6928_v23, %v6099_v24  ;;  %v6575_v23 = vld [vmem:[#allocation3 + $0x13c] sm:$0xf0] }
  0x6b   :  { %3232 = vmatpush.bf16.msra.mxu0 %v4522_v34  ;;  %3245 = vmatpush.bf16.msra.mxu1 %v4526_v38  ;;  %v5318_v34 = vor.u32 %v6734_v26, %v5315_v27  ;;  %v6670_v38 = vld [vmem:[#allocation3 + $0x43c] sm:$0xf] }
  0x6c   :  { %3258 = vmatpush.bf16.msra.mxu2 %v4530_v39  ;;  %v5059_v39 = vld [vmem:[#allocation3 + $0x538] sm:$0xf0] }
  0x6d   :  { %3271 = vmatpush.bf16.msra.mxu3 %v4534_v42  ;;  %v5058_v42 = vor.u32 %v6702_v37, %v5057_v36  ;;  %v5062_v46 = vor.u32 %v6670_v38, %v5059_v39  ;;  %v5843_v36 = vld [vmem:[#allocation3 + $0xb48] sm:$0xf0] }
  0x6e   :  { %3233 = vmatmul.bf16.vlgmr.msra.gmra.mxu0 %v7145_v58  ;;  %3246 = vmatmul.bf16.vlgmr.msra.gmra.mxu1 %v7145_v58 }
  0x6f   :  { %3277 = vmatpush.bf16.msrb.mxu0 %v6330_v43  ;;  %3290 = vmatpush.bf16.msrb.mxu1 %v6334_v44  ;;  %v4793_v43 = vld [vmem:[#allocation3 + $0x230] sm:$0xf] }
  0x70   :  { %3303 = vmatpush.bf16.msrb.mxu2 %v6338_v45  ;;  %3272 = vmatmul.bf16.vlgmr.msra.gmra.mxu3 %v7145_v58  ;;  %v6637_v44 = vld [vmem:[#allocation3 + $0x32c] sm:$0xf0]  ;;  %v6605_v45 = vld [vmem:[#allocation3 + $0x234] sm:$0xf] }
  0x71   :  { %3316 = vmatpush.bf16.msrb.mxu3 %v6342_v49  ;;  %3259 = vmatmul.bf16.vlgmr.msra.gmra.mxu2 %v7145_v58  ;;  %v6638_v49 = vld [vmem:[#allocation3 + $0x334] sm:$0xf0]  ;;  %v4794_v52 = vor.u32 %v6637_v44, %v4793_v43  ;;  %v5846_v43 = vor.u32 %v6864_v35, %v5843_v36  ;;  %v5579_v44 = vld [vmem:[#allocation3 + $0x940] sm:$0xf0]  ;;  %v6993_v35 = vld [vmem:[#allocation3 + $0xe54] sm:$0xf] }
  0x73   :  { %3278 = vmatpush.bf16.msrb.mxu0 %v6074_v55  ;;  %3291 = vmatpush.bf16.msrb.mxu1 %v6078_v56  ;;  %v4798_v55 = vor.u32 %v6605_v45, %v4795_v47  ;;  %v4802_v56 = vor.u32 %v6638_v49, %v4801_v48  ;;  %v5585_v45 = vld [vmem:[#allocation3 + $0x848] sm:$0xf]  ;;  %v6800_v47 = vld [vmem:[#allocation3 + $0x84c] sm:$0xf] }
  0x74   :  { %3304 = vmatpush.bf16.msrb.mxu2 %v6082_v57  ;;  %v6541_v57 = vld [vmem:[#allocation3 + $0x34] sm:$0xf]  ;;  %v5587_v48 = vld [vmem:[#allocation3 + $0x948] sm:$0xf0] }
  0x75   :  { %3317 = vmatpush.bf16.msrb.mxu3 %v6086_v62  ;;  %v6574_v62 = vld [vmem:[#allocation3 + $0x134] sm:$0xf0]  ;;  %v4542_v8 = vor.u32 %v6541_v57, %v4539_v59  ;;  %v6768_v57 = vld [vmem:[#allocation3 + $0x744] sm:$0xf0]  ;;  %v6736_v59 = vld [vmem:[#allocation3 + $0x64c] sm:$0xf] }
  0x76   :  { %v4546_v9 = vor.u32 %v6574_v62, %v4545_v60  ;;  %v5331_v60 = vld [vmem:[#allocation3 + $0x748] sm:$0xf0] }
  0x77   :  { %3279 = vmatpush.bf16.msrb.mxu0 %v5818_v4  ;;  %3292 = vmatpush.bf16.msrb.mxu1 %v5822_v5  ;;  %v4538_v4 = vor.u32 %v6573_v54, %v4537_v53  ;;  %v6347_v5 = vld [vmem:[#allocation3 + $0xf40] sm:$0xf0]  ;;  %v5590_v54 = vor.u32 %v6800_v47, %v5587_v48  ;;  %v6105_v48 = vld [vmem:[#allocation3 + $0xc50] sm:$0xf] }
  0x78   :  { %3305 = vmatpush.bf16.msrb.mxu2 %v5826_v6  ;;  %v6353_v6 = vld [vmem:[#allocation3 + $0xe48] sm:$0xf]  ;;  %v6350_v14 = vor.u32 %v6991_v3, %v6347_v5  ;;  %v6735_v53 = vld [vmem:[#allocation3 + $0x644] sm:$0xf]  ;;  %v5334_v3 = vor.u32 %v6736_v59, %v5331_v60 }
  0x79   :  { %3318 = vmatpush.bf16.msrb.mxu3 %v5830_v10  ;;  %v6992_v10 = vld [vmem:[#allocation3 + $0xe4c] sm:$0xf]  ;;  %v6354_v15 = vor.u32 %v7024_v7, %v6353_v6  ;;  %v5073_v5 = vld [vmem:[#allocation3 + $0x448] sm:$0xf] }
  0x7a   :  { %v6358_v19 = vor.u32 %v6992_v10, %v6355_v11  ;;  %v6704_v6 = vld [vmem:[#allocation3 + $0x544] sm:$0xf0]  ;;  %v6672_v7 = vld [vmem:[#allocation3 + $0x44c] sm:$0xf] }
  0x7b   :  { %3280 = vmatpush.bf16.msrb.mxu0 %v5562_v16  ;;  %3293 = vmatpush.bf16.msrb.mxu1 %v5566_v17  ;;  %v6089_v16 = vld [vmem:[#allocation3 + $0xc40] sm:$0xf]  ;;  %v5074_v11 = vor.u32 %v6704_v6, %v5073_v5  ;;  %v6866_v6 = vld [vmem:[#allocation3 + $0xa5c] sm:$0xf] }
  0x7c   :  { %3306 = vmatpush.bf16.msrb.mxu2 %v5570_v18  ;;  %v6959_v17 = vld [vmem:[#allocation3 + $0xd3c] sm:$0xf0]  ;;  %v6927_v18 = vld [vmem:[#allocation3 + $0xc44] sm:$0xf] }
  0x7d   :  { %3319 = vmatpush.bf16.msrb.mxu3 %v5574_v22  ;;  %v6960_v22 = vld [vmem:[#allocation3 + $0xd44] sm:$0xf0]  ;;  %v6090_v25 = vor.u32 %v6959_v17, %v6089_v16  ;;  %v6094_v26 = vor.u32 %v6927_v18, %v6091_v20  ;;  %v4811_v16 = vld [vmem:[#allocation3 + $0x340] sm:$0xf0]  ;;  %v4819_v20 = vld [vmem:[#allocation3 + $0x348] sm:$0xf0] }
  0x7e   :  { %v6098_v27 = vor.u32 %v6960_v22, %v6097_v21  ;;  %v4817_v17 = vld [vmem:[#allocation3 + $0x248] sm:$0xf]  ;;  %v4553_v22 = vld [vmem:[#allocation3 + $0x40] sm:$0xf] }
  0x7f   :  { %3281 = vmatpush.bf16.msrb.mxu0 %v5306_v28  ;;  %3294 = vmatpush.bf16.msrb.mxu1 %v5310_v29  ;;  %v5833_v28 = vld [vmem:[#allocation3 + $0xa40] sm:$0xf]  ;;  %v6640_v18 = vld [vmem:[#allocation3 + $0x344] sm:$0xf0]  ;;  %v4554_v36 = vor.u32 %v6575_v23, %v4553_v22  ;;  %v5337_v23 = vld [vmem:[#allocation3 + $0x650] sm:$0xf] }
  0x80   :  { %3307 = vmatpush.bf16.msrb.mxu2 %v5314_v30  ;;  %v6895_v29 = vld [vmem:[#allocation3 + $0xb3c] sm:$0xf0]  ;;  %v6863_v30 = vld [vmem:[#allocation3 + $0xa44] sm:$0xf] }
  0x81   :  { %3320 = vmatpush.bf16.msrb.mxu3 %v5318_v34  ;;  %v6896_v34 = vld [vmem:[#allocation3 + $0xb44] sm:$0xf0]  ;;  %v5834_v37 = vor.u32 %v6895_v29, %v5833_v28  ;;  %v5838_v38 = vor.u32 %v6863_v30, %v5835_v32  ;;  %v4563_v32 = vld [vmem:[#allocation3 + $0x148] sm:$0xf0] }
  0x82   :  { %v5842_v39 = vor.u32 %v6896_v34, %v5841_v33  ;;  %v4561_v28 = vld [vmem:[#allocation3 + $0x48] sm:$0xf]  ;;  %v6361_v33 = vld [vmem:[#allocation3 + $0xe50] sm:$0xf] }
  0x83   :  { %3282 = vmatpush.bf16.msrb.mxu0 %v5050_v40  ;;  %3295 = vmatpush.bf16.msrb.mxu1 %v5054_v41  ;;  %v5577_v40 = vld [vmem:[#allocation3 + $0x840] sm:$0xf]  ;;  %v6576_v30 = vld [vmem:[#allocation3 + $0x144] sm:$0xf0]  ;;  %v7025_v34 = vld [vmem:[#allocation3 + $0xf4c] sm:$0xf0] }
  0x84   :  { %3308 = vmatpush.bf16.msrb.mxu2 %v5058_v42  ;;  %v6831_v41 = vld [vmem:[#allocation3 + $0x93c] sm:$0xf0]  ;;  %v6799_v42 = vld [vmem:[#allocation3 + $0x844] sm:$0xf] }
  0x85   :  { %3321 = vmatpush.bf16.msrb.mxu3 %v5062_v46  ;;  %v6832_v46 = vld [vmem:[#allocation3 + $0x944] sm:$0xf0]  ;;  %v5578_v49 = vor.u32 %v6831_v41, %v5577_v40  ;;  %v4562_v41 = vor.u32 %v6576_v30, %v4561_v28  ;;  %v6737_v28 = vld [vmem:[#allocation3 + $0x654] sm:$0xf] }
  0x86   :  { %v5586_v50 = vor.u32 %v6832_v46, %v5585_v45  ;;  %v6362_v45 = vor.u32 %v7025_v34, %v6361_v33  ;;  %v6770_v33 = vld [vmem:[#allocation3 + $0x754] sm:$0xf0] }
  0x87   :  { %3283 = vmatpush.bf16.msrb.mxu0 %v4794_v52  ;;  %3296 = vmatpush.bf16.msrb.mxu1 %v4798_v55  ;;  %v6767_v52 = vld [vmem:[#allocation3 + $0x73c] sm:$0xf0]  ;;  %v5323_v55 = vld [vmem:[#allocation3 + $0x740] sm:$0xf0] }
  0x88   :  { %3309 = vmatpush.bf16.msrb.mxu2 %v4802_v56  ;;  %v5329_v56 = vld [vmem:[#allocation3 + $0x648] sm:$0xf]  ;;  %v5326_v62 = vor.u32 %v6735_v53, %v5323_v55  ;;  %v6962_v53 = vld [vmem:[#allocation3 + $0xd54] sm:$0xf0]  ;;  %v6115_v55 = vld [vmem:[#allocation3 + $0xd58] sm:$0xf0] }
  0x89   :  { %3322 = vmatpush.bf16.msrb.mxu3 %v4806_v61  ;;  %v5322_v61 = vor.u32 %v6767_v52, %v5321_v51  ;;  %v5330_v63 = vor.u32 %v6768_v57, %v5329_v56  ;;  %v6107_v51 = vld [vmem:[#allocation3 + $0xd50] sm:$0xf0]  ;;  %v6113_v52 = vld [vmem:[#allocation3 + $0xc58] sm:$0xf]  ;;  %v7163_v57 = vld [vmem:[#allocation5] sm:$0xff] }
  0x8a   :  { %v6114_v60 = vor.u32 %v6962_v53, %v6113_v52  ;;  %v7172_v5 = vunpack.c.l.bf16 %v7163_v57  ;;  %v6706_v52 = vld [vmem:[#allocation3 + $0x554] sm:$0xf0] }
  0x8b   :  { %3284 = vmatpush.bf16.msrb.mxu0 %v4538_v4  ;;  %3297 = vmatpush.bf16.msrb.mxu1 %v4542_v8  ;;  %v5067_v4 = vld [vmem:[#allocation3 + $0x540] sm:$0xf0]  ;;  %v5075_v8 = vld [vmem:[#allocation3 + $0x548] sm:$0xf0] }
  0x8c   :  { %3310 = vmatpush.bf16.msrb.mxu2 %v4546_v9  ;;  %v5066_v9 = vor.u32 %v6703_v1, %v5065_v0  ;;  %v5070_v10 = vor.u32 %v6671_v2, %v5067_v4  ;;  %v7168_v0 = vld [vmem:[%s7421_s0] sm:$0x1]  ;;  %v5851_v2 = vld [vmem:[#allocation3 + $0xb50] sm:$0xf0]  ;;  %v6898_v4 = vld [vmem:[#allocation3 + $0xb54] sm:$0xf0] }
  0x8d   :  { %3323 = vmatpush.bf16.msrb.mxu3 %v4550_v12  ;;  %v4809_v12 = vld [vmem:[#allocation3 + $0x240] sm:$0xf] }
  0x8e   :  { %3285 = vmatmul.bf16.vlgmr.msrb.gmra.mxu0 %v7145_v58  ;;  %3298 = vmatmul.bf16.vlgmr.msrb.gmra.mxu1 %v7145_v58 }
  0x8f   :  { %3329 = vmatpush.bf16.msra.mxu0 %v6346_v13  ;;  %3342 = vmatpush.bf16.msra.mxu1 %v6350_v14  ;;  %v6639_v13 = vld [vmem:[#allocation3 + $0x33c] sm:$0xf0]  ;;  %v6607_v14 = vld [vmem:[#allocation3 + $0x244] sm:$0xf] }
  0x90   :  { %3355 = vmatpush.bf16.msra.mxu2 %v6354_v15  ;;  %3324 = vmatmul.bf16.vlgmr.msrb.gmra.mxu3 %v7145_v58  ;;  %v5078_v15 = vor.u32 %v6672_v7, %v5075_v8  ;;  %v4810_v21 = vor.u32 %v6639_v13, %v4809_v12  ;;  %v4814_v24 = vor.u32 %v6607_v14, %v4811_v16  ;;  %v5859_v7 = vld [vmem:[#allocation3 + $0xb58] sm:$0xf0]  ;;  %v6833_v12 = vld [vmem:[#allocation3 + $0x94c] sm:$0xf0]  ;;  %v6801_v13 = vld [vmem:[#allocation3 + $0x854] sm:$0xf] }
  0x91   :  { %3368 = vmatpush.bf16.msra.mxu3 %v6358_v19  ;;  %3311 = vmatmul.bf16.vlgmr.msrb.gmra.mxu2 %v7145_v58  ;;  %v5582_v58 = vor.u32 %v6799_v42, %v5579_v44  ;;  %v6608_v19 = vld [vmem:[#allocation3 + $0x24c] sm:$0xf]  ;;  %v6994_v42 = vld [vmem:[#allocation3 + $0xe5c] sm:$0xf]  ;;  %v5595_v14 = vld [vmem:[#allocation3 + $0x950] sm:$0xf0] }
  0x92   :  { %v4822_v29 = vor.u32 %v6608_v19, %v4819_v20  ;;  %v5601_v16 = vld [vmem:[#allocation3 + $0x858] sm:$0xf]  ;;  %v4090_v19 = vperm.slane %v7172_v5, 2  ;;  %v6802_v20 = vld [vmem:[#allocation3 + $0x85c] sm:$0xf] }
  0x93   :  { %3330 = vmatpush.bf16.msra.mxu0 %v6090_v25  ;;  %3343 = vmatpush.bf16.msra.mxu1 %v6094_v26  ;;  %v4818_v25 = vor.u32 %v6640_v18, %v4817_v17  ;;  %v6543_v26 = vld [vmem:[#allocation3 + $0x44] sm:$0xf]  ;;  %v6834_v17 = vld [vmem:[#allocation3 + $0x954] sm:$0xf0]  ;;  %v4089_v18 = vperm.slane %v7172_v5, 0 }
  0x94   :  { %3356 = vmatpush.bf16.msra.mxu2 %v6098_v27  ;;  %v4555_v27 = vld [vmem:[#allocation3 + $0x140] sm:$0xf0] }
  0x95   :  { %3369 = vmatpush.bf16.msra.mxu3 %v6102_v31  ;;  %v6544_v31 = vld [vmem:[#allocation3 + $0x4c] sm:$0xf]  ;;  %v4558_v40 = vor.u32 %v6543_v26, %v4555_v27  ;;  %v5602_v26 = vor.u32 %v6834_v17, %v5601_v16  ;;  %v6769_v27 = vld [vmem:[#allocation3 + $0x74c] sm:$0xf0]  ;;  %v6610_v17 = vld [vmem:[#allocation3 + $0x25c] sm:$0xf] }
  0x96   :  { %v4566_v44 = vor.u32 %v6544_v31, %v4563_v32  ;;  %v5345_v32 = vld [vmem:[#allocation3 + $0x658] sm:$0xf] }
  0x97   :  { %3331 = vmatpush.bf16.msra.mxu0 %v5834_v37  ;;  %3344 = vmatpush.bf16.msra.mxu1 %v5838_v38  ;;  %v6363_v37 = vld [vmem:[#allocation3 + $0xf50] sm:$0xf0]  ;;  %v6369_v38 = vld [vmem:[#allocation3 + $0xe58] sm:$0xf] }
  0x98   :  { %3357 = vmatpush.bf16.msra.mxu2 %v5842_v39  ;;  %v7026_v39 = vld [vmem:[#allocation3 + $0xf54] sm:$0xf0]  ;;  %v6366_v46 = vor.u32 %v6993_v35, %v6363_v37  ;;  %v4217_v35 = vperm.slane %v4089_v18, 0  ;;  %v6738_v37 = vld [vmem:[#allocation3 + $0x65c] sm:$0xf] }
  0x99   :  { %3370 = vmatpush.bf16.msra.mxu3 %v5846_v43  ;;  %v6371_v43 = vld [vmem:[#allocation3 + $0xf58] sm:$0xf0]  ;;  %v6370_v47 = vor.u32 %v7026_v39, %v6369_v38  ;;  %v4091_v39 = vperm.slane %v7172_v5, 4 }
  0x9a   :  { %v5347_v38 = vld [vmem:[#allocation3 + $0x758] sm:$0xf0] }
  0x9b   :  { %3332 = vmatpush.bf16.msra.mxu0 %v5578_v49  ;;  %3345 = vmatpush.bf16.msra.mxu1 %v5582_v58  ;;  %v6961_v49 = vld [vmem:[#allocation3 + $0xd4c] sm:$0xf0]  ;;  %v6929_v58 = vld [vmem:[#allocation3 + $0xc54] sm:$0xf]  ;;  %v4835_v18 = vld [vmem:[#allocation3 + $0x358] sm:$0xf0] }
  0x9c   :  { %3358 = vmatpush.bf16.msra.mxu2 %v5586_v50  ;;  %v6374_v50 = vor.u32 %v6994_v42, %v6371_v43  ;;  %v6106_v56 = vor.u32 %v6961_v49, %v6105_v48  ;;  %v6110_v59 = vor.u32 %v6929_v58, %v6107_v51  ;;  %v5081_v42 = vld [vmem:[#allocation3 + $0x450] sm:$0xf]  ;;  %v6673_v48 = vld [vmem:[#allocation3 + $0x454] sm:$0xf]  ;;  %v5350_v58 = vor.u32 %v6738_v37, %v5347_v38  ;;  %v5089_v51 = vld [vmem:[#allocation3 + $0x458] sm:$0xf] }
  0x9d   :  { %3371 = vmatpush.bf16.msra.mxu3 %v5590_v54  ;;  %v6930_v54 = vld [vmem:[#allocation3 + $0xc5c] sm:$0xf]  ;;  %v6377_v38 = vld [vmem:[#allocation3 + $0xe60] sm:$0xf] }
  0x9e   :  { %v6118_v1 = vor.u32 %v6930_v54, %v6115_v55 }
  0x9f   :  { %3333 = vmatpush.bf16.msra.mxu0 %v5322_v61  ;;  %3346 = vmatpush.bf16.msra.mxu1 %v5326_v62  ;;  %v5849_v61 = vld [vmem:[#allocation3 + $0xa50] sm:$0xf] }
  0xa0   :  { %3359 = vmatpush.bf16.msra.mxu2 %v5330_v63  ;;  %v6897_v62 = vld [vmem:[#allocation3 + $0xb4c] sm:$0xf0]  ;;  %v6865_v63 = vld [vmem:[#allocation3 + $0xa54] sm:$0xf] }
  0xa1   :  { %3372 = vmatpush.bf16.msra.mxu3 %v5334_v3  ;;  %v5857_v3 = vld [vmem:[#allocation3 + $0xa58] sm:$0xf]  ;;  %v5850_v8 = vor.u32 %v6897_v62, %v5849_v61  ;;  %v4219_v61 = vperm.slane %v4091_v39, 0  ;;  %v7027_v39 = vld [vmem:[#allocation3 + $0xf5c] sm:$0xf0] }
  0xa3   :  { %3334 = vmatpush.bf16.msra.mxu0 %v5066_v9  ;;  %3347 = vmatpush.bf16.msra.mxu1 %v5070_v10  ;;  %v5593_v9 = vld [vmem:[#allocation3 + $0x850] sm:$0xf]  ;;  %v5854_v10 = vor.u32 %v6865_v63, %v5851_v2 }
  0xa4   :  { %3360 = vmatpush.bf16.msra.mxu2 %v5074_v11  ;;  %v5858_v11 = vor.u32 %v6898_v4, %v5857_v3  ;;  %v5594_v22 = vor.u32 %v6833_v12, %v5593_v9 }
  0xa5   :  { %3373 = vmatpush.bf16.msra.mxu3 %v5078_v15  ;;  %v5862_v15 = vor.u32 %v6866_v6, %v5859_v7  ;;  %v4825_v6 = vld [vmem:[#allocation3 + $0x250] sm:$0xf] }
  0xa6   :  { %v6641_v7 = vld [vmem:[#allocation3 + $0x34c] sm:$0xf0] }
  0xa7   :  { %3335 = vmatpush.bf16.msra.mxu0 %v4810_v21  ;;  %3348 = vmatpush.bf16.msra.mxu1 %v4814_v24  ;;  %v5603_v21 = vld [vmem:[#allocation3 + $0x958] sm:$0xf0] }
  0xa8   :  { %3361 = vmatpush.bf16.msra.mxu2 %v4818_v25  ;;  %v5598_v25 = vor.u32 %v6801_v13, %v5595_v14  ;;  %v5606_v31 = vor.u32 %v6802_v20, %v5603_v21  ;;  %v4827_v13 = vld [vmem:[#allocation3 + $0x350] sm:$0xf0]  ;;  %v4833_v14 = vld [vmem:[#allocation3 + $0x258] sm:$0xf]  ;;  %v4826_v21 = vor.u32 %v6641_v7, %v4825_v6  ;;  %v6867_v6 = vld [vmem:[#allocation3 + $0xa64] sm:$0xf] }
  0xa9   :  { %3374 = vmatpush.bf16.msra.mxu3 %v4822_v29  ;;  %v5339_v29 = vld [vmem:[#allocation3 + $0x750] sm:$0xf0] }
  0xab   :  { %3336 = vmatpush.bf16.msra.mxu0 %v4554_v36  ;;  %3349 = vmatpush.bf16.msra.mxu1 %v4558_v40  ;;  %v3130_v24 = vpop.f32.mrf.mxu0  ;;  %v3143_v30 = vpop.f32.mrf.mxu1  ;;  %v4218_v36 = vperm.slane %v4090_v19, 0  ;;  %v4092_v40 = vperm.slane %v7172_v5, 6  ;;  %v5090_v5 = vor.u32 %v6706_v52, %v5089_v51 }
  0xac   :  { %3362 = vmatpush.bf16.msra.mxu2 %v4562_v41  ;;  %v3953_v34 = vpack.c.bf16 %v3143_v30, %v3130_v24  ;;  %v5338_v41 = vor.u32 %v6769_v27, %v5337_v23  ;;  %v6577_v23 = vld [vmem:[#allocation3 + $0x14c] sm:$0xf0]  ;;  %v6545_v24 = vld [vmem:[#allocation3 + $0x54] sm:$0xf] }
  0xad   :  { %3375 = vmatpush.bf16.msra.mxu3 %v4566_v44  ;;  %v4220_v62 = vperm.slane %v4092_v40, 0  ;;  %v4571_v27 = vld [vmem:[#allocation3 + $0x150] sm:$0xf0]  ;;  %v6995_v40 = vld [vmem:[#allocation3 + $0xe64] sm:$0xf] }
  0xae   :  { %3337 = vmatmul.bf16.vlgmr.msra.gmra.mxu0 %v7168_v0  ;;  %3350 = vmatmul.bf16.vlgmr.msra.gmra.mxu1 %v7168_v0  ;;  %v3985_v43 = vunpack.c.l.bf16 %v3953_v34  ;;  %v3986_v44 = vunpack.c.h.bf16 %v3953_v34  ;;  %v6546_v34 = vld [vmem:[#allocation3 + $0x5c] sm:$0xf] }
  0xaf   :  { %3381 = vmatpush.bf16.msrb.mxu0 %v6362_v45  ;;  %3394 = vmatpush.bf16.msrb.mxu1 %v6366_v46  ;;  %v5342_v45 = vor.u32 %v6737_v28, %v5339_v29  ;;  %v5346_v46 = vor.u32 %v6770_v33, %v5345_v32  ;;  %v4577_v28 = vld [vmem:[#allocation3 + $0x58] sm:$0xf]  ;;  %v4838_v32 = vor.u32 %v6610_v17, %v4835_v18  ;;  %v6835_v18 = vld [vmem:[#allocation3 + $0x95c] sm:$0xf0] }
  0xb0   :  { %3407 = vmatpush.bf16.msrb.mxu2 %v6370_v47  ;;  %3376 = vmatmul.bf16.vlgmr.msra.gmra.mxu3 %v7168_v0  ;;  %v6705_v47 = vld [vmem:[#allocation3 + $0x54c] sm:$0xf0]  ;;  %v4281_v53 = vmul.f32 %v4217_v35, %v3985_v43  ;;  %v4282_v54 = vmul.f32 %v4218_v36, %v3986_v44  ;;  %v6578_v33 = vld [vmem:[#allocation3 + $0x154] sm:$0xf0]  ;;  %v4579_v35 = vld [vmem:[#allocation3 + $0x158] sm:$0xf0] }
  0xb1   :  { %3420 = vmatpush.bf16.msrb.mxu3 %v6374_v50  ;;  %3363 = vmatmul.bf16.vlgmr.msra.gmra.mxu2 %v7168_v0  ;;  %v5083_v50 = vld [vmem:[#allocation3 + $0x550] sm:$0xf0]  ;;  %v5082_v63 = vor.u32 %v6705_v47, %v5081_v42  ;;  %v6379_v42 = vld [vmem:[#allocation3 + $0xf60] sm:$0xf0]  ;;  %v6385_v43 = vld [vmem:[#allocation3 + $0xe68] sm:$0xf]  ;;  %v4578_v47 = vor.u32 %v6578_v33, %v4577_v28 }
  0xb2   :  { %v4347_v2 = vsel %vm4345_vm0, %v4282_v54, 0.0  ;;  %v5086_v4 = vor.u32 %v6673_v48, %v5083_v50  ;;  %v7028_v44 = vld [vmem:[#allocation3 + $0xf64] sm:$0xf0]  ;;  %v6996_v48 = vld [vmem:[#allocation3 + $0xe6c] sm:$0xf]  ;;  %v6378_v50 = vor.u32 %v7027_v39, %v6377_v38  ;;  %v6382_v51 = vor.u32 %v6995_v40, %v6379_v42 }
  0xb3   :  { %3382 = vmatpush.bf16.msrb.mxu0 %v6106_v56  ;;  %3395 = vmatpush.bf16.msrb.mxu1 %v6110_v59  ;;  %v3169_v55 = vpop.f32.mrf.mxu3  ;;  %v6674_v56 = vld [vmem:[#allocation3 + $0x45c] sm:$0xf]  ;;  %v3132_v3 = vpop.f32.mrf.mxu0  ;;  %v6386_v52 = vor.u32 %v7028_v44, %v6385_v43  ;;  %v6963_v54 = vld [vmem:[#allocation3 + $0xd5c] sm:$0xf0]  ;;  %v6739_v33 = vld [vmem:[#allocation3 + $0x664] sm:$0xf] }
  0xb4   :  { %3408 = vmatpush.bf16.msrb.mxu2 %v6114_v60  ;;  %v3156_v49 = vpop.f32.mrf.mxu2  ;;  %v5091_v59 = vld [vmem:[#allocation3 + $0x558] sm:$0xf0]  ;;  %v5353_v28 = vld [vmem:[#allocation3 + $0x660] sm:$0xf]  ;;  %v6772_v38 = vld [vmem:[#allocation3 + $0x764] sm:$0xf0] }
  0xb5   :  { %3421 = vmatpush.bf16.msrb.mxu3 %v6118_v1  ;;  %v3954_v60 = vpack.c.bf16 %v3169_v55, %v3156_v49  ;;  %v4346_v1 = vsel %vm4345_vm0, %v4281_v53, 0.0  ;;  %v5094_v12 = vor.u32 %v6674_v56, %v5091_v59  ;;  %v6387_v49 = vld [vmem:[#allocation3 + $0xf68] sm:$0xf0]  ;;  %v6121_v53 = vld [vmem:[#allocation3 + $0xc60] sm:$0xf] }
  0xb6   :  { %v4348_v16 = vadd.f32 %v4347_v2, %v4346_v1  ;;  %v6931_v55 = vld [vmem:[#allocation3 + $0xc64] sm:$0xf]  ;;  %v6390_v56 = vor.u32 %v6996_v48, %v6387_v49  ;;  %v6122_v1 = vor.u32 %v6963_v54, %v6121_v53  ;;  %v6740_v42 = vld [vmem:[#allocation3 + $0x66c] sm:$0xf] }
  0xb7   :  { %3383 = vmatpush.bf16.msrb.mxu0 %v5850_v8  ;;  %3396 = vmatpush.bf16.msrb.mxu1 %v5854_v10  ;;  %v6609_v8 = vld [vmem:[#allocation3 + $0x254] sm:$0xf]  ;;  %v3987_v9 = vunpack.c.l.bf16 %v3954_v60  ;;  %v3988_v10 = vunpack.c.h.bf16 %v3954_v60  ;;  %v6123_v59 = vld [vmem:[#allocation3 + $0xd60] sm:$0xf0]  ;;  %v6129_v60 = vld [vmem:[#allocation3 + $0xc68] sm:$0xf] }
  0xb8   :  { %3409 = vmatpush.bf16.msrb.mxu2 %v5858_v11  ;;  %v3145_v11 = vpop.f32.mrf.mxu1  ;;  %v6126_v2 = vor.u32 %v6931_v55, %v6123_v59  ;;  %v5363_v43 = vld [vmem:[#allocation3 + $0x768] sm:$0xf0]  ;;  %v6675_v53 = vld [vmem:[#allocation3 + $0x464] sm:$0xf] }
  0xb9   :  { %3422 = vmatpush.bf16.msrb.mxu3 %v5862_v15  ;;  %v6642_v15 = vld [vmem:[#allocation3 + $0x354] sm:$0xf0]  ;;  %v4283_v19 = vmul.f32 %v4219_v61, %v3987_v9  ;;  %v4284_v20 = vmul.f32 %v4220_v62, %v3988_v10  ;;  %v6964_v61 = vld [vmem:[#allocation3 + $0xd64] sm:$0xf0]  ;;  %v6932_v62 = vld [vmem:[#allocation3 + $0xc6c] sm:$0xf]  ;;  %v7189_v11 = vunpack.c.h.bf16 %v7163_v57 }
  0xba   :  { %v6130_v3 = vor.u32 %v6964_v61, %v6129_v60  ;;  %v5873_v9 = vld [vmem:[#allocation3 + $0xa68] sm:$0xf]  ;;  %v5099_v54 = vld [vmem:[#allocation3 + $0x560] sm:$0xf0] }
  0xbb   :  { %3384 = vmatpush.bf16.msrb.mxu0 %v5594_v22  ;;  %3397 = vmatpush.bf16.msrb.mxu1 %v5598_v25  ;;  %v4569_v22 = vld [vmem:[#allocation3 + $0x50] sm:$0xf]  ;;  %v4830_v25 = vor.u32 %v6609_v8, %v4827_v13  ;;  %v4349_v29 = vsel %vm4345_vm0, %v4283_v19, 0.0  ;;  %v4351_v30 = vsel %vm4345_vm0, %v4284_v20, 0.0  ;;  %v3171_v37 = vpop.f32.mrf.mxu3  ;;  %v5867_v8 = vld [vmem:[#allocation3 + $0xb60] sm:$0xf0] }
  0xbc   :  { %3410 = vmatpush.bf16.msrb.mxu2 %v5602_v26  ;;  %v4834_v26 = vor.u32 %v6642_v15, %v4833_v14  ;;  %v4350_v36 = vadd.f32 %v4349_v29, %v4348_v16  ;;  %v6900_v10 = vld [vmem:[#allocation3 + $0xb64] sm:$0xf0]  ;;  %v5875_v13 = vld [vmem:[#allocation3 + $0xb68] sm:$0xf0]  ;;  %v5609_v15 = vld [vmem:[#allocation3 + $0x860] sm:$0xf]  ;;  %v5870_v16 = vor.u32 %v6867_v6, %v5867_v8 }
  0xbd   :  { %3423 = vmatpush.bf16.msrb.mxu3 %v5606_v31  ;;  %v3158_v31 = vpop.f32.mrf.mxu2  ;;  %v5874_v17 = vor.u32 %v6900_v10, %v5873_v9  ;;  %v6803_v19 = vld [vmem:[#allocation3 + $0x864] sm:$0xf]  ;;  %v5361_v37 = vld [vmem:[#allocation3 + $0x668] sm:$0xf]  ;;  %v4095_v44 = vperm.slane %v7189_v11, 4  ;;  %v5102_v9 = vor.u32 %v6675_v53, %v5099_v54 }
  0xbe   :  { %v5611_v20 = vld [vmem:[#allocation3 + $0x960] sm:$0xf0]  ;;  %v5105_v61 = vld [vmem:[#allocation3 + $0x468] sm:$0xf]  ;;  %v6998_v53 = vld [vmem:[#allocation3 + $0xe7c] sm:$0xf] }
  0xbf   :  { %3385 = vmatpush.bf16.msrb.mxu0 %v5338_v41  ;;  %3398 = vmatpush.bf16.msrb.mxu1 %v5342_v45  ;;  %v4570_v41 = vor.u32 %v6577_v23, %v4569_v22  ;;  %v7185_v45 = vadd.f32 %v4351_v30, %v4350_v36  ;;  %v6836_v22 = vld [vmem:[#allocation3 + $0x964] sm:$0xf0]  ;;  %v4093_v23 = vperm.slane %v7189_v11, 0  ;;  %v5614_v30 = vor.u32 %v6803_v19, %v5611_v20  ;;  %v4843_v20 = vld [vmem:[#allocation3 + $0x360] sm:$0xf0] }
  0xc0   :  { %3411 = vmatpush.bf16.msrb.mxu2 %v5346_v46  ;;  %v4574_v46 = vor.u32 %v6545_v24, %v4571_v27  ;;  %v4094_v24 = vperm.slane %v7189_v11, 2  ;;  %v5610_v27 = vor.u32 %v6835_v18, %v5609_v15  ;;  %v4841_v15 = vld [vmem:[#allocation3 + $0x260] sm:$0xf]  ;;  %v6403_v54 = vld [vmem:[#allocation3 + $0xf78] sm:$0xf0] }
  0xc1   :  { %3424 = vmatpush.bf16.msrb.mxu3 %v5350_v58  ;;  %v4582_v58 = vor.u32 %v6546_v34, %v4579_v35  ;;  %v5355_v34 = vld [vmem:[#allocation3 + $0x760] sm:$0xf0]  ;;  %v4221_v40 = vperm.slane %v4093_v23, 0 }
  0xc3   :  { %3386 = vmatpush.bf16.msrb.mxu0 %v5082_v63  ;;  %3399 = vmatpush.bf16.msrb.mxu1 %v5086_v4  ;;  %v6131_v63 = vld [vmem:[#allocation3 + $0xd68] sm:$0xf0]  ;;  %v5865_v4 = vld [vmem:[#allocation3 + $0xa60] sm:$0xf] }
  0xc4   :  { %3412 = vmatpush.bf16.msrb.mxu2 %v5090_v5  ;;  %v6899_v5 = vld [vmem:[#allocation3 + $0xb5c] sm:$0xf0]  ;;  %v6134_v7 = vor.u32 %v6932_v62, %v6131_v63  ;;  %v6708_v62 = vld [vmem:[#allocation3 + $0x564] sm:$0xf0] }
  0xc5   :  { %3425 = vmatpush.bf16.msrb.mxu3 %v5094_v12  ;;  %v6868_v12 = vld [vmem:[#allocation3 + $0xa6c] sm:$0xf]  ;;  %v5866_v14 = vor.u32 %v6899_v5, %v5865_v4  ;;  %v4223_v4 = vperm.slane %v4095_v44, 0  ;;  %v7029_v44 = vld [vmem:[#allocation3 + $0xf6c] sm:$0xf0] }
  0xc6   :  { %v5878_v57 = vor.u32 %v6868_v12, %v5875_v13  ;;  %v5106_v12 = vor.u32 %v6708_v62, %v5105_v61  ;;  %v6965_v62 = vld [vmem:[#allocation3 + $0xd6c] sm:$0xf0] }
  0xc7   :  { %3387 = vmatpush.bf16.msrb.mxu0 %v4826_v21  ;;  %3400 = vmatpush.bf16.msrb.mxu1 %v4830_v25  ;;  %v5617_v21 = vld [vmem:[#allocation3 + $0x868] sm:$0xf]  ;;  %v6804_v25 = vld [vmem:[#allocation3 + $0x86c] sm:$0xf] }
  0xc8   :  { %3413 = vmatpush.bf16.msrb.mxu2 %v4834_v26  ;;  %v5619_v26 = vld [vmem:[#allocation3 + $0x968] sm:$0xf0]  ;;  %v5618_v31 = vor.u32 %v6836_v22, %v5617_v21  ;;  %v6644_v21 = vld [vmem:[#allocation3 + $0x364] sm:$0xf0] }
  0xc9   :  { %3426 = vmatpush.bf16.msrb.mxu3 %v4838_v32  ;;  %v6771_v32 = vld [vmem:[#allocation3 + $0x75c] sm:$0xf0]  ;;  %v5622_v36 = vor.u32 %v6804_v25, %v5619_v26  ;;  %v6612_v25 = vld [vmem:[#allocation3 + $0x26c] sm:$0xf] }
  0xca   :  { %v4851_v26 = vld [vmem:[#allocation3 + $0x368] sm:$0xf0] }
  0xcb   :  { %3388 = vmatpush.bf16.msrb.mxu0 %v4570_v41  ;;  %3401 = vmatpush.bf16.msrb.mxu1 %v4574_v46  ;;  %v3182_v29 = vpop.f32.mrf.mxu0  ;;  %v3195_v35 = vpop.f32.mrf.mxu1  ;;  %v4222_v41 = vperm.slane %v4094_v24, 0  ;;  %v4096_v46 = vperm.slane %v7189_v11, 6 }
  0xcc   :  { %3414 = vmatpush.bf16.msrb.mxu2 %v4578_v47  ;;  %v3955_v39 = vpack.c.bf16 %v3195_v35, %v3182_v29  ;;  %v5354_v47 = vor.u32 %v6771_v32, %v5353_v28  ;;  %v6579_v28 = vld [vmem:[#allocation3 + $0x15c] sm:$0xf0]  ;;  %v6547_v29 = vld [vmem:[#allocation3 + $0x64] sm:$0xf]  ;;  %v4593_v35 = vld [vmem:[#allocation3 + $0x68] sm:$0xf] }
  0xcd   :  { %3427 = vmatpush.bf16.msrb.mxu3 %v4582_v58  ;;  %v5097_v58 = vld [vmem:[#allocation3 + $0x460] sm:$0xf]  ;;  %v4224_v5 = vperm.slane %v4096_v46, 0  ;;  %v6997_v46 = vld [vmem:[#allocation3 + $0xe74] sm:$0xf] }
  0xce   :  { %3389 = vmatmul.bf16.vlgmr.msrb.gmra.mxu0 %v7168_v0  ;;  %3402 = vmatmul.bf16.vlgmr.msrb.gmra.mxu1 %v7168_v0  ;;  %v3989_v48 = vunpack.c.l.bf16 %v3955_v39  ;;  %v3990_v49 = vunpack.c.h.bf16 %v3955_v39  ;;  %v6580_v39 = vld [vmem:[#allocation3 + $0x164] sm:$0xf0] }
  0xcf   :  { %3433 = vmatpush.bf16.msra.mxu0 %v6378_v50  ;;  %3446 = vmatpush.bf16.msra.mxu1 %v6382_v51  ;;  %v5358_v50 = vor.u32 %v6739_v33, %v5355_v34  ;;  %v5362_v51 = vor.u32 %v6772_v38, %v5361_v37  ;;  %v4587_v34 = vld [vmem:[#allocation3 + $0x160] sm:$0xf0]  ;;  %v4854_v38 = vor.u32 %v6612_v25, %v4851_v26 }
  0xd0   :  { %3459 = vmatpush.bf16.msra.mxu2 %v6386_v52  ;;  %3428 = vmatmul.bf16.vlgmr.msrb.gmra.mxu3 %v7168_v0  ;;  %v6707_v52 = vld [vmem:[#allocation3 + $0x55c] sm:$0xf0]  ;;  %v4285_v59 = vmul.f32 %v4221_v40, %v3989_v48  ;;  %v4286_v60 = vmul.f32 %v4222_v41, %v3990_v49  ;;  %v6548_v40 = vld [vmem:[#allocation3 + $0x6c] sm:$0xf]  ;;  %v6395_v49 = vld [vmem:[#allocation3 + $0xf70] sm:$0xf0] }
  0xd1   :  { %3472 = vmatpush.bf16.msra.mxu3 %v6390_v56  ;;  %3415 = vmatmul.bf16.vlgmr.msrb.gmra.mxu2 %v7168_v0  ;;  %v5366_v56 = vor.u32 %v6740_v42, %v5363_v43  ;;  %v5098_v8 = vor.u32 %v6707_v52, %v5097_v58  ;;  %v4595_v41 = vld [vmem:[#allocation3 + $0x168] sm:$0xf0]  ;;  %v6393_v43 = vld [vmem:[#allocation3 + $0xe70] sm:$0xf]  ;;  %v6401_v58 = vld [vmem:[#allocation3 + $0xe78] sm:$0xf]  ;;  %v4594_v52 = vor.u32 %v6580_v39, %v4593_v35 }
  0xd2   :  { %v4353_v6 = vsel %vm4345_vm0, %v4285_v59, 0.0  ;;  %v6137_v59 = vld [vmem:[#allocation3 + $0xc70] sm:$0xf] }
  0xd3   :  { %3434 = vmatpush.bf16.msra.mxu0 %v6122_v1  ;;  %3447 = vmatpush.bf16.msra.mxu1 %v6126_v2  ;;  %v3221_v63 = vpop.f32.mrf.mxu3  ;;  %v6676_v1 = vld [vmem:[#allocation3 + $0x46c] sm:$0xf]  ;;  %v3184_v10 = vpop.f32.mrf.mxu0  ;;  %v4354_v11 = vadd.f32 %v4353_v6, %v7185_v45  ;;  %v4585_v45 = vld [vmem:[#allocation3 + $0x60] sm:$0xf]  ;;  %v6934_v6 = vld [vmem:[#allocation3 + $0xc7c] sm:$0xf] }
  0xd4   :  { %3460 = vmatpush.bf16.msra.mxu2 %v6130_v3  ;;  %v3208_v55 = vpop.f32.mrf.mxu2  ;;  %v5107_v2 = vld [vmem:[#allocation3 + $0x568] sm:$0xf0]  ;;  %v3197_v18 = vpop.f32.mrf.mxu1  ;;  %v4586_v48 = vor.u32 %v6579_v28, %v4585_v45  ;;  %v5627_v45 = vld [vmem:[#allocation3 + $0x970] sm:$0xf0] }
  0xd5   :  { %3473 = vmatpush.bf16.msra.mxu3 %v6134_v7  ;;  %v3956_v3 = vpack.c.bf16 %v3221_v63, %v3208_v55  ;;  %v4355_v7 = vsel %vm4345_vm0, %v4286_v60, 0.0  ;;  %v5110_v19 = vor.u32 %v6676_v1, %v5107_v2  ;;  %v4598_v55 = vor.u32 %v6548_v40, %v4595_v41  ;;  %v6933_v63 = vld [vmem:[#allocation3 + $0xc74] sm:$0xf]  ;;  %v6902_v18 = vld [vmem:[#allocation3 + $0xb74] sm:$0xf0] }
  0xd6   :  { %v4356_v22 = vadd.f32 %v4355_v7, %v4354_v11  ;;  %v6398_v60 = vor.u32 %v6997_v46, %v6395_v49  ;;  %v6139_v1 = vld [vmem:[#allocation3 + $0xd70] sm:$0xf0]  ;;  %v6406_v2 = vor.u32 %v6998_v53, %v6403_v54  ;;  %v6147_v7 = vld [vmem:[#allocation3 + $0xd78] sm:$0xf0]  ;;  %v5881_v11 = vld [vmem:[#allocation3 + $0xa70] sm:$0xf] }
  0xd7   :  { %3435 = vmatpush.bf16.msra.mxu0 %v5866_v14  ;;  %3448 = vmatpush.bf16.msra.mxu1 %v5870_v16  ;;  %v3991_v13 = vunpack.c.l.bf16 %v3956_v3  ;;  %v3992_v14 = vunpack.c.h.bf16 %v3956_v3  ;;  %v6643_v16 = vld [vmem:[#allocation3 + $0x35c] sm:$0xf0]  ;;  %v6145_v3 = vld [vmem:[#allocation3 + $0xc78] sm:$0xf] }
  0xd8   :  { %3461 = vmatpush.bf16.msra.mxu2 %v5874_v17  ;;  %v6611_v17 = vld [vmem:[#allocation3 + $0x264] sm:$0xf]  ;;  %v6774_v49 = vld [vmem:[#allocation3 + $0x774] sm:$0xf0] }
  0xd9   :  { %3474 = vmatpush.bf16.msra.mxu3 %v5878_v57  ;;  %v4849_v57 = vld [vmem:[#allocation3 + $0x268] sm:$0xf]  ;;  %v4287_v23 = vmul.f32 %v4223_v4, %v3991_v13  ;;  %v4288_v24 = vmul.f32 %v4224_v5, %v3992_v14  ;;  %v4846_v32 = vor.u32 %v6611_v17, %v4843_v20  ;;  %v6966_v4 = vld [vmem:[#allocation3 + $0xd74] sm:$0xf0]  ;;  %v6869_v13 = vld [vmem:[#allocation3 + $0xa74] sm:$0xf] }
  0xda   :  { %v4850_v33 = vor.u32 %v6644_v21, %v4849_v57  ;;  %v7205_v5 = vld [vmem:[#allocation5 + $0x8] sm:$0xff]  ;;  %v6146_v10 = vor.u32 %v6966_v4, %v6145_v3  ;;  %v5889_v17 = vld [vmem:[#allocation3 + $0xa78] sm:$0xf]  ;;  %v5891_v20 = vld [vmem:[#allocation3 + $0xb78] sm:$0xf0] }
  0xdb   :  { %3436 = vmatpush.bf16.msra.mxu0 %v5610_v27  ;;  %3449 = vmatpush.bf16.msra.mxu1 %v5614_v30  ;;  %v4842_v27 = vor.u32 %v6643_v16, %v4841_v15  ;;  %v4357_v30 = vsel %vm4345_vm0, %v4287_v23, 0.0  ;;  %v3223_v42 = vpop.f32.mrf.mxu3  ;;  %v7208_v14 = vunpack.c.l.bf16 %v7205_v5  ;;  %v6150_v15 = vor.u32 %v6934_v6, %v6147_v7  ;;  %v5883_v16 = vld [vmem:[#allocation3 + $0xb70] sm:$0xf0]  ;;  %v5625_v21 = vld [vmem:[#allocation3 + $0x870] sm:$0xf] }
  0xdc   :  { %3462 = vmatpush.bf16.msra.mxu2 %v5618_v31  ;;  %v4359_v31 = vsel %vm4345_vm0, %v4288_v24, 0.0  ;;  %v4358_v37 = vadd.f32 %v4357_v30, %v4356_v22  ;;  %v6837_v22 = vld [vmem:[#allocation3 + $0x96c] sm:$0xf0]  ;;  %v5886_v23 = vor.u32 %v6869_v13, %v5883_v16  ;;  %v5890_v24 = vor.u32 %v6902_v18, %v5889_v17  ;;  %v6838_v30 = vld [vmem:[#allocation3 + $0x974] sm:$0xf0] }
  0xdd   :  { %3475 = vmatpush.bf16.msra.mxu3 %v5622_v36  ;;  %v3210_v36 = vpop.f32.mrf.mxu2  ;;  %v4097_v25 = vperm.slane %v7208_v14, 0  ;;  %v4098_v26 = vperm.slane %v7208_v14, 2  ;;  %v5626_v35 = vor.u32 %v6837_v22, %v5625_v21  ;;  %v5115_v4 = vld [vmem:[#allocation3 + $0x570] sm:$0xf0]  ;;  %v5121_v6 = vld [vmem:[#allocation3 + $0x478] sm:$0xf] }
  0xde   :  { %v6710_v7 = vld [vmem:[#allocation3 + $0x574] sm:$0xf0]  ;;  %v5123_v13 = vld [vmem:[#allocation3 + $0x578] sm:$0xf0]  ;;  %v4857_v21 = vld [vmem:[#allocation3 + $0x270] sm:$0xf] }
  0xdf   :  { %3437 = vmatpush.bf16.msra.mxu0 %v5354_v47  ;;  %3450 = vmatpush.bf16.msra.mxu1 %v5358_v50  ;;  %v7203_v47 = vadd.f32 %v4359_v31, %v4358_v37  ;;  %v7030_v50 = vld [vmem:[#allocation3 + $0xf74] sm:$0xf0]  ;;  %v5369_v37 = vld [vmem:[#allocation3 + $0x670] sm:$0xf]  ;;  %v4225_v40 = vperm.slane %v4097_v25, 0  ;;  %v4226_v41 = vperm.slane %v4098_v26, 0 }
  0xe0   :  { %3463 = vmatpush.bf16.msra.mxu2 %v5362_v51  ;;  %v4590_v51 = vor.u32 %v6547_v29, %v4587_v34  ;;  %v6402_v61 = vor.u32 %v7030_v50, %v6401_v58  ;;  %v5633_v29 = vld [vmem:[#allocation3 + $0x878] sm:$0xf]  ;;  %v6645_v22 = vld [vmem:[#allocation3 + $0x36c] sm:$0xf0] }
  0xe1   :  { %3476 = vmatpush.bf16.msra.mxu3 %v5366_v56  ;;  %v6394_v56 = vor.u32 %v7029_v44, %v6393_v43  ;;  %v5634_v42 = vor.u32 %v6838_v30, %v5633_v29  ;;  %v6741_v43 = vld [vmem:[#allocation3 + $0x674] sm:$0xf]  ;;  %v6614_v29 = vld [vmem:[#allocation3 + $0x27c] sm:$0xf] }
  0xe2   :  { %v5371_v44 = vld [vmem:[#allocation3 + $0x770] sm:$0xf0]  ;;  %v4867_v30 = vld [vmem:[#allocation3 + $0x378] sm:$0xf0] }
  0xe3   :  { %3438 = vmatpush.bf16.msra.mxu0 %v5098_v8  ;;  %3451 = vmatpush.bf16.msra.mxu1 %v5102_v9  ;;  %v6138_v8 = vor.u32 %v6965_v62, %v6137_v59  ;;  %v6142_v9 = vor.u32 %v6933_v63, %v6139_v1  ;;  %v5374_v54 = vor.u32 %v6741_v43, %v5371_v44  ;;  %v5113_v59 = vld [vmem:[#allocation3 + $0x470] sm:$0xf]  ;;  %v6677_v1 = vld [vmem:[#allocation3 + $0x474] sm:$0xf] }
  0xe4   :  { %3464 = vmatpush.bf16.msra.mxu2 %v5106_v12  ;;  %v6901_v12 = vld [vmem:[#allocation3 + $0xb6c] sm:$0xf0]  ;;  %v4870_v44 = vor.u32 %v6614_v29, %v4867_v30  ;;  %v6839_v29 = vld [vmem:[#allocation3 + $0x97c] sm:$0xf0] }
  0xe5   :  { %3477 = vmatpush.bf16.msra.mxu3 %v5110_v19  ;;  %v6870_v19 = vld [vmem:[#allocation3 + $0xa7c] sm:$0xf]  ;;  %v5882_v57 = vor.u32 %v6901_v12, %v5881_v11 }
  0xe6   :  { %v5894_v28 = vor.u32 %v6870_v19, %v5891_v20  ;;  %v6678_v12 = vld [vmem:[#allocation3 + $0x47c] sm:$0xf]  ;;  %v5118_v20 = vor.u32 %v6677_v1, %v5115_v4  ;;  %v6419_v1 = vld [vmem:[#allocation3 + $0xf88] sm:$0xf0] }
  0xe7   :  { %3439 = vmatpush.bf16.msra.mxu0 %v4842_v27  ;;  %3452 = vmatpush.bf16.msra.mxu1 %v4846_v32  ;;  %v6805_v27 = vld [vmem:[#allocation3 + $0x874] sm:$0xf]  ;;  %v6806_v32 = vld [vmem:[#allocation3 + $0x87c] sm:$0xf] }
  0xe8   :  { %3465 = vmatpush.bf16.msra.mxu2 %v4850_v33  ;;  %v5635_v33 = vld [vmem:[#allocation3 + $0x978] sm:$0xf0]  ;;  %v5630_v36 = vor.u32 %v6805_v27, %v5627_v45  ;;  %v5126_v27 = vor.u32 %v6678_v12, %v5123_v13  ;;  %v4859_v45 = vld [vmem:[#allocation3 + $0x370] sm:$0xf0]  ;;  %v6161_v12 = vld [vmem:[#allocation3 + $0xc88] sm:$0xf] }
  0xe9   :  { %3478 = vmatpush.bf16.msra.mxu3 %v4854_v38  ;;  %v6773_v38 = vld [vmem:[#allocation3 + $0x76c] sm:$0xf0]  ;;  %v5638_v46 = vor.u32 %v6806_v32, %v5635_v33  ;;  %v4858_v33 = vor.u32 %v6645_v22, %v4857_v21  ;;  %v6968_v13 = vld [vmem:[#allocation3 + $0xd84] sm:$0xf0]  ;;  %v6871_v21 = vld [vmem:[#allocation3 + $0xa84] sm:$0xf] }
  0xea   :  { %v5370_v53 = vor.u32 %v6773_v38, %v5369_v37 }
  0xeb   :  { %3440 = vmatpush.bf16.msra.mxu0 %v4586_v48  ;;  %3453 = vmatpush.bf16.msra.mxu1 %v4590_v51  ;;  %v3234_v31 = vpop.f32.mrf.mxu0  ;;  %v3247_v34 = vpop.f32.mrf.mxu1  ;;  %v5377_v48 = vld [vmem:[#allocation3 + $0x678] sm:$0xf]  ;;  %v6742_v51 = vld [vmem:[#allocation3 + $0x67c] sm:$0xf] }
  0xec   :  { %3466 = vmatpush.bf16.msra.mxu2 %v4594_v52  ;;  %v3957_v39 = vpack.c.bf16 %v3247_v34, %v3234_v31  ;;  %v5379_v52 = vld [vmem:[#allocation3 + $0x778] sm:$0xf0]  ;;  %v5378_v63 = vor.u32 %v6774_v49, %v5377_v48  ;;  %v4601_v34 = vld [vmem:[#allocation3 + $0x70] sm:$0xf] }
  0xed   :  { %3479 = vmatpush.bf16.msra.mxu3 %v4598_v55  ;;  %v4099_v55 = vperm.slane %v7208_v14, 4  ;;  %v4611_v48 = vld [vmem:[#allocation3 + $0x178] sm:$0xf0] }
  0xee   :  { %3441 = vmatmul.bf16.vlgmr.msra.gmra.mxu0 %v7168_v0  ;;  %3454 = vmatmul.bf16.vlgmr.msra.gmra.mxu1 %v7168_v0  ;;  %v3993_v58 = vunpack.c.l.bf16 %v3957_v39  ;;  %v3994_v50 = vunpack.c.h.bf16 %v3957_v39  ;;  %v4603_v39 = vld [vmem:[#allocation3 + $0x170] sm:$0xf0] }
  0xef   :  { %3485 = vmatpush.bf16.msrb.mxu0 %v6394_v56  ;;  %3498 = vmatpush.bf16.msrb.mxu1 %v6398_v60  ;;  %v4100_v56 = vperm.slane %v7208_v14, 6  ;;  %v6709_v60 = vld [vmem:[#allocation3 + $0x56c] sm:$0xf0]  ;;  %v4227_v17 = vperm.slane %v4099_v55, 0  ;;  %v6411_v55 = vld [vmem:[#allocation3 + $0xf80] sm:$0xf0] }
  0xf0   :  { %3511 = vmatpush.bf16.msrb.mxu2 %v6402_v61  ;;  %3480 = vmatmul.bf16.vlgmr.msra.gmra.mxu3 %v7168_v0  ;;  %v4289_v61 = vmul.f32 %v4225_v40, %v3993_v58  ;;  %v4290_v62 = vmul.f32 %v4226_v41, %v3994_v50  ;;  %v5114_v11 = vor.u32 %v6709_v60, %v5113_v59  ;;  %v4609_v40 = vld [vmem:[#allocation3 + $0x78] sm:$0xf]  ;;  %v6409_v50 = vld [vmem:[#allocation3 + $0xe80] sm:$0xf]  ;;  %v7032_v59 = vld [vmem:[#allocation3 + $0xf84] sm:$0xf0] }
  0xf1   :  { %3524 = vmatpush.bf16.msrb.mxu3 %v6406_v2  ;;  %3467 = vmatmul.bf16.vlgmr.msra.gmra.mxu2 %v7168_v0  ;;  %v5382_v2 = vor.u32 %v6742_v51, %v5379_v52  ;;  %v4228_v18 = vperm.slane %v4100_v56, 0  ;;  %v6582_v41 = vld [vmem:[#allocation3 + $0x174] sm:$0xf0]  ;;  %v7031_v51 = vld [vmem:[#allocation3 + $0xf7c] sm:$0xf0] }
  0xf2   :  { %v6999_v52 = vld [vmem:[#allocation3 + $0xe84] sm:$0xf]  ;;  %v6417_v56 = vld [vmem:[#allocation3 + $0xe88] sm:$0xf] }
  0xf3   :  { %3486 = vmatpush.bf16.msrb.mxu0 %v6138_v8  ;;  %3499 = vmatpush.bf16.msrb.mxu1 %v6142_v9  ;;  %v4361_v8 = vsel %vm4345_vm0, %v4289_v61, 0.0  ;;  %v4363_v9 = vsel %vm4345_vm0, %v4290_v62, 0.0  ;;  %v3236_v14 = vpop.f32.mrf.mxu0  ;;  %v3249_v19 = vpop.f32.mrf.mxu1  ;;  %v4610_v62 = vor.u32 %v6582_v41, %v4609_v40  ;;  %v6414_v4 = vor.u32 %v6999_v52, %v6411_v55  ;;  %v6776_v55 = vld [vmem:[#allocation3 + $0x784] sm:$0xf0] }
  0xf4   :  { %3512 = vmatpush.bf16.msrb.mxu2 %v6146_v10  ;;  %v3260_v3 = vpop.f32.mrf.mxu2  ;;  %v3273_v10 = vpop.f32.mrf.mxu3  ;;  %v6936_v14 = vld [vmem:[#allocation3 + $0xc8c] sm:$0xf]  ;;  %v6162_v19 = vor.u32 %v6968_v13, %v6161_v12  ;;  %v5131_v13 = vld [vmem:[#allocation3 + $0x580] sm:$0xf0] }
  0xf5   :  { %3525 = vmatpush.bf16.msrb.mxu3 %v6150_v15  ;;  %v4362_v15 = vadd.f32 %v4361_v8, %v7203_v47  ;;  %v3958_v16 = vpack.c.bf16 %v3273_v10, %v3260_v3  ;;  %v6646_v47 = vld [vmem:[#allocation3 + $0x374] sm:$0xf0]  ;;  %v6410_v3 = vor.u32 %v7031_v51, %v6409_v50  ;;  %v6967_v8 = vld [vmem:[#allocation3 + $0xd7c] sm:$0xf0]  ;;  %v6743_v50 = vld [vmem:[#allocation3 + $0x684] sm:$0xf] }
  0xf6   :  { %v5387_v51 = vld [vmem:[#allocation3 + $0x780] sm:$0xf0] }
  0xf7   :  { %3487 = vmatpush.bf16.msrb.mxu0 %v5882_v57  ;;  %3500 = vmatpush.bf16.msrb.mxu1 %v5886_v23  ;;  %v5122_v57 = vor.u32 %v6710_v7, %v5121_v6  ;;  %v6613_v23 = vld [vmem:[#allocation3 + $0x274] sm:$0xf]  ;;  %v3995_v25 = vunpack.c.l.bf16 %v3958_v16  ;;  %v3996_v26 = vunpack.c.h.bf16 %v3958_v16  ;;  %v6418_v6 = vor.u32 %v7032_v59, %v6417_v56  ;;  %v6153_v7 = vld [vmem:[#allocation3 + $0xc80] sm:$0xf] }
  0xf8   :  { %3513 = vmatpush.bf16.msrb.mxu2 %v5890_v24  ;;  %v4364_v24 = vadd.f32 %v4363_v9, %v4362_v15  ;;  %v4862_v37 = vor.u32 %v6613_v23, %v4859_v45  ;;  %v6935_v9 = vld [vmem:[#allocation3 + $0xc84] sm:$0xf]  ;;  %v6163_v15 = vld [vmem:[#allocation3 + $0xd88] sm:$0xf0]  ;;  %v6154_v16 = vor.u32 %v6967_v8, %v6153_v7 }
  0xf9   :  { %3526 = vmatpush.bf16.msrb.mxu3 %v5894_v28  ;;  %v4865_v28 = vld [vmem:[#allocation3 + $0x278] sm:$0xf]  ;;  %v4291_v31 = vmul.f32 %v4227_v17, %v3995_v25  ;;  %v4292_v32 = vmul.f32 %v4228_v18, %v3996_v26  ;;  %v7226_v17 = vunpack.c.h.bf16 %v7205_v5  ;;  %v6166_v22 = vor.u32 %v6936_v14, %v6163_v15  ;;  %v5899_v23 = vld [vmem:[#allocation3 + $0xb80] sm:$0xf0]  ;;  %v6904_v25 = vld [vmem:[#allocation3 + $0xb84] sm:$0xf0] }
  0xfa   :  { %v4866_v38 = vor.u32 %v6646_v47, %v4865_v28  ;;  %v6872_v5 = vld [vmem:[#allocation3 + $0xa8c] sm:$0xf]  ;;  %v5641_v47 = vld [vmem:[#allocation3 + $0x880] sm:$0xf]  ;;  %v5902_v30 = vor.u32 %v6871_v21, %v5899_v23  ;;  %v5137_v14 = vld [vmem:[#allocation3 + $0x488] sm:$0xf] }
  0xfb   :  { %3488 = vmatpush.bf16.msrb.mxu0 %v5626_v35  ;;  %3501 = vmatpush.bf16.msrb.mxu1 %v5630_v36  ;;  %v6581_v35 = vld [vmem:[#allocation3 + $0x16c] sm:$0xf0]  ;;  %v6549_v36 = vld [vmem:[#allocation3 + $0x74] sm:$0xf]  ;;  %v4367_v43 = vsel %vm4345_vm0, %v4292_v32, 0.0  ;;  %v4101_v28 = vperm.slane %v7226_v17, 0 }
  0xfc   :  { %3514 = vmatpush.bf16.msrb.mxu2 %v5634_v42  ;;  %v4365_v42 = vsel %vm4345_vm0, %v4291_v31, 0.0  ;;  %v3262_v49 = vpop.f32.mrf.mxu2  ;;  %v4606_v61 = vor.u32 %v6549_v36, %v4603_v39  ;;  %v5907_v26 = vld [vmem:[#allocation3 + $0xb88] sm:$0xf0]  ;;  %v6807_v32 = vld [vmem:[#allocation3 + $0x884] sm:$0xf]  ;;  %v4103_v52 = vperm.slane %v7226_v17, 4 }
  0xfd   :  { %3527 = vmatpush.bf16.msrb.mxu3 %v5638_v46  ;;  %v6550_v46 = vld [vmem:[#allocation3 + $0x7c] sm:$0xf]  ;;  %v4366_v58 = vadd.f32 %v4365_v42, %v4364_v24  ;;  %v5905_v24 = vld [vmem:[#allocation3 + $0xa88] sm:$0xf]  ;;  %v5651_v39 = vld [vmem:[#allocation3 + $0x988] sm:$0xf0]  ;;  %v5642_v42 = vor.u32 %v6839_v29, %v5641_v47 }
  0xfe   :  { %v5906_v31 = vor.u32 %v6904_v25, %v5905_v24  ;;  %v6840_v36 = vld [vmem:[#allocation3 + $0x984] sm:$0xf0]  ;;  %v4229_v41 = vperm.slane %v4101_v28, 0  ;;  %v4231_v8 = vperm.slane %v4103_v52, 0  ;;  %v6647_v28 = vld [vmem:[#allocation3 + $0x37c] sm:$0xf0] }
  0xff   :  { %3489 = vmatpush.bf16.msrb.mxu0 %v5370_v53  ;;  %3502 = vmatpush.bf16.msrb.mxu1 %v5374_v54  ;;  %v3275_v53 = vpop.f32.mrf.mxu3  ;;  %v4602_v54 = vor.u32 %v6581_v35, %v4601_v34  ;;  %v7223_v60 = vadd.f32 %v4367_v43, %v4366_v58  ;;  %v5910_v34 = vor.u32 %v6872_v5, %v5907_v26  ;;  %v5649_v35 = vld [vmem:[#allocation3 + $0x888] sm:$0xf]  ;;  %v6615_v47 = vld [vmem:[#allocation3 + $0x284] sm:$0xf]  ;;  %v4627_v52 = vld [vmem:[#allocation3 + $0x188] sm:$0xf0] }
 0x100   :  { %3515 = vmatpush.bf16.msrb.mxu2 %v5378_v63  ;;  %v7000_v63 = vld [vmem:[#allocation3 + $0xe8c] sm:$0xf]  ;;  %v5650_v58 = vor.u32 %v6840_v36, %v5649_v35  ;;  %v6712_v15 = vld [vmem:[#allocation3 + $0x584] sm:$0xf0] }
 0x101   :  { %3528 = vmatpush.bf16.msrb.mxu3 %v5382_v2  ;;  %v4614_v2 = vor.u32 %v6550_v46, %v4611_v48  ;;  %v6422_v10 = vor.u32 %v7000_v63, %v6419_v1  ;;  %v6775_v46 = vld [vmem:[#allocation3 + $0x77c] sm:$0xf0]  ;;  %v5390_v1 = vor.u32 %v6743_v50, %v5387_v51  ;;  %v5138_v26 = vor.u32 %v6712_v15, %v5137_v14  ;;  %v4883_v35 = vld [vmem:[#allocation3 + $0x388] sm:$0xf0]  ;;  %v6969_v14 = vld [vmem:[#allocation3 + $0xd8c] sm:$0xf0] }
 0x102   :  { %v6552_v51 = vld [vmem:[#allocation3 + $0x8c] sm:$0xf]  ;;  %v6937_v15 = vld [vmem:[#allocation3 + $0xc94] sm:$0xf] }
 0x103   :  { %3490 = vmatpush.bf16.msrb.mxu0 %v5114_v11  ;;  %3503 = vmatpush.bf16.msrb.mxu1 %v5118_v20  ;;  %v6155_v11 = vld [vmem:[#allocation3 + $0xd80] sm:$0xf0]  ;;  %v5897_v20 = vld [vmem:[#allocation3 + $0xa80] sm:$0xf] }
 0x104   :  { %3516 = vmatpush.bf16.msrb.mxu2 %v5122_v57  ;;  %v6158_v18 = vor.u32 %v6935_v9, %v6155_v11  ;;  %v6903_v57 = vld [vmem:[#allocation3 + $0xb7c] sm:$0xf0] }
 0x105   :  { %3529 = vmatpush.bf16.msrb.mxu3 %v5126_v27  ;;  %v7234_v27 = vld [vmem:[%s7421_s0] sm:$0x1]  ;;  %v5898_v45 = vor.u32 %v6903_v57, %v5897_v20  ;;  %v5139_v20 = vld [vmem:[#allocation3 + $0x588] sm:$0xf0] }
 0x106   :  { %v6711_v9 = vld [vmem:[#allocation3 + $0x57c] sm:$0xf0] }
 0x107   :  { %3491 = vmatpush.bf16.msrb.mxu0 %v4858_v33  ;;  %3504 = vmatpush.bf16.msrb.mxu1 %v4862_v37  ;;  %v5643_v33 = vld [vmem:[#allocation3 + $0x980] sm:$0xf0] }
 0x108   :  { %3517 = vmatpush.bf16.msrb.mxu2 %v4866_v38  ;;  %v6808_v38 = vld [vmem:[#allocation3 + $0x88c] sm:$0xf]  ;;  %v5646_v43 = vor.u32 %v6807_v32, %v5643_v33  ;;  %v4875_v32 = vld [vmem:[#allocation3 + $0x380] sm:$0xf0]  ;;  %v4881_v33 = vld [vmem:[#allocation3 + $0x288] sm:$0xf] }
 0x109   :  { %3530 = vmatpush.bf16.msrb.mxu3 %v4870_v44  ;;  %v5385_v44 = vld [vmem:[#allocation3 + $0x680] sm:$0xf]  ;;  %v5654_v53 = vor.u32 %v6808_v38, %v5651_v39 }
 0x10a   :  { %v5386_v63 = vor.u32 %v6775_v46, %v5385_v44  ;;  %v4617_v39 = vld [vmem:[#allocation3 + $0x80] sm:$0xf]  ;;  %v4619_v44 = vld [vmem:[#allocation3 + $0x180] sm:$0xf0]  ;;  %v4625_v46 = vld [vmem:[#allocation3 + $0x88] sm:$0xf] }
 0x10b   :  { %3492 = vmatpush.bf16.msrb.mxu0 %v4602_v54  ;;  %3505 = vmatpush.bf16.msrb.mxu1 %v4606_v61  ;;  %v3286_v37 = vpop.f32.mrf.mxu0  ;;  %v3299_v40 = vpop.f32.mrf.mxu1  ;;  %v5393_v54 = vld [vmem:[#allocation3 + $0x688] sm:$0xf]  ;;  %v6744_v61 = vld [vmem:[#allocation3 + $0x68c] sm:$0xf] }
 0x10c   :  { %3518 = vmatpush.bf16.msrb.mxu2 %v4610_v62  ;;  %v3959_v48 = vpack.c.bf16 %v3299_v40, %v3286_v37  ;;  %v5395_v62 = vld [vmem:[#allocation3 + $0x788] sm:$0xf0]  ;;  %v5394_v7 = vor.u32 %v6776_v55, %v5393_v54  ;;  %v6583_v40 = vld [vmem:[#allocation3 + $0x17c] sm:$0xf0]  ;;  %v6425_v55 = vld [vmem:[#allocation3 + $0xe90] sm:$0xf] }
 0x10d   :  { %3531 = vmatpush.bf16.msrb.mxu3 %v4614_v2  ;;  %v4104_v2 = vperm.slane %v7226_v17, 6  ;;  %v5398_v11 = vor.u32 %v6744_v61, %v5395_v62  ;;  %v4618_v62 = vor.u32 %v6583_v40, %v4617_v39  ;;  %v5665_v40 = vld [vmem:[#allocation3 + $0x898] sm:$0xf] }
 0x10e   :  { %3493 = vmatmul.bf16.vlgmr.msrb.gmra.mxu0 %v7168_v0  ;;  %3506 = vmatmul.bf16.vlgmr.msrb.gmra.mxu1 %v7168_v0  ;;  %v3997_v56 = vunpack.c.l.bf16 %v3959_v48  ;;  %v3998_v59 = vunpack.c.h.bf16 %v3959_v48  ;;  %v6584_v48 = vld [vmem:[#allocation3 + $0x184] sm:$0xf0] }
 0x10f   :  { %3537 = vmatpush.bf16.msra.mxu0 %v6410_v3  ;;  %3550 = vmatpush.bf16.msra.mxu1 %v6414_v4  ;;  %v5129_v3 = vld [vmem:[#allocation3 + $0x480] sm:$0xf]  ;;  %v4232_v23 = vperm.slane %v4104_v2, 0  ;;  %v7034_v2 = vld [vmem:[#allocation3 + $0xf94] sm:$0xf0] }
 0x110   :  { %3563 = vmatpush.bf16.msra.mxu2 %v6418_v6  ;;  %3532 = vmatmul.bf16.vlgmr.msrb.gmra.mxu3 %v7234_v27  ;;  %v4293_v4 = vmul.f32 %v4229_v41, %v3997_v56  ;;  %v5130_v24 = vor.u32 %v6711_v9, %v5129_v3  ;;  %v6551_v41 = vld [vmem:[#allocation3 + $0x84] sm:$0xf]  ;;  %v7033_v56 = vld [vmem:[#allocation3 + $0xf8c] sm:$0xf0]  ;;  %v4630_v9 = vor.u32 %v6552_v51, %v4627_v52 }
 0x111   :  { %3576 = vmatpush.bf16.msra.mxu3 %v6422_v10  ;;  %3519 = vmatmul.bf16.vlgmr.msrb.gmra.mxu2 %v7168_v0  ;;  %v4102_v0 = vperm.slane %v7226_v17, 2  ;;  %v6679_v10 = vld [vmem:[#allocation3 + $0x484] sm:$0xf]  ;;  %v5401_v51 = vld [vmem:[#allocation3 + $0x690] sm:$0xf] }
 0x112   :  { %v5134_v5 = vor.u32 %v6679_v10, %v5131_v13  ;;  %v6426_v10 = vor.u32 %v7033_v56, %v6425_v55  ;;  %v6777_v52 = vld [vmem:[#allocation3 + $0x78c] sm:$0xf0] }
 0x113   :  { %3538 = vmatpush.bf16.msra.mxu0 %v6154_v16  ;;  %3551 = vmatpush.bf16.msra.mxu1 %v6158_v18  ;;  %v4230_v49 = vperm.slane %v4102_v0, 0  ;;  %v4369_v16 = vsel %vm4345_vm0, %v4293_v4, 0.0  ;;  %v3325_v17 = vpop.f32.mrf.mxu3  ;;  %v3288_v57 = vpop.f32.mrf.mxu0  ;;  %v4622_v4 = vor.u32 %v6551_v41, %v4619_v44  ;;  %v6842_v41 = vld [vmem:[#allocation3 + $0x994] sm:$0xf0]  ;;  %v6810_v44 = vld [vmem:[#allocation3 + $0x89c] sm:$0xf] }
 0x114   :  { %3564 = vmatpush.bf16.msra.mxu2 %v6162_v19  ;;  %v3312_v12 = vpop.f32.mrf.mxu2  ;;  %v6680_v19 = vld [vmem:[#allocation3 + $0x48c] sm:$0xf]  ;;  %v4370_v21 = vadd.f32 %v4369_v16, %v7223_v60  ;;  %v3301_v25 = vpop.f32.mrf.mxu1  ;;  %v6648_v60 = vld [vmem:[#allocation3 + $0x384] sm:$0xf0]  ;;  %v6171_v16 = vld [vmem:[#allocation3 + $0xd90] sm:$0xf0] }
 0x115   :  { %3577 = vmatpush.bf16.msra.mxu3 %v6166_v22  ;;  %v4294_v6 = vmul.f32 %v4230_v49, %v3998_v59  ;;  %v3960_v22 = vpack.c.bf16 %v3325_v17, %v3312_v12  ;;  %v5142_v0 = vor.u32 %v6680_v19, %v5139_v20  ;;  %v7001_v59 = vld [vmem:[#allocation3 + $0xe94] sm:$0xf]  ;;  %v6177_v17 = vld [vmem:[#allocation3 + $0xc98] sm:$0xf]  ;;  %v6938_v57 = vld [vmem:[#allocation3 + $0xc9c] sm:$0xf] }
 0x116   :  { %v6970_v19 = vld [vmem:[#allocation3 + $0xd94] sm:$0xf0]  ;;  %v7248_v20 = vld [vmem:[#allocation5 + $0x10] sm:$0xff] }
 0x117   :  { %3539 = vmatpush.bf16.msra.mxu0 %v5898_v45  ;;  %3552 = vmatpush.bf16.msra.mxu1 %v5902_v30  ;;  %v4371_v18 = vsel %vm4345_vm0, %v4294_v6, 0.0  ;;  %v4873_v45 = vld [vmem:[#allocation3 + $0x280] sm:$0xf]  ;;  %v3999_v30 = vunpack.c.l.bf16 %v3960_v22  ;;  %v4626_v6 = vor.u32 %v6584_v48, %v4625_v46  ;;  %v5913_v25 = vld [vmem:[#allocation3 + $0xa90] sm:$0xf] }
 0x118   :  { %3565 = vmatpush.bf16.msra.mxu2 %v5906_v31  ;;  %v4372_v29 = vadd.f32 %v4371_v18, %v4370_v21  ;;  %v4000_v31 = vunpack.c.h.bf16 %v3960_v22  ;;  %v4874_v38 = vor.u32 %v6647_v28, %v4873_v45  ;;  %v6179_v21 = vld [vmem:[#allocation3 + $0xd98] sm:$0xf0]  ;;  %v7251_v45 = vunpack.c.l.bf16 %v7248_v20 }
 0x119   :  { %3578 = vmatpush.bf16.msra.mxu3 %v5910_v34  ;;  %v6616_v34 = vld [vmem:[#allocation3 + $0x28c] sm:$0xf]  ;;  %v4295_v36 = vmul.f32 %v4231_v8, %v3999_v30  ;;  %v6435_v8 = vld [vmem:[#allocation3 + $0xf98] sm:$0xf0]  ;;  %v6182_v28 = vor.u32 %v6938_v57, %v6179_v21  ;;  %v6906_v30 = vld [vmem:[#allocation3 + $0xb94] sm:$0xf0] }
 0x11a   :  { %v4296_v37 = vmul.f32 %v4232_v23, %v4000_v31  ;;  %v4886_v50 = vor.u32 %v6616_v34, %v4883_v35  ;;  %v6174_v23 = vor.u32 %v6937_v15, %v6171_v16  ;;  %v6874_v31 = vld [vmem:[#allocation3 + $0xa9c] sm:$0xf]  ;;  %v6809_v34 = vld [vmem:[#allocation3 + $0x894] sm:$0xf]  ;;  %v4106_v39 = vperm.slane %v7251_v45, 2 }
 0x11b   :  { %3540 = vmatpush.bf16.msra.mxu0 %v5642_v42  ;;  %3553 = vmatpush.bf16.msra.mxu1 %v5646_v43  ;;  %v4878_v42 = vor.u32 %v6615_v47, %v4875_v32  ;;  %v4882_v43 = vor.u32 %v6648_v60, %v4881_v33  ;;  %v4373_v49 = vsel %vm4345_vm0, %v4295_v36, 0.0  ;;  %v3327_v61 = vpop.f32.mrf.mxu3  ;;  %v5915_v47 = vld [vmem:[#allocation3 + $0xb90] sm:$0xf0]  ;;  %v5657_v32 = vld [vmem:[#allocation3 + $0x890] sm:$0xf] }
 0x11c   :  { %3566 = vmatpush.bf16.msra.mxu2 %v5650_v58  ;;  %v4375_v58 = vsel %vm4345_vm0, %v4296_v37, 0.0  ;;  %v4374_v54 = vadd.f32 %v4373_v49, %v4372_v29  ;;  %v5921_v29 = vld [vmem:[#allocation3 + $0xa98] sm:$0xf]  ;;  %v6841_v60 = vld [vmem:[#allocation3 + $0x98c] sm:$0xf0]  ;;  %v4234_v56 = vperm.slane %v4106_v39, 0 }
 0x11d   :  { %3579 = vmatpush.bf16.msra.mxu3 %v5654_v53  ;;  %v3314_v53 = vpop.f32.mrf.mxu2  ;;  %v5659_v35 = vld [vmem:[#allocation3 + $0x990] sm:$0xf0]  ;;  %v5922_v37 = vor.u32 %v6906_v30, %v5921_v29  ;;  %v5667_v46 = vld [vmem:[#allocation3 + $0x998] sm:$0xf0]  ;;  %v5658_v49 = vor.u32 %v6841_v60, %v5657_v32  ;;  %v4107_v61 = vperm.slane %v7251_v45, 4 }
 0x11e   :  { %v7246_v3 = vadd.f32 %v4375_v58, %v4374_v54  ;;  %v5662_v58 = vor.u32 %v6809_v34, %v5659_v35  ;;  %v6745_v53 = vld [vmem:[#allocation3 + $0x694] sm:$0xf]  ;;  %v6713_v16 = vld [vmem:[#allocation3 + $0x58c] sm:$0xf0]  ;;  %v5153_v21 = vld [vmem:[#allocation3 + $0x498] sm:$0xf] }
 0x11f   :  { %3541 = vmatpush.bf16.msra.mxu0 %v5386_v63  ;;  %3554 = vmatpush.bf16.msra.mxu1 %v5390_v1  ;;  %v6427_v63 = vld [vmem:[#allocation3 + $0xf90] sm:$0xf0]  ;;  %v6433_v1 = vld [vmem:[#allocation3 + $0xe98] sm:$0xf]  ;;  %v4235_v15 = vperm.slane %v4107_v61, 0 }
 0x120   :  { %3567 = vmatpush.bf16.msra.mxu2 %v5394_v7  ;;  %v7002_v7 = vld [vmem:[#allocation3 + $0xe9c] sm:$0xf]  ;;  %v6430_v12 = vor.u32 %v7001_v59, %v6427_v63  ;;  %v6434_v13 = vor.u32 %v7034_v2, %v6433_v1  ;;  %v5403_v59 = vld [vmem:[#allocation3 + $0x790] sm:$0xf0]  ;;  %v5409_v63 = vld [vmem:[#allocation3 + $0x698] sm:$0xf] }
 0x121   :  { %3580 = vmatpush.bf16.msra.mxu3 %v5398_v11  ;;  %v6169_v11 = vld [vmem:[#allocation3 + $0xc90] sm:$0xf]  ;;  %v6438_v18 = vor.u32 %v7002_v7, %v6435_v8  ;;  %v6778_v1 = vld [vmem:[#allocation3 + $0x794] sm:$0xf0]  ;;  %v5411_v7 = vld [vmem:[#allocation3 + $0x798] sm:$0xf0]  ;;  %v5402_v8 = vor.u32 %v6777_v52, %v5401_v51 }
 0x122   :  { %v6170_v22 = vor.u32 %v6969_v14, %v6169_v11  ;;  %v5145_v11 = vld [vmem:[#allocation3 + $0x490] sm:$0xf]  ;;  %v5410_v14 = vor.u32 %v6778_v1, %v5409_v63  ;;  %v5147_v57 = vld [vmem:[#allocation3 + $0x590] sm:$0xf0]  ;;  %v6554_v61 = vld [vmem:[#allocation3 + $0x9c] sm:$0xf] }
 0x123   :  { %3542 = vmatpush.bf16.msra.mxu0 %v5130_v24  ;;  %3555 = vmatpush.bf16.msra.mxu1 %v5134_v5  ;;  %v6178_v24 = vor.u32 %v6970_v19, %v6177_v17  ;;  %v6905_v5 = vld [vmem:[#allocation3 + $0xb8c] sm:$0xf0]  ;;  %v5146_v30 = vor.u32 %v6713_v16, %v5145_v11  ;;  %v6617_v34 = vld [vmem:[#allocation3 + $0x294] sm:$0xf]  ;;  %v7036_v11 = vld [vmem:[#allocation3 + $0xfa4] sm:$0xf0] }
 0x124   :  { %3568 = vmatpush.bf16.msra.mxu2 %v5138_v26  ;;  %v6873_v26 = vld [vmem:[#allocation3 + $0xa94] sm:$0xf]  ;;  %v5914_v33 = vor.u32 %v6905_v5, %v5913_v25  ;;  %v6682_v5 = vld [vmem:[#allocation3 + $0x49c] sm:$0xf]  ;;  %v6649_v60 = vld [vmem:[#allocation3 + $0x38c] sm:$0xf0] }
 0x125   :  { %3581 = vmatpush.bf16.msra.mxu3 %v5142_v0  ;;  %v5923_v0 = vld [vmem:[#allocation3 + $0xb98] sm:$0xf0]  ;;  %v5918_v36 = vor.u32 %v6873_v26, %v5915_v47  ;;  %v4891_v39 = vld [vmem:[#allocation3 + $0x390] sm:$0xf0]  ;;  %v6451_v16 = vld [vmem:[#allocation3 + $0xfa8] sm:$0xf0] }
 0x126   :  { %v5155_v26 = vld [vmem:[#allocation3 + $0x598] sm:$0xf0]  ;;  %v4635_v52 = vld [vmem:[#allocation3 + $0x190] sm:$0xf0] }
 0x127   :  { %3543 = vmatpush.bf16.msra.mxu0 %v4874_v38  ;;  %3556 = vmatpush.bf16.msra.mxu1 %v4878_v42  ;;  %v4105_v38 = vperm.slane %v7251_v45, 0  ;;  %v5926_v42 = vor.u32 %v6874_v31, %v5923_v0 }
 0x128   :  { %3569 = vmatpush.bf16.msra.mxu2 %v4882_v43 }
 0x129   :  { %3582 = vmatpush.bf16.msra.mxu3 %v4886_v50  ;;  %v5666_v50 = vor.u32 %v6842_v41, %v5665_v40  ;;  %v4233_v55 = vperm.slane %v4105_v38, 0  ;;  %v5158_v38 = vor.u32 %v6682_v5, %v5155_v26  ;;  %v4897_v40 = vld [vmem:[#allocation3 + $0x298] sm:$0xf]  ;;  %v6618_v41 = vld [vmem:[#allocation3 + $0x29c] sm:$0xf] }
 0x12a   :  { %v6193_v5 = vld [vmem:[#allocation3 + $0xca8] sm:$0xf] }
 0x12b   :  { %3544 = vmatpush.bf16.msra.mxu0 %v4618_v62  ;;  %3557 = vmatpush.bf16.msra.mxu1 %v4622_v4  ;;  %v3338_v43 = vpop.f32.mrf.mxu0  ;;  %v3351_v48 = vpop.f32.mrf.mxu1  ;;  %v5670_v62 = vor.u32 %v6810_v44, %v5667_v46  ;;  %v6972_v26 = vld [vmem:[#allocation3 + $0xda4] sm:$0xf0] }
 0x12c   :  { %3570 = vmatpush.bf16.msra.mxu2 %v4626_v6  ;;  %v3961_v54 = vpack.c.bf16 %v3351_v48, %v3338_v43  ;;  %v6746_v6 = vld [vmem:[#allocation3 + $0x69c] sm:$0xf]  ;;  %v4633_v48 = vld [vmem:[#allocation3 + $0x90] sm:$0xf] }
 0x12d   :  { %3583 = vmatpush.bf16.msra.mxu3 %v4630_v9  ;;  %v5406_v9 = vor.u32 %v6745_v53, %v5403_v59  ;;  %v5414_v17 = vor.u32 %v6746_v6, %v5411_v7  ;;  %v4641_v53 = vld [vmem:[#allocation3 + $0x98] sm:$0xf]  ;;  %v7003_v6 = vld [vmem:[#allocation3 + $0xea4] sm:$0xf] }
 0x12e   :  { %3545 = vmatmul.bf16.vlgmr.msra.gmra.mxu0 %v7234_v27  ;;  %3558 = vmatmul.bf16.vlgmr.msra.gmra.mxu1 %v7234_v27  ;;  %v4001_v2 = vunpack.c.l.bf16 %v3961_v54  ;;  %v4002_v4 = vunpack.c.h.bf16 %v3961_v54  ;;  %v6586_v54 = vld [vmem:[#allocation3 + $0x194] sm:$0xf0] }
 0x12f   :  { %3589 = vmatpush.bf16.msrb.mxu0 %v6426_v10  ;;  %3602 = vmatpush.bf16.msrb.mxu1 %v6430_v12  ;;  %v4108_v10 = vperm.slane %v7251_v45, 6 }
 0x130   :  { %3615 = vmatpush.bf16.msrb.mxu2 %v6434_v13  ;;  %3584 = vmatmul.bf16.vlgmr.msra.gmra.mxu3 %v7234_v27  ;;  %v4297_v12 = vmul.f32 %v4233_v55, %v4001_v2  ;;  %v4298_v13 = vmul.f32 %v4234_v56, %v4002_v4  ;;  %v6441_v2 = vld [vmem:[#allocation3 + $0xea0] sm:$0xf] }
 0x131   :  { %3628 = vmatpush.bf16.msrb.mxu3 %v6438_v18  ;;  %3571 = vmatmul.bf16.vlgmr.msra.gmra.mxu2 %v7234_v27  ;;  %v6681_v18 = vld [vmem:[#allocation3 + $0x494] sm:$0xf]  ;;  %v4236_v29 = vperm.slane %v4108_v10, 0  ;;  %v7035_v4 = vld [vmem:[#allocation3 + $0xf9c] sm:$0xf0] }
 0x132   :  { %v5150_v0 = vor.u32 %v6681_v18, %v5147_v57  ;;  %v6449_v10 = vld [vmem:[#allocation3 + $0xea8] sm:$0xf] }
 0x133   :  { %3590 = vmatpush.bf16.msrb.mxu0 %v6170_v22  ;;  %3603 = vmatpush.bf16.msrb.mxu1 %v6174_v23  ;;  %v6714_v22 = vld [vmem:[#allocation3 + $0x594] sm:$0xf0]  ;;  %v4377_v23 = vsel %vm4345_vm0, %v4297_v12, 0.0  ;;  %v3377_v25 = vpop.f32.mrf.mxu3  ;;  %v3340_v45 = vpop.f32.mrf.mxu0  ;;  %v6450_v57 = vor.u32 %v7036_v11, %v6449_v10 }
 0x134   :  { %3616 = vmatpush.bf16.msrb.mxu2 %v6178_v24  ;;  %v3364_v19 = vpop.f32.mrf.mxu2  ;;  %v4379_v24 = vsel %vm4345_vm0, %v4298_v13, 0.0  ;;  %v3353_v31 = vpop.f32.mrf.mxu1  ;;  %v5154_v32 = vor.u32 %v6714_v22, %v5153_v21  ;;  %v6185_v21 = vld [vmem:[#allocation3 + $0xca0] sm:$0xf]  ;;  %v6940_v45 = vld [vmem:[#allocation3 + $0xcac] sm:$0xf] }
 0x135   :  { %3629 = vmatpush.bf16.msrb.mxu3 %v6182_v28  ;;  %v4378_v28 = vadd.f32 %v4377_v23, %v7246_v3  ;;  %v3962_v47 = vpack.c.bf16 %v3377_v25, %v3364_v19  ;;  %v6650_v3 = vld [vmem:[#allocation3 + $0x394] sm:$0xf0]  ;;  %v6971_v22 = vld [vmem:[#allocation3 + $0xd9c] sm:$0xf0]  ;;  %v6939_v23 = vld [vmem:[#allocation3 + $0xca4] sm:$0xf]  ;;  %v6194_v31 = vor.u32 %v6972_v26, %v6193_v5 }
 0x136   :  { %v4898_v51 = vor.u32 %v6650_v3, %v4897_v40  ;;  %v6187_v25 = vld [vmem:[#allocation3 + $0xda0] sm:$0xf0]  ;;  %v5673_v40 = vld [vmem:[#allocation3 + $0x8a0] sm:$0xf] }
 0x137   :  { %3591 = vmatpush.bf16.msrb.mxu0 %v5914_v33  ;;  %3604 = vmatpush.bf16.msrb.mxu1 %v5918_v36  ;;  %v4889_v33 = vld [vmem:[#allocation3 + $0x290] sm:$0xf]  ;;  %v4380_v35 = vadd.f32 %v4379_v24, %v4378_v28  ;;  %v4003_v36 = vunpack.c.l.bf16 %v3962_v47  ;;  %v6195_v28 = vld [vmem:[#allocation3 + $0xda8] sm:$0xf0]  ;;  %v6843_v3 = vld [vmem:[#allocation3 + $0x99c] sm:$0xf0] }
 0x138   :  { %3617 = vmatpush.bf16.msrb.mxu2 %v5922_v37  ;;  %v4004_v37 = vunpack.c.h.bf16 %v3962_v47  ;;  %v4890_v46 = vor.u32 %v6649_v60, %v4889_v33  ;;  %v6186_v47 = vor.u32 %v6971_v22, %v6185_v21  ;;  %v6875_v33 = vld [vmem:[#allocation3 + $0xaa4] sm:$0xf]  ;;  %v6198_v60 = vor.u32 %v6940_v45, %v6195_v28  ;;  %v5169_v45 = vld [vmem:[#allocation3 + $0x4a8] sm:$0xf] }
 0x139   :  { %3630 = vmatpush.bf16.msrb.mxu3 %v5926_v42  ;;  %v4899_v42 = vld [vmem:[#allocation3 + $0x398] sm:$0xf0]  ;;  %v4299_v43 = vmul.f32 %v4235_v15, %v4003_v36  ;;  %v7004_v15 = vld [vmem:[#allocation3 + $0xeac] sm:$0xf]  ;;  %v6908_v36 = vld [vmem:[#allocation3 + $0xba4] sm:$0xf0] }
 0x13a   :  { %v4300_v44 = vmul.f32 %v4236_v29, %v4004_v37  ;;  %v4902_v59 = vor.u32 %v6618_v41, %v4899_v42  ;;  %v6454_v24 = vor.u32 %v7004_v15, %v6451_v16  ;;  %v7269_v29 = vunpack.c.h.bf16 %v7248_v20  ;;  %v6876_v20 = vld [vmem:[#allocation3 + $0xaac] sm:$0xf]  ;;  %v5163_v26 = vld [vmem:[#allocation3 + $0x5a0] sm:$0xf0]  ;;  %v6716_v28 = vld [vmem:[#allocation3 + $0x5a4] sm:$0xf0] }
 0x13b   :  { %3592 = vmatpush.bf16.msrb.mxu0 %v5658_v49  ;;  %3605 = vmatpush.bf16.msrb.mxu1 %v5662_v58  ;;  %v6585_v49 = vld [vmem:[#allocation3 + $0x18c] sm:$0xf0]  ;;  %v6553_v58 = vld [vmem:[#allocation3 + $0x94] sm:$0xf]  ;;  %v4381_v55 = vsel %vm4345_vm0, %v4299_v43, 0.0  ;;  %v3379_v7 = vpop.f32.mrf.mxu3 }
 0x13c   :  { %3618 = vmatpush.bf16.msrb.mxu2 %v5666_v50  ;;  %v4894_v50 = vor.u32 %v6617_v34, %v4891_v39  ;;  %v4383_v56 = vsel %vm4345_vm0, %v4300_v44, 0.0  ;;  %v3366_v63 = vpop.f32.mrf.mxu2  ;;  %v4382_v1 = vadd.f32 %v4381_v55, %v4380_v35  ;;  %v4638_v13 = vor.u32 %v6553_v58, %v4635_v52  ;;  %v5931_v34 = vld [vmem:[#allocation3 + $0xba0] sm:$0xf0]  ;;  %v5937_v35 = vld [vmem:[#allocation3 + $0xaa8] sm:$0xf] }
 0x13d   :  { %3631 = vmatpush.bf16.msrb.mxu3 %v5670_v62  ;;  %v4643_v62 = vld [vmem:[#allocation3 + $0x198] sm:$0xf0]  ;;  %v5939_v37 = vld [vmem:[#allocation3 + $0xba8] sm:$0xf0]  ;;  %v4109_v39 = vperm.slane %v7269_v29, 0  ;;  %v5934_v41 = vor.u32 %v6875_v33, %v5931_v34  ;;  %v5938_v42 = vor.u32 %v6908_v36, %v5937_v35  ;;  %v4110_v43 = vperm.slane %v7269_v29, 2 }
 0x13e   :  { %v7266_v12 = vadd.f32 %v4383_v56, %v4382_v1  ;;  %v4646_v18 = vor.u32 %v6554_v61, %v4643_v62  ;;  %v6811_v44 = vld [vmem:[#allocation3 + $0x8a4] sm:$0xf]  ;;  %v6844_v58 = vld [vmem:[#allocation3 + $0x9a4] sm:$0xf0]  ;;  %v5683_v52 = vld [vmem:[#allocation3 + $0x9a8] sm:$0xf0]  ;;  %v5674_v55 = vor.u32 %v6843_v3, %v5673_v40 }
 0x13f   :  { %3593 = vmatpush.bf16.msrb.mxu0 %v5402_v8  ;;  %3606 = vmatpush.bf16.msrb.mxu1 %v5406_v9  ;;  %v4634_v8 = vor.u32 %v6585_v49, %v4633_v48  ;;  %v6443_v9 = vld [vmem:[#allocation3 + $0xfa0] sm:$0xf0]  ;;  %v5942_v48 = vor.u32 %v6876_v20, %v5939_v37  ;;  %v5681_v49 = vld [vmem:[#allocation3 + $0x8a8] sm:$0xf]  ;;  %v6779_v61 = vld [vmem:[#allocation3 + $0x79c] sm:$0xf0]  ;;  %v5170_v37 = vor.u32 %v6716_v28, %v5169_v45 }
 0x140   :  { %3619 = vmatpush.bf16.msrb.mxu2 %v5410_v14  ;;  %v4642_v14 = vor.u32 %v6586_v54, %v4641_v53  ;;  %v6446_v19 = vor.u32 %v7003_v6, %v6443_v9  ;;  %v4237_v54 = vperm.slane %v4109_v39, 0  ;;  %v4238_v63 = vperm.slane %v4110_v43, 0  ;;  %v6780_v9 = vld [vmem:[#allocation3 + $0x7a4] sm:$0xf0]  ;;  %v6651_v39 = vld [vmem:[#allocation3 + $0x39c] sm:$0xf0] }
 0x141   :  { %3632 = vmatpush.bf16.msrb.mxu3 %v5414_v17  ;;  %v6442_v17 = vor.u32 %v7035_v4, %v6441_v2  ;;  %v5682_v1 = vor.u32 %v6844_v58, %v5681_v49  ;;  %v6747_v2 = vld [vmem:[#allocation3 + $0x6a4] sm:$0xf]  ;;  %v4111_v6 = vperm.slane %v7269_v29, 4  ;;  %v4915_v49 = vld [vmem:[#allocation3 + $0x3a8] sm:$0xf0] }
 0x142   :  { %v5419_v4 = vld [vmem:[#allocation3 + $0x7a0] sm:$0xf0]  ;;  %v6973_v45 = vld [vmem:[#allocation3 + $0xdac] sm:$0xf0]  ;;  %v6941_v28 = vld [vmem:[#allocation3 + $0xcb4] sm:$0xf] }
 0x143   :  { %3594 = vmatpush.bf16.msrb.mxu0 %v5146_v30  ;;  %3607 = vmatpush.bf16.msrb.mxu1 %v5150_v0  ;;  %v6190_v30 = vor.u32 %v6939_v23, %v6187_v25  ;;  %v5929_v0 = vld [vmem:[#allocation3 + $0xaa0] sm:$0xf]  ;;  %v5422_v16 = vor.u32 %v6747_v2, %v5419_v4  ;;  %v4239_v22 = vperm.slane %v4111_v6, 0  ;;  %v6619_v40 = vld [vmem:[#allocation3 + $0x2a4] sm:$0xf] }
 0x144   :  { %3620 = vmatpush.bf16.msrb.mxu2 %v5154_v32  ;;  %v6907_v32 = vld [vmem:[#allocation3 + $0xb9c] sm:$0xf0]  ;;  %v6556_v4 = vld [vmem:[#allocation3 + $0xac] sm:$0xf] }
 0x145   :  { %3633 = vmatpush.bf16.msrb.mxu3 %v5158_v38  ;;  %v5930_v38 = vor.u32 %v6907_v32, %v5929_v0  ;;  %v6715_v23 = vld [vmem:[#allocation3 + $0x59c] sm:$0xf0]  ;;  %v5171_v0 = vld [vmem:[#allocation3 + $0x5a8] sm:$0xf0] }
 0x146   :  { %v4659_v6 = vld [vmem:[#allocation3 + $0x1a8] sm:$0xf0] }
 0x147   :  { %3595 = vmatpush.bf16.msrb.mxu0 %v4890_v46  ;;  %3608 = vmatpush.bf16.msrb.mxu1 %v4894_v50  ;;  %v5675_v46 = vld [vmem:[#allocation3 + $0x9a0] sm:$0xf0] }
 0x148   :  { %3621 = vmatpush.bf16.msrb.mxu2 %v4898_v51  ;;  %v6812_v51 = vld [vmem:[#allocation3 + $0x8ac] sm:$0xf]  ;;  %v5678_v56 = vor.u32 %v6811_v44, %v5675_v46  ;;  %v4907_v44 = vld [vmem:[#allocation3 + $0x3a0] sm:$0xf0]  ;;  %v4913_v46 = vld [vmem:[#allocation3 + $0x2a8] sm:$0xf] }
 0x149   :  { %3634 = vmatpush.bf16.msrb.mxu3 %v4902_v59  ;;  %v5417_v59 = vld [vmem:[#allocation3 + $0x6a0] sm:$0xf]  ;;  %v5686_v7 = vor.u32 %v6812_v51, %v5683_v52 }
 0x14a   :  { %v5418_v15 = vor.u32 %v6779_v61, %v5417_v59  ;;  %v4649_v52 = vld [vmem:[#allocation3 + $0xa0] sm:$0xf]  ;;  %v4651_v59 = vld [vmem:[#allocation3 + $0x1a0] sm:$0xf0]  ;;  %v4657_v61 = vld [vmem:[#allocation3 + $0xa8] sm:$0xf] }
 0x14b   :  { %3596 = vmatpush.bf16.msrb.mxu0 %v4634_v8  ;;  %3609 = vmatpush.bf16.msrb.mxu1 %v4638_v13  ;;  %v3390_v50 = vpop.f32.mrf.mxu0  ;;  %v3403_v53 = vpop.f32.mrf.mxu1  ;;  %v5425_v8 = vld [vmem:[#allocation3 + $0x6a8] sm:$0xf]  ;;  %v6748_v13 = vld [vmem:[#allocation3 + $0x6ac] sm:$0xf] }
 0x14c   :  { %3622 = vmatpush.bf16.msrb.mxu2 %v4642_v14  ;;  %v3963_v62 = vpack.c.bf16 %v3403_v53, %v3390_v50  ;;  %v5427_v14 = vld [vmem:[#allocation3 + $0x7a8] sm:$0xf0]  ;;  %v5426_v21 = vor.u32 %v6780_v9, %v5425_v8  ;;  %v6587_v53 = vld [vmem:[#allocation3 + $0x19c] sm:$0xf0]  ;;  %v6457_v9 = vld [vmem:[#allocation3 + $0xeb0] sm:$0xf] }
 0x14d   :  { %3635 = vmatpush.bf16.msrb.mxu3 %v4646_v18  ;;  %v4112_v18 = vperm.slane %v7269_v29, 6  ;;  %v5430_v25 = vor.u32 %v6748_v13, %v5427_v14  ;;  %v4650_v14 = vor.u32 %v6587_v53, %v4649_v52  ;;  %v5697_v53 = vld [vmem:[#allocation3 + $0x8b8] sm:$0xf] }
 0x14e   :  { %3597 = vmatmul.bf16.vlgmr.msrb.gmra.mxu0 %v7234_v27  ;;  %3610 = vmatmul.bf16.vlgmr.msrb.gmra.mxu1 %v7234_v27  ;;  %v4005_v10 = vunpack.c.l.bf16 %v3963_v62  ;;  %v4006_v11 = vunpack.c.h.bf16 %v3963_v62  ;;  %v6588_v62 = vld [vmem:[#allocation3 + $0x1a4] sm:$0xf0] }
 0x14f   :  { %3641 = vmatpush.bf16.msra.mxu0 %v6442_v17  ;;  %3654 = vmatpush.bf16.msra.mxu1 %v6446_v19  ;;  %v5161_v17 = vld [vmem:[#allocation3 + $0x4a0] sm:$0xf]  ;;  %v4240_v34 = vperm.slane %v4112_v18, 0  ;;  %v7038_v18 = vld [vmem:[#allocation3 + $0xfb4] sm:$0xf0] }
 0x150   :  { %3667 = vmatpush.bf16.msra.mxu2 %v6450_v57  ;;  %3636 = vmatmul.bf16.vlgmr.msrb.gmra.mxu3 %v7234_v27  ;;  %v4301_v19 = vmul.f32 %v4237_v54, %v4005_v10  ;;  %v4302_v57 = vmul.f32 %v4238_v63, %v4006_v11  ;;  %v5162_v35 = vor.u32 %v6715_v23, %v5161_v17  ;;  %v6555_v54 = vld [vmem:[#allocation3 + $0xa4] sm:$0xf]  ;;  %v7037_v10 = vld [vmem:[#allocation3 + $0xfac] sm:$0xf0]  ;;  %v7005_v11 = vld [vmem:[#allocation3 + $0xeb4] sm:$0xf] }
 0x151   :  { %3680 = vmatpush.bf16.msra.mxu3 %v6454_v24  ;;  %3623 = vmatmul.bf16.vlgmr.msrb.gmra.mxu2 %v7234_v27  ;;  %v6683_v24 = vld [vmem:[#allocation3 + $0x4a4] sm:$0xf]  ;;  %v4662_v23 = vor.u32 %v6556_v4, %v4659_v6  ;;  %v6781_v4 = vld [vmem:[#allocation3 + $0x7ac] sm:$0xf0]  ;;  %v6749_v6 = vld [vmem:[#allocation3 + $0x6b4] sm:$0xf] }
 0x152   :  { %v5166_v20 = vor.u32 %v6683_v24, %v5163_v26  ;;  %v6458_v24 = vor.u32 %v7037_v10, %v6457_v9  ;;  %v5435_v10 = vld [vmem:[#allocation3 + $0x7b0] sm:$0xf0] }
 0x153   :  { %3642 = vmatpush.bf16.msra.mxu0 %v6186_v47  ;;  %3655 = vmatpush.bf16.msra.mxu1 %v6190_v30  ;;  %v4385_v47 = vsel %vm4345_vm0, %v4301_v19, 0.0  ;;  %v4387_v30 = vsel %vm4345_vm0, %v4302_v57, 0.0  ;;  %v3429_v29 = vpop.f32.mrf.mxu3  ;;  %v3392_v32 = vpop.f32.mrf.mxu0  ;;  %v4654_v19 = vor.u32 %v6555_v54, %v4651_v59  ;;  %v4658_v57 = vor.u32 %v6588_v62, %v4657_v61  ;;  %v6846_v54 = vld [vmem:[#allocation3 + $0x9b4] sm:$0xf0]  ;;  %v6814_v59 = vld [vmem:[#allocation3 + $0x8bc] sm:$0xf] }
 0x154   :  { %3668 = vmatpush.bf16.msra.mxu2 %v6194_v31  ;;  %v3416_v5 = vpop.f32.mrf.mxu2  ;;  %v6684_v31 = vld [vmem:[#allocation3 + $0x4ac] sm:$0xf]  ;;  %v4386_v33 = vadd.f32 %v4385_v47, %v7266_v12  ;;  %v3405_v36 = vpop.f32.mrf.mxu1  ;;  %v6652_v12 = vld [vmem:[#allocation3 + $0x3a4] sm:$0xf0]  ;;  %v6203_v47 = vld [vmem:[#allocation3 + $0xdb0] sm:$0xf0] }
 0x155   :  { %3681 = vmatpush.bf16.msra.mxu3 %v6198_v60  ;;  %v3964_v60 = vpack.c.bf16 %v3429_v29, %v3416_v5  ;;  %v5174_v43 = vor.u32 %v6684_v31, %v5171_v0  ;;  %v6209_v29 = vld [vmem:[#allocation3 + $0xcb8] sm:$0xf]  ;;  %v6942_v32 = vld [vmem:[#allocation3 + $0xcbc] sm:$0xf]  ;;  %v5945_v36 = vld [vmem:[#allocation3 + $0xab0] sm:$0xf] }
 0x156   :  { %v4388_v3 = vadd.f32 %v4387_v30, %v4386_v33  ;;  %v6974_v31 = vld [vmem:[#allocation3 + $0xdb4] sm:$0xf0]  ;;  %v6211_v33 = vld [vmem:[#allocation3 + $0xdb8] sm:$0xf0] }
 0x157   :  { %3643 = vmatpush.bf16.msra.mxu0 %v5930_v38  ;;  %3656 = vmatpush.bf16.msra.mxu1 %v5934_v41  ;;  %v4905_v38 = vld [vmem:[#allocation3 + $0x2a0] sm:$0xf]  ;;  %v4007_v41 = vunpack.c.l.bf16 %v3964_v60  ;;  %v7286_v0 = vld [vmem:[#allocation5 + $0x18] sm:$0xff] }
 0x158   :  { %3669 = vmatpush.bf16.msra.mxu2 %v5938_v42  ;;  %v4008_v42 = vunpack.c.h.bf16 %v3964_v60  ;;  %v4906_v51 = vor.u32 %v6651_v39, %v4905_v38  ;;  %v7289_v38 = vunpack.c.l.bf16 %v7286_v0  ;;  %v6214_v39 = vor.u32 %v6942_v32, %v6211_v33  ;;  %v5185_v32 = vld [vmem:[#allocation3 + $0x4b8] sm:$0xf] }
 0x159   :  { %3682 = vmatpush.bf16.msra.mxu3 %v5942_v48  ;;  %v6620_v48 = vld [vmem:[#allocation3 + $0x2ac] sm:$0xf]  ;;  %v4303_v58 = vmul.f32 %v4239_v22, %v4007_v41  ;;  %v6467_v22 = vld [vmem:[#allocation3 + $0xfb8] sm:$0xf0]  ;;  %v6910_v41 = vld [vmem:[#allocation3 + $0xbb4] sm:$0xf0] }
 0x15a   :  { %v4304_v50 = vmul.f32 %v4240_v34, %v4008_v42  ;;  %v4918_v2 = vor.u32 %v6620_v48, %v4915_v49  ;;  %v6206_v34 = vor.u32 %v6941_v28, %v6203_v47  ;;  %v6878_v42 = vld [vmem:[#allocation3 + $0xabc] sm:$0xf]  ;;  %v6813_v48 = vld [vmem:[#allocation3 + $0x8b4] sm:$0xf]  ;;  %v4114_v52 = vperm.slane %v7289_v38, 2 }
 0x15b   :  { %3644 = vmatpush.bf16.msra.mxu0 %v5674_v55  ;;  %3657 = vmatpush.bf16.msra.mxu1 %v5678_v56  ;;  %v4910_v55 = vor.u32 %v6619_v40, %v4907_v44  ;;  %v4914_v56 = vor.u32 %v6652_v12, %v4913_v46  ;;  %v4389_v63 = vsel %vm4345_vm0, %v4303_v58, 0.0  ;;  %v3431_v13 = vpop.f32.mrf.mxu3  ;;  %v5947_v40 = vld [vmem:[#allocation3 + $0xbb0] sm:$0xf0]  ;;  %v5689_v44 = vld [vmem:[#allocation3 + $0x8b0] sm:$0xf] }
 0x15c   :  { %3670 = vmatpush.bf16.msra.mxu2 %v5682_v1  ;;  %v4391_v1 = vsel %vm4345_vm0, %v4304_v50, 0.0  ;;  %v4390_v8 = vadd.f32 %v4389_v63, %v4388_v3  ;;  %v5953_v3 = vld [vmem:[#allocation3 + $0xab8] sm:$0xf]  ;;  %v6845_v12 = vld [vmem:[#allocation3 + $0x9ac] sm:$0xf0]  ;;  %v4242_v9 = vperm.slane %v4114_v52, 0 }
 0x15d   :  { %3683 = vmatpush.bf16.msra.mxu3 %v5686_v7  ;;  %v3418_v7 = vpop.f32.mrf.mxu2  ;;  %v5691_v49 = vld [vmem:[#allocation3 + $0x9b0] sm:$0xf0]  ;;  %v5954_v50 = vor.u32 %v6910_v41, %v5953_v3  ;;  %v5690_v62 = vor.u32 %v6845_v12, %v5689_v44  ;;  %v6717_v28 = vld [vmem:[#allocation3 + $0x5ac] sm:$0xf0]  ;;  %v6718_v33 = vld [vmem:[#allocation3 + $0x5b4] sm:$0xf0] }
 0x15e   :  { %v7284_v17 = vadd.f32 %v4391_v1, %v4390_v8  ;;  %v5694_v63 = vor.u32 %v6813_v48, %v5691_v49  ;;  %v5698_v1 = vor.u32 %v6846_v54, %v5697_v53  ;;  %v6685_v47 = vld [vmem:[#allocation3 + $0x4b4] sm:$0xf]  ;;  %v4921_v44 = vld [vmem:[#allocation3 + $0x2b0] sm:$0xf]  ;;  %v4929_v52 = vld [vmem:[#allocation3 + $0x2b8] sm:$0xf] }
 0x15f   :  { %3645 = vmatpush.bf16.msra.mxu0 %v5418_v15  ;;  %3658 = vmatpush.bf16.msra.mxu1 %v5422_v16  ;;  %v6459_v15 = vld [vmem:[#allocation3 + $0xfb0] sm:$0xf0]  ;;  %v6465_v16 = vld [vmem:[#allocation3 + $0xeb8] sm:$0xf]  ;;  %v6622_v53 = vld [vmem:[#allocation3 + $0x2bc] sm:$0xf] }
 0x160   :  { %3671 = vmatpush.bf16.msra.mxu2 %v5426_v21  ;;  %v7006_v21 = vld [vmem:[#allocation3 + $0xebc] sm:$0xf]  ;;  %v6462_v5 = vor.u32 %v7005_v11, %v6459_v15  ;;  %v6466_v26 = vor.u32 %v7038_v18, %v6465_v16  ;;  %v4115_v11 = vperm.slane %v7289_v38, 4  ;;  %v6782_v15 = vld [vmem:[#allocation3 + $0x7b4] sm:$0xf0] }
 0x161   :  { %3684 = vmatpush.bf16.msra.mxu3 %v5430_v25  ;;  %v6201_v25 = vld [vmem:[#allocation3 + $0xcb0] sm:$0xf]  ;;  %v6470_v30 = vor.u32 %v7006_v21, %v6467_v22  ;;  %v5438_v22 = vor.u32 %v6749_v6, %v5435_v10  ;;  %v6621_v12 = vld [vmem:[#allocation3 + $0x2b4] sm:$0xf]  ;;  %v4931_v54 = vld [vmem:[#allocation3 + $0x3b8] sm:$0xf0] }
 0x162   :  { %v6202_v60 = vor.u32 %v6973_v45, %v6201_v25  ;;  %v4243_v45 = vperm.slane %v4115_v11, 0  ;;  %v6590_v6 = vld [vmem:[#allocation3 + $0x1b4] sm:$0xf0]  ;;  %v6558_v10 = vld [vmem:[#allocation3 + $0xbc] sm:$0xf] }
 0x163   :  { %3646 = vmatpush.bf16.msra.mxu0 %v5162_v35  ;;  %3659 = vmatpush.bf16.msra.mxu1 %v5166_v20  ;;  %v6210_v35 = vor.u32 %v6974_v31, %v6209_v29  ;;  %v6909_v20 = vld [vmem:[#allocation3 + $0xbac] sm:$0xf0]  ;;  %v5179_v31 = vld [vmem:[#allocation3 + $0x5b0] sm:$0xf0]  ;;  %v4675_v11 = vld [vmem:[#allocation3 + $0x1b8] sm:$0xf0] }
 0x164   :  { %3672 = vmatpush.bf16.msra.mxu2 %v5170_v37  ;;  %v6877_v37 = vld [vmem:[#allocation3 + $0xab4] sm:$0xf]  ;;  %v5946_v46 = vor.u32 %v6909_v20, %v5945_v36  ;;  %v6686_v36 = vld [vmem:[#allocation3 + $0x4bc] sm:$0xf] }
 0x165   :  { %3685 = vmatpush.bf16.msra.mxu3 %v5174_v43  ;;  %v5955_v43 = vld [vmem:[#allocation3 + $0xbb8] sm:$0xf0]  ;;  %v5950_v58 = vor.u32 %v6877_v37, %v5947_v40 }
 0x166   :  { %v5187_v20 = vld [vmem:[#allocation3 + $0x5b8] sm:$0xf0] }
 0x167   :  { %3647 = vmatpush.bf16.msra.mxu0 %v4906_v51  ;;  %3660 = vmatpush.bf16.msra.mxu1 %v4910_v55  ;;  %v4113_v51 = vperm.slane %v7289_v38, 0  ;;  %v5958_v55 = vor.u32 %v6878_v42, %v5955_v43  ;;  %v5182_v42 = vor.u32 %v6685_v47, %v5179_v31  ;;  %v5186_v43 = vor.u32 %v6718_v33, %v5185_v32  ;;  %v6217_v31 = vld [vmem:[#allocation3 + $0xcc0] sm:$0xf]  ;;  %v6943_v33 = vld [vmem:[#allocation3 + $0xcc4] sm:$0xf] }
 0x168   :  { %3673 = vmatpush.bf16.msra.mxu2 %v4914_v56  ;;  %v6975_v32 = vld [vmem:[#allocation3 + $0xdbc] sm:$0xf0] }
 0x169   :  { %3686 = vmatpush.bf16.msra.mxu3 %v4918_v2  ;;  %v5433_v2 = vld [vmem:[#allocation3 + $0x6b0] sm:$0xf]  ;;  %v4241_v8 = vperm.slane %v4113_v51, 0  ;;  %v4923_v51 = vld [vmem:[#allocation3 + $0x3b0] sm:$0xf0] }
 0x16a   :  { %v5434_v21 = vor.u32 %v6781_v4, %v5433_v2  ;;  %v4667_v2 = vld [vmem:[#allocation3 + $0x1b0] sm:$0xf0]  ;;  %v4673_v4 = vld [vmem:[#allocation3 + $0xb8] sm:$0xf] }
 0x16b   :  { %3648 = vmatpush.bf16.msra.mxu0 %v4650_v14  ;;  %3661 = vmatpush.bf16.msra.mxu1 %v4654_v19  ;;  %v3442_v56 = vpop.f32.mrf.mxu0  ;;  %v3455_v61 = vpop.f32.mrf.mxu1  ;;  %v5441_v14 = vld [vmem:[#allocation3 + $0x6b8] sm:$0xf]  ;;  %v6750_v19 = vld [vmem:[#allocation3 + $0x6bc] sm:$0xf] }
 0x16c   :  { %3674 = vmatpush.bf16.msra.mxu2 %v4658_v57  ;;  %v3965_v7 = vpack.c.bf16 %v3455_v61, %v3442_v56  ;;  %v5443_v57 = vld [vmem:[#allocation3 + $0x7b8] sm:$0xf0]  ;;  %v6589_v61 = vld [vmem:[#allocation3 + $0x1ac] sm:$0xf0] }
 0x16d   :  { %3687 = vmatpush.bf16.msra.mxu3 %v4662_v23  ;;  %v4116_v23 = vperm.slane %v7289_v38, 6 }
 0x16e   :  { %3649 = vmatmul.bf16.vlgmr.msra.gmra.mxu0 %v7234_v27  ;;  %3662 = vmatmul.bf16.vlgmr.msra.gmra.mxu1 %v7234_v27  ;;  %v4009_v16 = vunpack.c.l.bf16 %v3965_v7  ;;  %v4010_v18 = vunpack.c.h.bf16 %v3965_v7 }
 0x16f   :  { %3693 = vmatpush.bf16.msrb.mxu0 %v6458_v24  ;;  %3706 = vmatpush.bf16.msrb.mxu1 %v6462_v5  ;;  %v5177_v24 = vld [vmem:[#allocation3 + $0x4b0] sm:$0xf]  ;;  %v4244_v40 = vperm.slane %v4116_v23, 0  ;;  %v7040_v23 = vld [vmem:[#allocation3 + $0xfc4] sm:$0xf0] }
 0x170   :  { %3719 = vmatpush.bf16.msrb.mxu2 %v6466_v26  ;;  %3688 = vmatmul.bf16.vlgmr.msra.gmra.mxu3 %v7234_v27  ;;  %v4305_v25 = vmul.f32 %v4241_v8, %v4009_v16  ;;  %v4306_v5 = vmul.f32 %v4242_v9, %v4010_v18  ;;  %v5442_v26 = vor.u32 %v6782_v15, %v5441_v14  ;;  %v6473_v15 = vld [vmem:[#allocation3 + $0xec0] sm:$0xf]  ;;  %v7007_v18 = vld [vmem:[#allocation3 + $0xec4] sm:$0xf] }
 0x171   :  { %3732 = vmatpush.bf16.msrb.mxu3 %v6470_v30  ;;  %3675 = vmatmul.bf16.vlgmr.msra.gmra.mxu2 %v7234_v27  ;;  %v5699_v27 = vld [vmem:[#allocation3 + $0x9b8] sm:$0xf0]  ;;  %v5446_v30 = vor.u32 %v6750_v19, %v5443_v57  ;;  %v5178_v3 = vor.u32 %v6717_v28, %v5177_v24  ;;  %v4934_v9 = vor.u32 %v6622_v53, %v4931_v54  ;;  %v7039_v16 = vld [vmem:[#allocation3 + $0xfbc] sm:$0xf0] }
 0x172   :  { %v5702_v13 = vor.u32 %v6814_v59, %v5699_v27  ;;  %v4665_v27 = vld [vmem:[#allocation3 + $0xb0] sm:$0xf]  ;;  %v4678_v28 = vor.u32 %v6558_v10, %v4675_v11  ;;  %v6474_v47 = vor.u32 %v7039_v16, %v6473_v15  ;;  %v6783_v10 = vld [vmem:[#allocation3 + $0x7bc] sm:$0xf0]  ;;  %v6751_v15 = vld [vmem:[#allocation3 + $0x6c4] sm:$0xf] }
 0x173   :  { %3694 = vmatpush.bf16.msrb.mxu0 %v6202_v60  ;;  %3707 = vmatpush.bf16.msrb.mxu1 %v6206_v34  ;;  %v4393_v60 = vsel %vm4345_vm0, %v4305_v25, 0.0  ;;  %v4395_v34 = vsel %vm4345_vm0, %v4306_v5, 0.0  ;;  %v3444_v37 = vpop.f32.mrf.mxu0  ;;  %v3457_v41 = vpop.f32.mrf.mxu1  ;;  %v4666_v57 = vor.u32 %v6589_v61, %v4665_v27  ;;  %v4674_v5 = vor.u32 %v6590_v6, %v4673_v4  ;;  %v5713_v61 = vld [vmem:[#allocation3 + $0x8c8] sm:$0xf]  ;;  %v5451_v16 = vld [vmem:[#allocation3 + $0x7c0] sm:$0xf0] }
 0x174   :  { %3720 = vmatpush.bf16.msrb.mxu2 %v6210_v35  ;;  %v3468_v29 = vpop.f32.mrf.mxu2  ;;  %v3481_v35 = vpop.f32.mrf.mxu3  ;;  %v4394_v38 = vadd.f32 %v4393_v60, %v7284_v17  ;;  %v6654_v17 = vld [vmem:[#allocation3 + $0x3b4] sm:$0xf0]  ;;  %v6227_v37 = vld [vmem:[#allocation3 + $0xdc8] sm:$0xf0]  ;;  %v5961_v41 = vld [vmem:[#allocation3 + $0xac0] sm:$0xf] }
 0x175   :  { %3733 = vmatpush.bf16.msrb.mxu3 %v6214_v39  ;;  %v3966_v39 = vpack.c.bf16 %v3481_v35, %v3468_v29  ;;  %v6225_v35 = vld [vmem:[#allocation3 + $0xcc8] sm:$0xf] }
 0x176   :  { %v4396_v48 = vadd.f32 %v4395_v34, %v4394_v38  ;;  %v6219_v34 = vld [vmem:[#allocation3 + $0xdc0] sm:$0xf0]  ;;  %v6218_v38 = vor.u32 %v6975_v32, %v6217_v31 }
 0x177   :  { %3695 = vmatpush.bf16.msrb.mxu0 %v5946_v46  ;;  %3708 = vmatpush.bf16.msrb.mxu1 %v5950_v58  ;;  %v6653_v46 = vld [vmem:[#allocation3 + $0x3ac] sm:$0xf0]  ;;  %v4011_v49 = vunpack.c.l.bf16 %v3966_v39  ;;  %v4012_v58 = vunpack.c.h.bf16 %v3966_v39  ;;  %v7307_v39 = vunpack.c.h.bf16 %v7286_v0  ;;  %v6912_v0 = vld [vmem:[#allocation3 + $0xbc4] sm:$0xf0] }
 0x178   :  { %3721 = vmatpush.bf16.msrb.mxu2 %v5954_v50  ;;  %v5190_v50 = vor.u32 %v6686_v36, %v5187_v20  ;;  %v4922_v59 = vor.u32 %v6653_v46, %v4921_v44  ;;  %v6976_v36 = vld [vmem:[#allocation3 + $0xdc4] sm:$0xf0]  ;;  %v6944_v20 = vld [vmem:[#allocation3 + $0xccc] sm:$0xf]  ;;  %v7312_v44 = vld [vmem:[%s7421_s0] sm:$0x1] }
 0x179   :  { %3734 = vmatpush.bf16.msrb.mxu3 %v5958_v55  ;;  %v4307_v55 = vmul.f32 %v4243_v45, %v4011_v49  ;;  %v4308_v56 = vmul.f32 %v4244_v40, %v4012_v58  ;;  %v6483_v45 = vld [vmem:[#allocation3 + $0xfc8] sm:$0xf0]  ;;  %v6222_v40 = vor.u32 %v6943_v33, %v6219_v34  ;;  %v6230_v46 = vor.u32 %v6944_v20, %v6227_v37  ;;  %v6719_v33 = vld [vmem:[#allocation3 + $0x5bc] sm:$0xf0]  ;;  %v5201_v20 = vld [vmem:[#allocation3 + $0x4c8] sm:$0xf] }
 0x17a   :  { %v6880_v49 = vld [vmem:[#allocation3 + $0xacc] sm:$0xf]  ;;  %v6720_v37 = vld [vmem:[#allocation3 + $0x5c4] sm:$0xf0] }
 0x17b   :  { %3696 = vmatpush.bf16.msrb.mxu0 %v5690_v62  ;;  %3709 = vmatpush.bf16.msrb.mxu1 %v5694_v63  ;;  %v6557_v62 = vld [vmem:[#allocation3 + $0xb4] sm:$0xf]  ;;  %v4926_v63 = vor.u32 %v6621_v12, %v4923_v51  ;;  %v4397_v7 = vsel %vm4345_vm0, %v4307_v55, 0.0  ;;  %v4399_v8 = vsel %vm4345_vm0, %v4308_v56, 0.0  ;;  %v5963_v12 = vld [vmem:[#allocation3 + $0xbc0] sm:$0xf0] }
 0x17c   :  { %3722 = vmatpush.bf16.msrb.mxu2 %v5698_v1  ;;  %v4930_v1 = vor.u32 %v6654_v17, %v4929_v52  ;;  %v4398_v14 = vadd.f32 %v4397_v7, %v4396_v48  ;;  %v3483_v19 = vpop.f32.mrf.mxu3  ;;  %v4670_v25 = vor.u32 %v6557_v62, %v4667_v2  ;;  %v5969_v48 = vld [vmem:[#allocation3 + $0xac8] sm:$0xf]  ;;  %v5971_v58 = vld [vmem:[#allocation3 + $0xbc8] sm:$0xf0]  ;;  %v4117_v51 = vperm.slane %v7307_v39, 0 }
 0x17d   :  { %3735 = vmatpush.bf16.msrb.mxu3 %v5702_v13  ;;  %v3470_v13 = vpop.f32.mrf.mxu2  ;;  %v5705_v52 = vld [vmem:[#allocation3 + $0x8c0] sm:$0xf]  ;;  %v5970_v54 = vor.u32 %v6912_v0, %v5969_v48  ;;  %v4118_v55 = vperm.slane %v7307_v39, 2  ;;  %v6815_v56 = vld [vmem:[#allocation3 + $0x8c4] sm:$0xf]  ;;  %v5974_v27 = vor.u32 %v6880_v49, %v5971_v58  ;;  %v5202_v58 = vor.u32 %v6720_v37, %v5201_v20 }
 0x17e   :  { %v7304_v24 = vadd.f32 %v4399_v8, %v4398_v14  ;;  %v6847_v17 = vld [vmem:[#allocation3 + $0x9bc] sm:$0xf0]  ;;  %v6848_v62 = vld [vmem:[#allocation3 + $0x9c4] sm:$0xf0]  ;;  %v5715_v2 = vld [vmem:[#allocation3 + $0x9c8] sm:$0xf0] }
 0x17f   :  { %3697 = vmatpush.bf16.msrb.mxu0 %v5434_v21  ;;  %3710 = vmatpush.bf16.msrb.mxu1 %v5438_v22  ;;  %v6475_v21 = vld [vmem:[#allocation3 + $0xfc0] sm:$0xf0]  ;;  %v6481_v22 = vld [vmem:[#allocation3 + $0xec8] sm:$0xf]  ;;  %v4245_v6 = vperm.slane %v4117_v51, 0  ;;  %v5706_v7 = vor.u32 %v6847_v17, %v5705_v52  ;;  %v4246_v13 = vperm.slane %v4118_v55, 0  ;;  %v5714_v14 = vor.u32 %v6848_v62, %v5713_v61 }
 0x180   :  { %3723 = vmatpush.bf16.msrb.mxu2 %v5442_v26  ;;  %v7008_v26 = vld [vmem:[#allocation3 + $0xecc] sm:$0xf]  ;;  %v6482_v29 = vor.u32 %v7040_v23, %v6481_v22  ;;  %v6655_v51 = vld [vmem:[#allocation3 + $0x3bc] sm:$0xf0]  ;;  %v6623_v52 = vld [vmem:[#allocation3 + $0x2c4] sm:$0xf] }
 0x181   :  { %3736 = vmatpush.bf16.msrb.mxu3 %v5446_v30  ;;  %v6478_v30 = vor.u32 %v7007_v18, %v6475_v21  ;;  %v6486_v60 = vor.u32 %v7008_v26, %v6483_v45  ;;  %v4119_v18 = vperm.slane %v7307_v39, 4  ;;  %v6784_v21 = vld [vmem:[#allocation3 + $0x7c4] sm:$0xf0]  ;;  %v5454_v45 = vor.u32 %v6751_v15, %v5451_v16  ;;  %v4947_v61 = vld [vmem:[#allocation3 + $0x3c8] sm:$0xf0] }
 0x182   :  { %v6560_v16 = vld [vmem:[#allocation3 + $0xcc] sm:$0xf]  ;;  %v6977_v20 = vld [vmem:[#allocation3 + $0xdcc] sm:$0xf0]  ;;  %v6945_v37 = vld [vmem:[#allocation3 + $0xcd4] sm:$0xf] }
 0x183   :  { %3698 = vmatpush.bf16.msrb.mxu0 %v5178_v3  ;;  %3711 = vmatpush.bf16.msrb.mxu1 %v5182_v42  ;;  %v6226_v3 = vor.u32 %v6976_v36, %v6225_v35  ;;  %v6911_v42 = vld [vmem:[#allocation3 + $0xbbc] sm:$0xf0]  ;;  %v4247_v32 = vperm.slane %v4119_v18, 0  ;;  %v5195_v36 = vld [vmem:[#allocation3 + $0x5c0] sm:$0xf0] }
 0x184   :  { %3724 = vmatpush.bf16.msrb.mxu2 %v5186_v43  ;;  %v6879_v43 = vld [vmem:[#allocation3 + $0xac4] sm:$0xf]  ;;  %v4691_v18 = vld [vmem:[#allocation3 + $0x1c8] sm:$0xf0] }
 0x185   :  { %3737 = vmatpush.bf16.msrb.mxu3 %v5190_v50  ;;  %v5962_v50 = vor.u32 %v6911_v42, %v5961_v41  ;;  %v5966_v53 = vor.u32 %v6879_v43, %v5963_v12  ;;  %v5203_v41 = vld [vmem:[#allocation3 + $0x5c8] sm:$0xf0] }
 0x187   :  { %3699 = vmatpush.bf16.msrb.mxu0 %v4922_v59  ;;  %3712 = vmatpush.bf16.msrb.mxu1 %v4926_v63  ;;  %v5707_v59 = vld [vmem:[#allocation3 + $0x9c0] sm:$0xf0] }
 0x188   :  { %3725 = vmatpush.bf16.msrb.mxu2 %v4930_v1  ;;  %v6816_v1 = vld [vmem:[#allocation3 + $0x8cc] sm:$0xf]  ;;  %v5710_v8 = vor.u32 %v6815_v56, %v5707_v59  ;;  %v4939_v56 = vld [vmem:[#allocation3 + $0x3c0] sm:$0xf0]  ;;  %v4945_v59 = vld [vmem:[#allocation3 + $0x2c8] sm:$0xf] }
 0x189   :  { %3738 = vmatpush.bf16.msrb.mxu3 %v4934_v9  ;;  %v5449_v9 = vld [vmem:[#allocation3 + $0x6c0] sm:$0xf]  ;;  %v5718_v19 = vor.u32 %v6816_v1, %v5715_v2 }
 0x18a   :  { %v5450_v26 = vor.u32 %v6783_v10, %v5449_v9  ;;  %v4681_v2 = vld [vmem:[#allocation3 + $0xc0] sm:$0xf]  ;;  %v4683_v9 = vld [vmem:[#allocation3 + $0x1c0] sm:$0xf0]  ;;  %v4689_v10 = vld [vmem:[#allocation3 + $0xc8] sm:$0xf] }
 0x18b   :  { %3700 = vmatpush.bf16.msrb.mxu0 %v4666_v57  ;;  %3713 = vmatpush.bf16.msrb.mxu1 %v4670_v25  ;;  %v3494_v63 = vpop.f32.mrf.mxu0  ;;  %v3507_v4 = vpop.f32.mrf.mxu1  ;;  %v5457_v57 = vld [vmem:[#allocation3 + $0x6c8] sm:$0xf]  ;;  %v6752_v25 = vld [vmem:[#allocation3 + $0x6cc] sm:$0xf] }
 0x18c   :  { %3726 = vmatpush.bf16.msrb.mxu2 %v4674_v5  ;;  %v3967_v11 = vpack.c.bf16 %v3507_v4, %v3494_v63  ;;  %v5459_v5 = vld [vmem:[#allocation3 + $0x7c8] sm:$0xf0]  ;;  %v5458_v31 = vor.u32 %v6784_v21, %v5457_v57  ;;  %v6591_v4 = vld [vmem:[#allocation3 + $0x1bc] sm:$0xf0]  ;;  %v6489_v21 = vld [vmem:[#allocation3 + $0xed0] sm:$0xf] }
 0x18d   :  { %3739 = vmatpush.bf16.msrb.mxu3 %v4678_v28  ;;  %v4120_v28 = vperm.slane %v7307_v39, 6  ;;  %v5462_v34 = vor.u32 %v6752_v25, %v5459_v5  ;;  %v4682_v5 = vor.u32 %v6591_v4, %v4681_v2  ;;  %v5729_v4 = vld [vmem:[#allocation3 + $0x8d8] sm:$0xf] }
 0x18e   :  { %3701 = vmatmul.bf16.vlgmr.msrb.gmra.mxu0 %v7312_v44  ;;  %3714 = vmatmul.bf16.vlgmr.msrb.gmra.mxu1 %v7312_v44  ;;  %v4013_v22 = vunpack.c.l.bf16 %v3967_v11  ;;  %v4014_v23 = vunpack.c.h.bf16 %v3967_v11  ;;  %v6592_v11 = vld [vmem:[#allocation3 + $0x1c4] sm:$0xf0] }
 0x18f   :  { %3745 = vmatpush.bf16.msra.mxu0 %v6474_v47  ;;  %3758 = vmatpush.bf16.msra.mxu1 %v6478_v30  ;;  %v5193_v47 = vld [vmem:[#allocation3 + $0x4c0] sm:$0xf]  ;;  %v4248_v12 = vperm.slane %v4120_v28, 0  ;;  %v7042_v28 = vld [vmem:[#allocation3 + $0xfd4] sm:$0xf0] }
 0x190   :  { %3771 = vmatpush.bf16.msra.mxu2 %v6482_v29  ;;  %3740 = vmatmul.bf16.vlgmr.msrb.gmra.mxu3 %v7312_v44  ;;  %v4309_v30 = vmul.f32 %v4245_v6, %v4013_v22  ;;  %v4310_v29 = vmul.f32 %v4246_v13, %v4014_v23  ;;  %v5194_v48 = vor.u32 %v6719_v33, %v5193_v47  ;;  %v6559_v6 = vld [vmem:[#allocation3 + $0xc4] sm:$0xf]  ;;  %v7041_v22 = vld [vmem:[#allocation3 + $0xfcc] sm:$0xf0]  ;;  %v7009_v23 = vld [vmem:[#allocation3 + $0xed4] sm:$0xf] }
 0x191   :  { %3784 = vmatpush.bf16.msra.mxu3 %v6486_v60  ;;  %3727 = vmatmul.bf16.vlgmr.msrb.gmra.mxu2 %v7312_v44  ;;  %v6687_v60 = vld [vmem:[#allocation3 + $0x4c4] sm:$0xf]  ;;  %v4694_v33 = vor.u32 %v6560_v16, %v4691_v18  ;;  %v5465_v16 = vld [vmem:[#allocation3 + $0x6d0] sm:$0xf] }
 0x192   :  { %v5198_v49 = vor.u32 %v6687_v60, %v5195_v36  ;;  %v6490_v60 = vor.u32 %v7041_v22, %v6489_v21  ;;  %v6785_v18 = vld [vmem:[#allocation3 + $0x7cc] sm:$0xf0] }
 0x193   :  { %3746 = vmatpush.bf16.msra.mxu0 %v6218_v38  ;;  %3759 = vmatpush.bf16.msra.mxu1 %v6222_v40  ;;  %v4401_v38 = vsel %vm4345_vm0, %v4309_v30, 0.0  ;;  %v4403_v40 = vsel %vm4345_vm0, %v4310_v29, 0.0  ;;  %v3533_v39 = vpop.f32.mrf.mxu3  ;;  %v3496_v42 = vpop.f32.mrf.mxu0  ;;  %v4686_v30 = vor.u32 %v6559_v6, %v4683_v9  ;;  %v4690_v29 = vor.u32 %v6592_v11, %v4689_v10  ;;  %v6850_v6 = vld [vmem:[#allocation3 + $0x9d4] sm:$0xf0]  ;;  %v6818_v9 = vld [vmem:[#allocation3 + $0x8dc] sm:$0xf] }
 0x194   :  { %3772 = vmatpush.bf16.msra.mxu2 %v6226_v3  ;;  %v3520_v35 = vpop.f32.mrf.mxu2  ;;  %v6688_v3 = vld [vmem:[#allocation3 + $0x4cc] sm:$0xf]  ;;  %v4402_v43 = vadd.f32 %v4401_v38, %v7304_v24  ;;  %v3509_v0 = vpop.f32.mrf.mxu1  ;;  %v6656_v24 = vld [vmem:[#allocation3 + $0x3c4] sm:$0xf0]  ;;  %v6235_v38 = vld [vmem:[#allocation3 + $0xdd0] sm:$0xf0] }
 0x195   :  { %3785 = vmatpush.bf16.msra.mxu3 %v6230_v46  ;;  %v3968_v46 = vpack.c.bf16 %v3533_v39, %v3520_v35  ;;  %v5206_v55 = vor.u32 %v6688_v3, %v5203_v41  ;;  %v6241_v39 = vld [vmem:[#allocation3 + $0xcd8] sm:$0xf]  ;;  %v7329_v41 = vld [vmem:[#allocation5 + $0x20] sm:$0xff]  ;;  %v6946_v42 = vld [vmem:[#allocation3 + $0xcdc] sm:$0xf] }
 0x196   :  { %v4404_v17 = vadd.f32 %v4403_v40, %v4402_v43  ;;  %v6978_v3 = vld [vmem:[#allocation3 + $0xdd4] sm:$0xf0]  ;;  %v6243_v43 = vld [vmem:[#allocation3 + $0xdd8] sm:$0xf0]  ;;  %v5977_v0 = vld [vmem:[#allocation3 + $0xad0] sm:$0xf] }
 0x197   :  { %3747 = vmatpush.bf16.msra.mxu0 %v5962_v50  ;;  %3760 = vmatpush.bf16.msra.mxu1 %v5966_v53  ;;  %v4937_v50 = vld [vmem:[#allocation3 + $0x2c0] sm:$0xf]  ;;  %v4015_v53 = vunpack.c.l.bf16 %v3968_v46  ;;  %v5731_v10 = vld [vmem:[#allocation3 + $0x9d8] sm:$0xf0] }
 0x198   :  { %3773 = vmatpush.bf16.msra.mxu2 %v5970_v54  ;;  %v4016_v54 = vunpack.c.h.bf16 %v3968_v46  ;;  %v4938_v1 = vor.u32 %v6655_v51, %v4937_v50  ;;  %v7332_v50 = vunpack.c.l.bf16 %v7329_v41  ;;  %v6246_v51 = vor.u32 %v6946_v42, %v6243_v43  ;;  %v5211_v42 = vld [vmem:[#allocation3 + $0x5d0] sm:$0xf0]  ;;  %v5217_v43 = vld [vmem:[#allocation3 + $0x4d8] sm:$0xf] }
 0x199   :  { %3786 = vmatpush.bf16.msra.mxu3 %v5974_v27  ;;  %v6624_v27 = vld [vmem:[#allocation3 + $0x2cc] sm:$0xf]  ;;  %v4311_v62 = vmul.f32 %v4247_v32, %v4015_v53  ;;  %v6499_v32 = vld [vmem:[#allocation3 + $0xfd8] sm:$0xf0]  ;;  %v6914_v53 = vld [vmem:[#allocation3 + $0xbd4] sm:$0xf0] }
 0x19a   :  { %v4312_v63 = vmul.f32 %v4248_v12, %v4016_v54  ;;  %v4950_v15 = vor.u32 %v6624_v27, %v4947_v61  ;;  %v6238_v12 = vor.u32 %v6945_v37, %v6235_v38  ;;  %v6882_v54 = vld [vmem:[#allocation3 + $0xadc] sm:$0xf]  ;;  %v6817_v27 = vld [vmem:[#allocation3 + $0x8d4] sm:$0xf]  ;;  %v4122_v2 = vperm.slane %v7332_v50, 2 }
 0x19b   :  { %3748 = vmatpush.bf16.msra.mxu0 %v5706_v7  ;;  %3761 = vmatpush.bf16.msra.mxu1 %v5710_v8  ;;  %v4942_v7 = vor.u32 %v6623_v52, %v4939_v56  ;;  %v4946_v8 = vor.u32 %v6656_v24, %v4945_v59  ;;  %v4405_v13 = vsel %vm4345_vm0, %v4311_v62, 0.0  ;;  %v3535_v25 = vpop.f32.mrf.mxu3  ;;  %v5979_v52 = vld [vmem:[#allocation3 + $0xbd0] sm:$0xf0]  ;;  %v5721_v56 = vld [vmem:[#allocation3 + $0x8d0] sm:$0xf] }
 0x19c   :  { %3774 = vmatpush.bf16.msra.mxu2 %v5714_v14  ;;  %v4407_v14 = vsel %vm4345_vm0, %v4312_v63, 0.0  ;;  %v4406_v57 = vadd.f32 %v4405_v13, %v4404_v17  ;;  %v5985_v17 = vld [vmem:[#allocation3 + $0xad8] sm:$0xf]  ;;  %v6849_v24 = vld [vmem:[#allocation3 + $0x9cc] sm:$0xf0]  ;;  %v4250_v22 = vperm.slane %v4122_v2, 0 }
 0x19d   :  { %3787 = vmatpush.bf16.msra.mxu3 %v5718_v19  ;;  %v3522_v19 = vpop.f32.mrf.mxu2  ;;  %v5723_v61 = vld [vmem:[#allocation3 + $0x9d0] sm:$0xf0]  ;;  %v5986_v63 = vor.u32 %v6914_v53, %v5985_v17  ;;  %v5722_v13 = vor.u32 %v6849_v24, %v5721_v56  ;;  %v4123_v25 = vperm.slane %v7332_v50, 4  ;;  %v6721_v38 = vld [vmem:[#allocation3 + $0x5cc] sm:$0xf0] }
 0x19e   :  { %v7327_v47 = vadd.f32 %v4407_v14, %v4406_v57  ;;  %v5726_v14 = vor.u32 %v6817_v27, %v5723_v61  ;;  %v6753_v19 = vld [vmem:[#allocation3 + $0x6d4] sm:$0xf]  ;;  %v6657_v24 = vld [vmem:[#allocation3 + $0x3cc] sm:$0xf0] }
 0x19f   :  { %3749 = vmatpush.bf16.msra.mxu0 %v5450_v26  ;;  %3762 = vmatpush.bf16.msra.mxu1 %v5454_v45  ;;  %v6491_v26 = vld [vmem:[#allocation3 + $0xfd0] sm:$0xf0]  ;;  %v6497_v45 = vld [vmem:[#allocation3 + $0xed8] sm:$0xf]  ;;  %v4251_v37 = vperm.slane %v4123_v25, 0 }
 0x1a0   :  { %3775 = vmatpush.bf16.msra.mxu2 %v5458_v31  ;;  %v7010_v31 = vld [vmem:[#allocation3 + $0xedc] sm:$0xf]  ;;  %v6494_v35 = vor.u32 %v7009_v23, %v6491_v26  ;;  %v6498_v36 = vor.u32 %v7042_v28, %v6497_v45  ;;  %v5467_v23 = vld [vmem:[#allocation3 + $0x7d0] sm:$0xf0]  ;;  %v5473_v26 = vld [vmem:[#allocation3 + $0x6d8] sm:$0xf] }
 0x1a1   :  { %3788 = vmatpush.bf16.msra.mxu3 %v5462_v34  ;;  %v6233_v34 = vld [vmem:[#allocation3 + $0xcd0] sm:$0xf]  ;;  %v6502_v40 = vor.u32 %v7010_v31, %v6499_v32  ;;  %v6786_v45 = vld [vmem:[#allocation3 + $0x7d4] sm:$0xf0]  ;;  %v5475_v31 = vld [vmem:[#allocation3 + $0x7d8] sm:$0xf0]  ;;  %v5466_v32 = vor.u32 %v6785_v18, %v5465_v16 }
 0x1a2   :  { %v6234_v46 = vor.u32 %v6977_v20, %v6233_v34  ;;  %v5209_v34 = vld [vmem:[#allocation3 + $0x4d0] sm:$0xf]  ;;  %v5474_v20 = vor.u32 %v6786_v45, %v5473_v26  ;;  %v6625_v27 = vld [vmem:[#allocation3 + $0x2d4] sm:$0xf]  ;;  %v6562_v25 = vld [vmem:[#allocation3 + $0xdc] sm:$0xf] }
 0x1a3   :  { %3750 = vmatpush.bf16.msra.mxu0 %v5194_v48  ;;  %3763 = vmatpush.bf16.msra.mxu1 %v5198_v49  ;;  %v6242_v48 = vor.u32 %v6978_v3, %v6241_v39  ;;  %v6913_v49 = vld [vmem:[#allocation3 + $0xbcc] sm:$0xf0]  ;;  %v5210_v53 = vor.u32 %v6721_v38, %v5209_v34  ;;  %v4955_v2 = vld [vmem:[#allocation3 + $0x3d0] sm:$0xf0]  ;;  %v7044_v34 = vld [vmem:[#allocation3 + $0xfe4] sm:$0xf0] }
 0x1a4   :  { %3776 = vmatpush.bf16.msra.mxu2 %v5202_v58  ;;  %v6881_v58 = vld [vmem:[#allocation3 + $0xad4] sm:$0xf]  ;;  %v5978_v59 = vor.u32 %v6913_v49, %v5977_v0  ;;  %v6690_v49 = vld [vmem:[#allocation3 + $0x4dc] sm:$0xf]  ;;  %v6515_v38 = vld [vmem:[#allocation3 + $0xfe8] sm:$0xf0] }
 0x1a5   :  { %3789 = vmatpush.bf16.msra.mxu3 %v5206_v55  ;;  %v5987_v55 = vld [vmem:[#allocation3 + $0xbd8] sm:$0xf0]  ;;  %v5982_v62 = vor.u32 %v6881_v58, %v5979_v52  ;;  %v4699_v18 = vld [vmem:[#allocation3 + $0x1d0] sm:$0xf0] }
 0x1a6   :  { %v5219_v58 = vld [vmem:[#allocation3 + $0x5d8] sm:$0xf0] }
 0x1a7   :  { %3751 = vmatpush.bf16.msra.mxu0 %v4938_v1  ;;  %3764 = vmatpush.bf16.msra.mxu1 %v4942_v7  ;;  %v4121_v1 = vperm.slane %v7332_v50, 0  ;;  %v5990_v7 = vor.u32 %v6882_v54, %v5987_v55 }
 0x1a8   :  { %3777 = vmatpush.bf16.msra.mxu2 %v4946_v8 }
 0x1a9   :  { %3790 = vmatpush.bf16.msra.mxu3 %v4950_v15  ;;  %v5730_v15 = vor.u32 %v6850_v6, %v5729_v4  ;;  %v4249_v21 = vperm.slane %v4121_v1, 0  ;;  %v5222_v1 = vor.u32 %v6690_v49, %v5219_v58  ;;  %v4961_v4 = vld [vmem:[#allocation3 + $0x2d8] sm:$0xf]  ;;  %v6626_v6 = vld [vmem:[#allocation3 + $0x2dc] sm:$0xf] }
 0x1aa   :  { %v6257_v49 = vld [vmem:[#allocation3 + $0xce8] sm:$0xf] }
 0x1ab   :  { %3752 = vmatpush.bf16.msra.mxu0 %v4682_v5  ;;  %3765 = vmatpush.bf16.msra.mxu1 %v4686_v30  ;;  %v3546_v8 = vpop.f32.mrf.mxu0  ;;  %v3559_v11 = vpop.f32.mrf.mxu1  ;;  %v5734_v5 = vor.u32 %v6818_v9, %v5731_v10  ;;  %v6980_v58 = vld [vmem:[#allocation3 + $0xde4] sm:$0xf0] }
 0x1ac   :  { %3778 = vmatpush.bf16.msra.mxu2 %v4690_v29  ;;  %v3969_v57 = vpack.c.bf16 %v3559_v11, %v3546_v8  ;;  %v6754_v29 = vld [vmem:[#allocation3 + $0x6dc] sm:$0xf]  ;;  %v4697_v11 = vld [vmem:[#allocation3 + $0xd0] sm:$0xf] }
 0x1ad   :  { %3791 = vmatpush.bf16.msra.mxu3 %v4694_v33  ;;  %v5470_v33 = vor.u32 %v6753_v19, %v5467_v23  ;;  %v5478_v39 = vor.u32 %v6754_v29, %v5475_v31  ;;  %v4705_v19 = vld [vmem:[#allocation3 + $0xd8] sm:$0xf]  ;;  %v7011_v29 = vld [vmem:[#allocation3 + $0xee4] sm:$0xf] }
 0x1ae   :  { %3753 = vmatmul.bf16.vlgmr.msra.gmra.mxu0 %v7312_v44  ;;  %3766 = vmatmul.bf16.vlgmr.msra.gmra.mxu1 %v7312_v44  ;;  %v4017_v28 = vunpack.c.l.bf16 %v3969_v57  ;;  %v4018_v30 = vunpack.c.h.bf16 %v3969_v57  ;;  %v6594_v57 = vld [vmem:[#allocation3 + $0x1d4] sm:$0xf0] }
 0x1af   :  { %3797 = vmatpush.bf16.msrb.mxu0 %v6490_v60  ;;  %3810 = vmatpush.bf16.msrb.mxu1 %v6494_v35  ;;  %v4124_v60 = vperm.slane %v7332_v50, 6 }
 0x1b0   :  { %3823 = vmatpush.bf16.msrb.mxu2 %v6498_v36  ;;  %3792 = vmatmul.bf16.vlgmr.msra.gmra.mxu3 %v7312_v44  ;;  %v4313_v35 = vmul.f32 %v4249_v21, %v4017_v28  ;;  %v4314_v36 = vmul.f32 %v4250_v22, %v4018_v30  ;;  %v6505_v28 = vld [vmem:[#allocation3 + $0xee0] sm:$0xf] }
 0x1b1   :  { %3836 = vmatpush.bf16.msrb.mxu3 %v6502_v40  ;;  %3779 = vmatmul.bf16.vlgmr.msra.gmra.mxu2 %v7312_v44  ;;  %v6689_v40 = vld [vmem:[#allocation3 + $0x4d4] sm:$0xf]  ;;  %v4252_v17 = vperm.slane %v4124_v60, 0  ;;  %v7043_v30 = vld [vmem:[#allocation3 + $0xfdc] sm:$0xf0] }
 0x1b2   :  { %v5214_v55 = vor.u32 %v6689_v40, %v5211_v42  ;;  %v6513_v60 = vld [vmem:[#allocation3 + $0xee8] sm:$0xf] }
 0x1b3   :  { %3798 = vmatpush.bf16.msrb.mxu0 %v6234_v46  ;;  %3811 = vmatpush.bf16.msrb.mxu1 %v6238_v12  ;;  %v6722_v46 = vld [vmem:[#allocation3 + $0x5d4] sm:$0xf0]  ;;  %v4409_v12 = vsel %vm4345_vm0, %v4313_v35, 0.0  ;;  %v3585_v0 = vpop.f32.mrf.mxu3  ;;  %v3548_v50 = vpop.f32.mrf.mxu0  ;;  %v6514_v42 = vor.u32 %v7044_v34, %v6513_v60 }
 0x1b4   :  { %3824 = vmatpush.bf16.msrb.mxu2 %v6242_v48  ;;  %v3572_v3 = vpop.f32.mrf.mxu2  ;;  %v4411_v48 = vsel %vm4345_vm0, %v4314_v36, 0.0  ;;  %v3561_v54 = vpop.f32.mrf.mxu1  ;;  %v5218_v56 = vor.u32 %v6722_v46, %v5217_v43  ;;  %v6249_v43 = vld [vmem:[#allocation3 + $0xce0] sm:$0xf]  ;;  %v6948_v50 = vld [vmem:[#allocation3 + $0xcec] sm:$0xf] }
 0x1b5   :  { %3837 = vmatpush.bf16.msrb.mxu3 %v6246_v51  ;;  %v4410_v51 = vadd.f32 %v4409_v12, %v7327_v47  ;;  %v3970_v52 = vpack.c.bf16 %v3585_v0, %v3572_v3  ;;  %v6658_v47 = vld [vmem:[#allocation3 + $0x3d4] sm:$0xf0]  ;;  %v6979_v46 = vld [vmem:[#allocation3 + $0xddc] sm:$0xf0]  ;;  %v6947_v12 = vld [vmem:[#allocation3 + $0xce4] sm:$0xf]  ;;  %v6258_v54 = vor.u32 %v6980_v58, %v6257_v49 }
 0x1b6   :  { %v4962_v16 = vor.u32 %v6658_v47, %v4961_v4  ;;  %v6251_v0 = vld [vmem:[#allocation3 + $0xde0] sm:$0xf0]  ;;  %v5737_v4 = vld [vmem:[#allocation3 + $0x8e0] sm:$0xf] }
 0x1b7   :  { %3799 = vmatpush.bf16.msrb.mxu0 %v5978_v59  ;;  %3812 = vmatpush.bf16.msrb.mxu1 %v5982_v62  ;;  %v4953_v59 = vld [vmem:[#allocation3 + $0x2d0] sm:$0xf]  ;;  %v4412_v61 = vadd.f32 %v4411_v48, %v4410_v51  ;;  %v4019_v62 = vunpack.c.l.bf16 %v3970_v52  ;;  %v6259_v51 = vld [vmem:[#allocation3 + $0xde8] sm:$0xf0]  ;;  %v6851_v47 = vld [vmem:[#allocation3 + $0x9dc] sm:$0xf0] }
 0x1b8   :  { %3825 = vmatpush.bf16.msrb.mxu2 %v5986_v63  ;;  %v4020_v63 = vunpack.c.h.bf16 %v3970_v52  ;;  %v4954_v10 = vor.u32 %v6657_v24, %v4953_v59  ;;  %v6250_v52 = vor.u32 %v6979_v46, %v6249_v43  ;;  %v6883_v59 = vld [vmem:[#allocation3 + $0xae4] sm:$0xf]  ;;  %v6262_v24 = vor.u32 %v6948_v50, %v6259_v51  ;;  %v5233_v50 = vld [vmem:[#allocation3 + $0x4e8] sm:$0xf] }
 0x1b9   :  { %3838 = vmatpush.bf16.msrb.mxu3 %v5990_v7  ;;  %v4963_v7 = vld [vmem:[#allocation3 + $0x3d8] sm:$0xf0]  ;;  %v4315_v8 = vmul.f32 %v4251_v37, %v4019_v62  ;;  %v7012_v37 = vld [vmem:[#allocation3 + $0xeec] sm:$0xf]  ;;  %v6916_v62 = vld [vmem:[#allocation3 + $0xbe4] sm:$0xf0] }
 0x1ba   :  { %v4316_v9 = vmul.f32 %v4252_v17, %v4020_v63  ;;  %v4966_v23 = vor.u32 %v6626_v6, %v4963_v7  ;;  %v6518_v48 = vor.u32 %v7012_v37, %v6515_v38  ;;  %v7350_v17 = vunpack.c.h.bf16 %v7329_v41  ;;  %v6884_v41 = vld [vmem:[#allocation3 + $0xaec] sm:$0xf]  ;;  %v5227_v58 = vld [vmem:[#allocation3 + $0x5e0] sm:$0xf0]  ;;  %v6724_v51 = vld [vmem:[#allocation3 + $0x5e4] sm:$0xf0] }
 0x1bb   :  { %3800 = vmatpush.bf16.msrb.mxu0 %v5722_v13  ;;  %3813 = vmatpush.bf16.msrb.mxu1 %v5726_v14  ;;  %v6593_v13 = vld [vmem:[#allocation3 + $0x1cc] sm:$0xf0]  ;;  %v6561_v14 = vld [vmem:[#allocation3 + $0xd4] sm:$0xf]  ;;  %v4413_v21 = vsel %vm4345_vm0, %v4315_v8, 0.0  ;;  %v3587_v31 = vpop.f32.mrf.mxu3 }
 0x1bc   :  { %3826 = vmatpush.bf16.msrb.mxu2 %v5730_v15  ;;  %v4958_v15 = vor.u32 %v6625_v27, %v4955_v2  ;;  %v4415_v22 = vsel %vm4345_vm0, %v4316_v9, 0.0  ;;  %v3574_v26 = vpop.f32.mrf.mxu2  ;;  %v4414_v45 = vadd.f32 %v4413_v21, %v4412_v61  ;;  %v4702_v36 = vor.u32 %v6561_v14, %v4699_v18  ;;  %v5995_v27 = vld [vmem:[#allocation3 + $0xbe0] sm:$0xf0]  ;;  %v6001_v61 = vld [vmem:[#allocation3 + $0xae8] sm:$0xf] }
 0x1bd   :  { %3839 = vmatpush.bf16.msrb.mxu3 %v5734_v5  ;;  %v4707_v5 = vld [vmem:[#allocation3 + $0x1d8] sm:$0xf0]  ;;  %v6003_v63 = vld [vmem:[#allocation3 + $0xbe8] sm:$0xf0]  ;;  %v4125_v2 = vperm.slane %v7350_v17, 0  ;;  %v5998_v6 = vor.u32 %v6883_v59, %v5995_v27  ;;  %v6002_v7 = vor.u32 %v6916_v62, %v6001_v61  ;;  %v4126_v8 = vperm.slane %v7350_v17, 2 }
 0x1be   :  { %v7347_v35 = vadd.f32 %v4415_v22, %v4414_v45  ;;  %v4710_v40 = vor.u32 %v6562_v25, %v4707_v5  ;;  %v6819_v9 = vld [vmem:[#allocation3 + $0x8e4] sm:$0xf]  ;;  %v6852_v14 = vld [vmem:[#allocation3 + $0x9e4] sm:$0xf0]  ;;  %v5747_v18 = vld [vmem:[#allocation3 + $0x9e8] sm:$0xf0]  ;;  %v5738_v21 = vor.u32 %v6851_v47, %v5737_v4 }
 0x1bf   :  { %3801 = vmatpush.bf16.msrb.mxu0 %v5466_v32  ;;  %3814 = vmatpush.bf16.msrb.mxu1 %v5470_v33  ;;  %v4698_v32 = vor.u32 %v6593_v13, %v4697_v11  ;;  %v6507_v33 = vld [vmem:[#allocation3 + $0xfe0] sm:$0xf0]  ;;  %v6006_v11 = vor.u32 %v6884_v41, %v6003_v63  ;;  %v5745_v13 = vld [vmem:[#allocation3 + $0x8e8] sm:$0xf]  ;;  %v6787_v25 = vld [vmem:[#allocation3 + $0x7dc] sm:$0xf0]  ;;  %v5234_v63 = vor.u32 %v6724_v51, %v5233_v50 }
 0x1c0   :  { %3827 = vmatpush.bf16.msrb.mxu2 %v5474_v20  ;;  %v4706_v20 = vor.u32 %v6594_v57, %v4705_v19  ;;  %v6510_v3 = vor.u32 %v7011_v29, %v6507_v33  ;;  %v4253_v57 = vperm.slane %v4125_v2, 0  ;;  %v4254_v26 = vperm.slane %v4126_v8, 0  ;;  %v6788_v33 = vld [vmem:[#allocation3 + $0x7e4] sm:$0xf0]  ;;  %v6659_v2 = vld [vmem:[#allocation3 + $0x3dc] sm:$0xf0] }
 0x1c1   :  { %3840 = vmatpush.bf16.msrb.mxu3 %v5478_v39  ;;  %v6506_v39 = vor.u32 %v7043_v30, %v6505_v28  ;;  %v5746_v45 = vor.u32 %v6852_v14, %v5745_v13  ;;  %v6755_v28 = vld [vmem:[#allocation3 + $0x6e4] sm:$0xf]  ;;  %v4127_v29 = vperm.slane %v7350_v17, 4  ;;  %v4979_v13 = vld [vmem:[#allocation3 + $0x3e8] sm:$0xf0] }
 0x1c2   :  { %v5483_v30 = vld [vmem:[#allocation3 + $0x7e0] sm:$0xf0]  ;;  %v6981_v50 = vld [vmem:[#allocation3 + $0xdec] sm:$0xf0]  ;;  %v6949_v51 = vld [vmem:[#allocation3 + $0xcf4] sm:$0xf] }
 0x1c3   :  { %3802 = vmatpush.bf16.msrb.mxu0 %v5210_v53  ;;  %3815 = vmatpush.bf16.msrb.mxu1 %v5214_v55  ;;  %v6254_v53 = vor.u32 %v6947_v12, %v6251_v0  ;;  %v5993_v55 = vld [vmem:[#allocation3 + $0xae0] sm:$0xf]  ;;  %v5486_v38 = vor.u32 %v6755_v28, %v5483_v30  ;;  %v4255_v46 = vperm.slane %v4127_v29, 0  ;;  %v6627_v4 = vld [vmem:[#allocation3 + $0x2e4] sm:$0xf] }
 0x1c4   :  { %3828 = vmatpush.bf16.msrb.mxu2 %v5218_v56  ;;  %v6915_v56 = vld [vmem:[#allocation3 + $0xbdc] sm:$0xf0]  ;;  %v6564_v30 = vld [vmem:[#allocation3 + $0xec] sm:$0xf] }
 0x1c5   :  { %3841 = vmatpush.bf16.msrb.mxu3 %v5222_v1  ;;  %v5994_v1 = vor.u32 %v6915_v56, %v5993_v55  ;;  %v6723_v12 = vld [vmem:[#allocation3 + $0x5dc] sm:$0xf0]  ;;  %v5235_v55 = vld [vmem:[#allocation3 + $0x5e8] sm:$0xf0] }
 0x1c6   :  { %v4723_v29 = vld [vmem:[#allocation3 + $0x1e8] sm:$0xf0] }
 0x1c7   :  { %3803 = vmatpush.bf16.msrb.mxu0 %v4954_v10  ;;  %3816 = vmatpush.bf16.msrb.mxu1 %v4958_v15  ;;  %v5739_v10 = vld [vmem:[#allocation3 + $0x9e0] sm:$0xf0] }
 0x1c8   :  { %3829 = vmatpush.bf16.msrb.mxu2 %v4962_v16  ;;  %v6820_v16 = vld [vmem:[#allocation3 + $0x8ec] sm:$0xf]  ;;  %v5742_v22 = vor.u32 %v6819_v9, %v5739_v10  ;;  %v4971_v9 = vld [vmem:[#allocation3 + $0x3e0] sm:$0xf0]  ;;  %v4977_v10 = vld [vmem:[#allocation3 + $0x2e8] sm:$0xf] }
 0x1c9   :  { %3842 = vmatpush.bf16.msrb.mxu3 %v4966_v23  ;;  %v5481_v23 = vld [vmem:[#allocation3 + $0x6e0] sm:$0xf]  ;;  %v5750_v31 = vor.u32 %v6820_v16, %v5747_v18 }
 0x1ca   :  { %v5482_v37 = vor.u32 %v6787_v25, %v5481_v23  ;;  %v4713_v18 = vld [vmem:[#allocation3 + $0xe0] sm:$0xf]  ;;  %v4715_v23 = vld [vmem:[#allocation3 + $0x1e0] sm:$0xf0]  ;;  %v4721_v25 = vld [vmem:[#allocation3 + $0xe8] sm:$0xf] }
 0x1cb   :  { %3804 = vmatpush.bf16.msrb.mxu0 %v4698_v32  ;;  %3817 = vmatpush.bf16.msrb.mxu1 %v4702_v36  ;;  %v3598_v15 = vpop.f32.mrf.mxu0  ;;  %v3611_v19 = vpop.f32.mrf.mxu1  ;;  %v5489_v32 = vld [vmem:[#allocation3 + $0x6e8] sm:$0xf]  ;;  %v6756_v36 = vld [vmem:[#allocation3 + $0x6ec] sm:$0xf] }
 0x1cc   :  { %3830 = vmatpush.bf16.msrb.mxu2 %v4706_v20  ;;  %v3971_v5 = vpack.c.bf16 %v3611_v19, %v3598_v15  ;;  %v5491_v20 = vld [vmem:[#allocation3 + $0x7e8] sm:$0xf0]  ;;  %v5490_v43 = vor.u32 %v6788_v33, %v5489_v32  ;;  %v6595_v19 = vld [vmem:[#allocation3 + $0x1dc] sm:$0xf0]  ;;  %v6521_v33 = vld [vmem:[#allocation3 + $0xef0] sm:$0xf] }
 0x1cd   :  { %3843 = vmatpush.bf16.msrb.mxu3 %v4710_v40  ;;  %v4128_v40 = vperm.slane %v7350_v17, 6  ;;  %v5494_v0 = vor.u32 %v6756_v36, %v5491_v20  ;;  %v4714_v20 = vor.u32 %v6595_v19, %v4713_v18  ;;  %v5761_v19 = vld [vmem:[#allocation3 + $0x8f8] sm:$0xf] }
 0x1ce   :  { %3805 = vmatmul.bf16.vlgmr.msrb.gmra.mxu0 %v7312_v44  ;;  %3818 = vmatmul.bf16.vlgmr.msrb.gmra.mxu1 %v7312_v44  ;;  %v4021_v60 = vunpack.c.l.bf16 %v3971_v5  ;;  %v4022_v34 = vunpack.c.h.bf16 %v3971_v5  ;;  %v6596_v5 = vld [vmem:[#allocation3 + $0x1e4] sm:$0xf0] }
 0x1cf   :  { %3849 = vmatpush.bf16.msra.mxu0 %v6506_v39  ;;  %3862 = vmatpush.bf16.msra.mxu1 %v6510_v3  ;;  %v5225_v39 = vld [vmem:[#allocation3 + $0x4e0] sm:$0xf]  ;;  %v4256_v27 = vperm.slane %v4128_v40, 0  ;;  %v7046_v40 = vld [vmem:[#allocation3 + $0xff4] sm:$0xf0] }
 0x1d0   :  { %3875 = vmatpush.bf16.msra.mxu2 %v6514_v42  ;;  %3844 = vmatmul.bf16.vlgmr.msrb.gmra.mxu3 %v7312_v44  ;;  %v4317_v3 = vmul.f32 %v4253_v57, %v4021_v60  ;;  %v4318_v42 = vmul.f32 %v4254_v26, %v4022_v34  ;;  %v5226_v61 = vor.u32 %v6723_v12, %v5225_v39  ;;  %v6563_v57 = vld [vmem:[#allocation3 + $0xe4] sm:$0xf]  ;;  %v7045_v60 = vld [vmem:[#allocation3 + $0xfec] sm:$0xf0]  ;;  %v7013_v34 = vld [vmem:[#allocation3 + $0xef4] sm:$0xf] }
 0x1d1   :  { %3888 = vmatpush.bf16.msra.mxu3 %v6518_v48  ;;  %3831 = vmatmul.bf16.vlgmr.msrb.gmra.mxu2 %v7312_v44  ;;  %v6691_v48 = vld [vmem:[#allocation3 + $0x4e4] sm:$0xf]  ;;  %v4726_v12 = vor.u32 %v6564_v30, %v4723_v29  ;;  %v5497_v30 = vld [vmem:[#allocation3 + $0x6f0] sm:$0xf] }
 0x1d2   :  { %v5230_v41 = vor.u32 %v6691_v48, %v5227_v58  ;;  %v6522_v48 = vor.u32 %v7045_v60, %v6521_v33  ;;  %v6789_v29 = vld [vmem:[#allocation3 + $0x7ec] sm:$0xf0] }
 0x1d3   :  { %3850 = vmatpush.bf16.msra.mxu0 %v6250_v52  ;;  %3863 = vmatpush.bf16.msra.mxu1 %v6254_v53  ;;  %v4417_v52 = vsel %vm4345_vm0, %v4317_v3, 0.0  ;;  %v4419_v53 = vsel %vm4345_vm0, %v4318_v42, 0.0  ;;  %v3637_v17 = vpop.f32.mrf.mxu3  ;;  %v3600_v56 = vpop.f32.mrf.mxu0  ;;  %v4718_v3 = vor.u32 %v6563_v57, %v4715_v23  ;;  %v4722_v42 = vor.u32 %v6596_v5, %v4721_v25  ;;  %v6854_v57 = vld [vmem:[#allocation3 + $0x9f4] sm:$0xf0]  ;;  %v6822_v23 = vld [vmem:[#allocation3 + $0x8fc] sm:$0xf] }
 0x1d4   :  { %3876 = vmatpush.bf16.msra.mxu2 %v6258_v54  ;;  %v3624_v49 = vpop.f32.mrf.mxu2  ;;  %v6692_v54 = vld [vmem:[#allocation3 + $0x4ec] sm:$0xf]  ;;  %v4418_v59 = vadd.f32 %v4417_v52, %v7347_v35  ;;  %v3613_v62 = vpop.f32.mrf.mxu1  ;;  %v6660_v35 = vld [vmem:[#allocation3 + $0x3e4] sm:$0xf0]  ;;  %v6267_v52 = vld [vmem:[#allocation3 + $0xdf0] sm:$0xf0] }
 0x1d5   :  { %3889 = vmatpush.bf16.msra.mxu3 %v6262_v24  ;;  %v3972_v24 = vpack.c.bf16 %v3637_v17, %v3624_v49  ;;  %v5238_v8 = vor.u32 %v6692_v54, %v5235_v55  ;;  %v6273_v17 = vld [vmem:[#allocation3 + $0xcf8] sm:$0xf]  ;;  %v7367_v55 = vld [vmem:[#allocation5 + $0x28] sm:$0xff]  ;;  %v6950_v56 = vld [vmem:[#allocation3 + $0xcfc] sm:$0xf] }
 0x1d6   :  { %v4420_v47 = vadd.f32 %v4419_v53, %v4418_v59  ;;  %v6982_v54 = vld [vmem:[#allocation3 + $0xdf4] sm:$0xf0]  ;;  %v6275_v59 = vld [vmem:[#allocation3 + $0xdf8] sm:$0xf0]  ;;  %v6009_v62 = vld [vmem:[#allocation3 + $0xaf0] sm:$0xf] }
 0x1d7   :  { %3851 = vmatpush.bf16.msra.mxu0 %v5994_v1  ;;  %3864 = vmatpush.bf16.msra.mxu1 %v5998_v6  ;;  %v4969_v1 = vld [vmem:[#allocation3 + $0x2e0] sm:$0xf]  ;;  %v4023_v6 = vunpack.c.l.bf16 %v3972_v24  ;;  %v5763_v25 = vld [vmem:[#allocation3 + $0x9f8] sm:$0xf0] }
 0x1d8   :  { %3877 = vmatpush.bf16.msra.mxu2 %v6002_v7  ;;  %v4024_v7 = vunpack.c.h.bf16 %v3972_v24  ;;  %v4970_v16 = vor.u32 %v6659_v2, %v4969_v1  ;;  %v7370_v1 = vunpack.c.l.bf16 %v7367_v55  ;;  %v6278_v2 = vor.u32 %v6950_v56, %v6275_v59  ;;  %v5243_v56 = vld [vmem:[#allocation3 + $0x5f0] sm:$0xf0]  ;;  %v5249_v59 = vld [vmem:[#allocation3 + $0x4f8] sm:$0xf] }
 0x1d9   :  { %3890 = vmatpush.bf16.msra.mxu3 %v6006_v11  ;;  %v6628_v11 = vld [vmem:[#allocation3 + $0x2ec] sm:$0xf]  ;;  %v4319_v14 = vmul.f32 %v4255_v46, %v4023_v6  ;;  %v6531_v46 = vld [vmem:[#allocation3 + $0xff8] sm:$0xf0]  ;;  %v6918_v6 = vld [vmem:[#allocation3 + $0xbf4] sm:$0xf0] }
 0x1da   :  { %v4320_v15 = vmul.f32 %v4256_v27, %v4024_v7  ;;  %v4982_v28 = vor.u32 %v6628_v11, %v4979_v13  ;;  %v6270_v27 = vor.u32 %v6949_v51, %v6267_v52  ;;  %v6886_v7 = vld [vmem:[#allocation3 + $0xafc] sm:$0xf]  ;;  %v6853_v11 = vld [vmem:[#allocation3 + $0x9ec] sm:$0xf0]  ;;  %v6821_v13 = vld [vmem:[#allocation3 + $0x8f4] sm:$0xf] }
 0x1db   :  { %3852 = vmatpush.bf16.msra.mxu0 %v5738_v21  ;;  %3865 = vmatpush.bf16.msra.mxu1 %v5742_v22  ;;  %v4974_v21 = vor.u32 %v6627_v4, %v4971_v9  ;;  %v4978_v22 = vor.u32 %v6660_v35, %v4977_v10  ;;  %v4421_v26 = vsel %vm4345_vm0, %v4319_v14, 0.0  ;;  %v3639_v36 = vpop.f32.mrf.mxu3  ;;  %v6011_v4 = vld [vmem:[#allocation3 + $0xbf0] sm:$0xf0]  ;;  %v5753_v9 = vld [vmem:[#allocation3 + $0x8f0] sm:$0xf]  ;;  %v4130_v18 = vperm.slane %v7370_v1, 2 }
 0x1dc   :  { %3878 = vmatpush.bf16.msra.mxu2 %v5746_v45  ;;  %v4423_v45 = vsel %vm4345_vm0, %v4320_v15, 0.0  ;;  %v4422_v32 = vadd.f32 %v4421_v26, %v4420_v47  ;;  %v6017_v47 = vld [vmem:[#allocation3 + $0xaf8] sm:$0xf]  ;;  %v7378_v10 = vld [vmem:[%s7421_s0] sm:$0x1]  ;;  %v5754_v26 = vor.u32 %v6853_v11, %v5753_v9  ;;  %v4131_v36 = vperm.slane %v7370_v1, 4 }
 0x1dd   :  { %3891 = vmatpush.bf16.msra.mxu3 %v5750_v31  ;;  %v3626_v31 = vpop.f32.mrf.mxu2  ;;  %v5755_v14 = vld [vmem:[#allocation3 + $0x9f0] sm:$0xf0]  ;;  %v4258_v60 = vperm.slane %v4130_v18, 0  ;;  %v6725_v52 = vld [vmem:[#allocation3 + $0x5ec] sm:$0xf0] }
 0x1de   :  { %v7365_v39 = vadd.f32 %v4423_v45, %v4422_v32  ;;  %v5758_v45 = vor.u32 %v6821_v13, %v5755_v14  ;;  %v6757_v31 = vld [vmem:[#allocation3 + $0x6f4] sm:$0xf]  ;;  %v4259_v51 = vperm.slane %v4131_v36, 0  ;;  %v6661_v11 = vld [vmem:[#allocation3 + $0x3ec] sm:$0xf0] }
 0x1df   :  { %3853 = vmatpush.bf16.msra.mxu0 %v5482_v37  ;;  %3866 = vmatpush.bf16.msra.mxu1 %v5486_v38  ;;  %v6523_v37 = vld [vmem:[#allocation3 + $0xff0] sm:$0xf0]  ;;  %v6529_v38 = vld [vmem:[#allocation3 + $0xef8] sm:$0xf] }
 0x1e0   :  { %3879 = vmatpush.bf16.msra.mxu2 %v5490_v43  ;;  %v7014_v43 = vld [vmem:[#allocation3 + $0xefc] sm:$0xf]  ;;  %v6526_v49 = vor.u32 %v7013_v34, %v6523_v37  ;;  %v6530_v58 = vor.u32 %v7046_v40, %v6529_v38  ;;  %v5499_v34 = vld [vmem:[#allocation3 + $0x7f0] sm:$0xf0]  ;;  %v5505_v37 = vld [vmem:[#allocation3 + $0x6f8] sm:$0xf] }
 0x1e1   :  { %3892 = vmatpush.bf16.msra.mxu3 %v5494_v0  ;;  %v6265_v0 = vld [vmem:[#allocation3 + $0xcf0] sm:$0xf]  ;;  %v6534_v53 = vor.u32 %v7014_v43, %v6531_v46  ;;  %v6790_v38 = vld [vmem:[#allocation3 + $0x7f4] sm:$0xf0]  ;;  %v5507_v43 = vld [vmem:[#allocation3 + $0x7f8] sm:$0xf0]  ;;  %v5498_v46 = vor.u32 %v6789_v29, %v5497_v30 }
 0x1e2   :  { %v6266_v24 = vor.u32 %v6981_v50, %v6265_v0  ;;  %v5241_v0 = vld [vmem:[#allocation3 + $0x4f0] sm:$0xf]  ;;  %v5506_v50 = vor.u32 %v6790_v38, %v5505_v37  ;;  %v6629_v13 = vld [vmem:[#allocation3 + $0x2f4] sm:$0xf]  ;;  %v6566_v37 = vld [vmem:[#allocation3 + $0xfc] sm:$0xf] }
 0x1e3   :  { %3854 = vmatpush.bf16.msra.mxu0 %v5226_v61  ;;  %3867 = vmatpush.bf16.msra.mxu1 %v5230_v41  ;;  %v6274_v61 = vor.u32 %v6982_v54, %v6273_v17  ;;  %v6917_v41 = vld [vmem:[#allocation3 + $0xbec] sm:$0xf0]  ;;  %v4987_v18 = vld [vmem:[#allocation3 + $0x3f0] sm:$0xf0]  ;;  %v4739_v38 = vld [vmem:[#allocation3 + $0x1f8] sm:$0xf0] }
 0x1e4   :  { %3880 = vmatpush.bf16.msra.mxu2 %v5234_v63  ;;  %v6885_v63 = vld [vmem:[#allocation3 + $0xaf4] sm:$0xf]  ;;  %v6010_v35 = vor.u32 %v6917_v41, %v6009_v62  ;;  %v6694_v41 = vld [vmem:[#allocation3 + $0x4fc] sm:$0xf] }
 0x1e5   :  { %3893 = vmatpush.bf16.msra.mxu3 %v5238_v8  ;;  %v6019_v8 = vld [vmem:[#allocation3 + $0xbf8] sm:$0xf0]  ;;  %v6014_v15 = vor.u32 %v6885_v63, %v6011_v4  ;;  %v6565_v30 = vld [vmem:[#allocation3 + $0xf4] sm:$0xf] }
 0x1e6   :  { %v5251_v63 = vld [vmem:[#allocation3 + $0x5f8] sm:$0xf0]  ;;  %v4731_v29 = vld [vmem:[#allocation3 + $0x1f0] sm:$0xf0] }
 0x1e7   :  { %3855 = vmatpush.bf16.msra.mxu0 %v4970_v16  ;;  %3868 = vmatpush.bf16.msra.mxu1 %v4974_v21  ;;  %v6018_v16 = vor.u32 %v6918_v6, %v6017_v47  ;;  %v6022_v21 = vor.u32 %v6886_v7, %v6019_v8  ;;  %v5242_v6 = vor.u32 %v6725_v52, %v5241_v0 }
 0x1e8   :  { %3881 = vmatpush.bf16.msra.mxu2 %v4978_v22 }
 0x1e9   :  { %3894 = vmatpush.bf16.msra.mxu3 %v4982_v28  ;;  %v5762_v28 = vor.u32 %v6854_v57, %v5761_v19  ;;  %v4993_v19 = vld [vmem:[#allocation3 + $0x2f8] sm:$0xf]  ;;  %v6630_v57 = vld [vmem:[#allocation3 + $0x2fc] sm:$0xf] }
 0x1eb   :  { %3856 = vmatpush.bf16.msra.mxu0 %v4714_v20  ;;  %3869 = vmatpush.bf16.msra.mxu1 %v4718_v3  ;;  %v3650_v22 = vpop.f32.mrf.mxu0  ;;  %v3663_v5 = vpop.f32.mrf.mxu1  ;;  %v5766_v20 = vor.u32 %v6822_v23, %v5763_v25 }
 0x1ec   :  { %3882 = vmatpush.bf16.msra.mxu2 %v4722_v42  ;;  %v3973_v32 = vpack.c.bf16 %v3663_v5, %v3650_v22  ;;  %v6758_v42 = vld [vmem:[#allocation3 + $0x6fc] sm:$0xf]  ;;  %v4729_v5 = vld [vmem:[#allocation3 + $0xf0] sm:$0xf] }
 0x1ed   :  { %3895 = vmatpush.bf16.msra.mxu3 %v4726_v12  ;;  %v5502_v12 = vor.u32 %v6757_v31, %v5499_v34  ;;  %v5510_v17 = vor.u32 %v6758_v42, %v5507_v43  ;;  %v6598_v34 = vld [vmem:[#allocation3 + $0x1f4] sm:$0xf0]  ;;  %v4734_v43 = vor.u32 %v6565_v30, %v4731_v29 }
 0x1ee   :  { %3857 = vmatmul.bf16.vlgmr.msra.gmra.mxu0 %v7312_v44  ;;  %3870 = vmatmul.bf16.vlgmr.msra.gmra.mxu1 %v7312_v44  ;;  %v4025_v40 = vunpack.c.l.bf16 %v3973_v32  ;;  %v4026_v3 = vunpack.c.h.bf16 %v3973_v32 }
 0x1ef   :  { %3901 = vmatpush.bf16.msrb.mxu0 %v6522_v48  ;;  %3914 = vmatpush.bf16.msrb.mxu1 %v6526_v49  ;;  %v4132_v48 = vperm.slane %v7370_v1, 6 }
 0x1f0   :  { %3927 = vmatpush.bf16.msrb.mxu2 %v6530_v58  ;;  %3896 = vmatmul.bf16.vlgmr.msra.gmra.mxu3 %v7378_v10  ;;  %v4322_v58 = vmul.f32 %v4258_v60, %v4026_v3  ;;  %v4737_v60 = vld [vmem:[#allocation3 + $0xf8] sm:$0xf] }
 0x1f1   :  { %3940 = vmatpush.bf16.msrb.mxu3 %v6534_v53  ;;  %3883 = vmatmul.bf16.vlgmr.msra.gmra.mxu2 %v7312_v44  ;;  %v4129_v44 = vperm.slane %v7370_v1, 0  ;;  %v6693_v53 = vld [vmem:[#allocation3 + $0x4f4] sm:$0xf]  ;;  %v4260_v47 = vperm.slane %v4132_v48, 0  ;;  %v4068_v48 = vunpack.c.h.bf16 %v7367_v55 }
 0x1f2   :  { %v5246_v8 = vor.u32 %v6693_v53, %v5243_v56 }
 0x1f3   :  { %3902 = vmatpush.bf16.msrb.mxu0 %v6266_v24  ;;  %3915 = vmatpush.bf16.msrb.mxu1 %v6270_v27  ;;  %v4257_v33 = vperm.slane %v4129_v44, 0  ;;  %v6726_v24 = vld [vmem:[#allocation3 + $0x5f4] sm:$0xf0]  ;;  %v3689_v62 = vpop.f32.mrf.mxu3  ;;  %v3652_v1 = vpop.f32.mrf.mxu0  ;;  %v5254_v44 = vor.u32 %v6694_v41, %v5251_v63  ;;  %v4133_v0 = vperm.slane %v4068_v48, 0  ;;  %v4135_v56 = vperm.slane %v4068_v48, 4 }
 0x1f4   :  { %3928 = vmatpush.bf16.msrb.mxu2 %v6274_v61  ;;  %v3676_v54 = vpop.f32.mrf.mxu2  ;;  %v4427_v61 = vsel %vm4345_vm0, %v4322_v58, 0.0  ;;  %v3665_v7 = vpop.f32.mrf.mxu1  ;;  %v5250_v9 = vor.u32 %v6726_v24, %v5249_v59  ;;  %v4136_v59 = vperm.slane %v4068_v48, 6 }
 0x1f5   :  { %3941 = vmatpush.bf16.msrb.mxu3 %v6278_v2  ;;  %v4321_v49 = vmul.f32 %v4257_v33, %v4025_v40  ;;  %v3974_v4 = vpack.c.bf16 %v3689_v62, %v3676_v54  ;;  %v4261_v52 = vperm.slane %v4133_v0, 0 }
 0x1f7   :  { %3903 = vmatpush.bf16.msrb.mxu0 %v6010_v35  ;;  %3916 = vmatpush.bf16.msrb.mxu1 %v6014_v15  ;;  %v4425_v27 = vsel %vm4345_vm0, %v4321_v49, 0.0  ;;  %v4985_v35 = vld [vmem:[#allocation3 + $0x2f0] sm:$0xf]  ;;  %v4027_v15 = vunpack.c.l.bf16 %v3974_v4  ;;  %v4134_v49 = vperm.slane %v4068_v48, 2 }
 0x1f8   :  { %3929 = vmatpush.bf16.msrb.mxu2 %v6018_v16  ;;  %v4426_v2 = vadd.f32 %v4425_v27, %v7365_v39  ;;  %v4028_v16 = vunpack.c.h.bf16 %v3974_v4  ;;  %v6662_v39 = vld [vmem:[#allocation3 + $0x3f4] sm:$0xf0]  ;;  %v4986_v25 = vor.u32 %v6661_v11, %v4985_v35  ;;  %v4264_v4 = vperm.slane %v4136_v59, 0 }
 0x1f9   :  { %3942 = vmatpush.bf16.msrb.mxu3 %v6022_v21  ;;  %v4995_v21 = vld [vmem:[#allocation3 + $0x3f8] sm:$0xf0]  ;;  %v4323_v22 = vmul.f32 %v4259_v51, %v4027_v15  ;;  %v4262_v53 = vperm.slane %v4134_v49, 0 }
 0x1fa   :  { %v4428_v14 = vadd.f32 %v4427_v61, %v4426_v2  ;;  %v4324_v23 = vmul.f32 %v4260_v47, %v4028_v16  ;;  %v4998_v33 = vor.u32 %v6630_v57, %v4995_v21  ;;  %v4263_v2 = vperm.slane %v4135_v56, 0 }
 0x1fb   :  { %3904 = vmatpush.bf16.msrb.mxu0 %v5754_v26  ;;  %3917 = vmatpush.bf16.msrb.mxu1 %v5758_v45  ;;  %v4990_v26 = vor.u32 %v6629_v13, %v4987_v18  ;;  %v4994_v45 = vor.u32 %v6662_v39, %v4993_v19  ;;  %v4429_v31 = vsel %vm4345_vm0, %v4323_v22, 0.0  ;;  %v3691_v40 = vpop.f32.mrf.mxu3  ;;  %v4055_v18 = vld [vmem:[#allocation5 + $0x30] sm:$0xff] }
 0x1fc   :  { %3930 = vmatpush.bf16.msrb.mxu2 %v5762_v28  ;;  %v6597_v28 = vld [vmem:[#allocation3 + $0x1ec] sm:$0xf0]  ;;  %v4431_v32 = vsel %vm4345_vm0, %v4324_v23, 0.0  ;;  %v3678_v36 = vpop.f32.mrf.mxu2  ;;  %v4069_v19 = vunpack.c.l.bf16 %v4055_v18 }
 0x1fd   :  { %3943 = vmatpush.bf16.msrb.mxu3 %v5766_v20  ;;  %v4430_v20 = vadd.f32 %v4429_v31, %v4428_v14  ;;  %v4730_v3 = vor.u32 %v6597_v28, %v4729_v5 }
 0x1fe   :  { %v4137_v39 = vperm.slane %v4069_v19, 0  ;;  %v4138_v57 = vperm.slane %v4069_v19, 2  ;;  %v4139_v28 = vperm.slane %v4069_v19, 4  ;;  %v4140_v30 = vperm.slane %v4069_v19, 6 }
 0x1ff   :  { %3905 = vmatpush.bf16.msrb.mxu0 %v5498_v46  ;;  %3918 = vmatpush.bf16.msrb.mxu1 %v5502_v12  ;;  %v4432_v42 = vadd.f32 %v4431_v32, %v4430_v20  ;;  %v4738_v46 = vor.u32 %v6598_v34, %v4737_v60  ;;  %v4742_v12 = vor.u32 %v6566_v37, %v4739_v38 }
 0x200   :  { %3931 = vmatpush.bf16.msrb.mxu2 %v5506_v50  ;;  %v4266_v5 = vperm.slane %v4138_v57, 0  ;;  %v4267_v38 = vperm.slane %v4139_v28, 0  ;;  %v4268_v40 = vperm.slane %v4140_v30, 0 }
 0x201   :  { %3944 = vmatpush.bf16.msrb.mxu3 %v5510_v17 }
 0x203   :  { %3906 = vmatpush.bf16.msrb.mxu0 %v5242_v6  ;;  %3919 = vmatpush.bf16.msrb.mxu1 %v5246_v8 }
 0x204   :  { %3932 = vmatpush.bf16.msrb.mxu2 %v5250_v9 }
 0x205   :  { %3945 = vmatpush.bf16.msrb.mxu3 %v5254_v44 }
 0x207   :  { %3907 = vmatpush.bf16.msrb.mxu0 %v4986_v25  ;;  %3920 = vmatpush.bf16.msrb.mxu1 %v4990_v26  ;;  %v4265_v25 = vperm.slane %v4137_v39, 0 }
 0x208   :  { %3933 = vmatpush.bf16.msrb.mxu2 %v4994_v45 }
 0x209   :  { %3946 = vmatpush.bf16.msrb.mxu3 %v4998_v33 }
 0x20b   :  { %3908 = vmatpush.bf16.msrb.mxu0 %v4730_v3  ;;  %3921 = vmatpush.bf16.msrb.mxu1 %v4734_v43  ;;  %v3702_v58 = vpop.f32.mrf.mxu0  ;;  %v3715_v50 = vpop.f32.mrf.mxu1 }
 0x20c   :  { %3934 = vmatpush.bf16.msrb.mxu2 %v4738_v46  ;;  %v3975_v51 = vpack.c.bf16 %v3715_v50, %v3702_v58 }
 0x20d   :  { %3947 = vmatpush.bf16.msrb.mxu3 %v4742_v12 }
 0x20e   :  { %3909 = vmatmul.bf16.vlgmr.msrb.gmra.mxu0 %v7378_v10  ;;  %3922 = vmatmul.bf16.vlgmr.msrb.gmra.mxu1 %v7378_v10  ;;  %v4029_v17 = vunpack.c.l.bf16 %v3975_v51  ;;  %v4030_v54 = vunpack.c.h.bf16 %v3975_v51 }
 0x20f   :  { %3935 = vmatmul.bf16.vlgmr.msrb.gmra.mxu2 %v7378_v10 }
 0x210   :  { %3948 = vmatmul.bf16.vlgmr.msrb.gmra.mxu3 %v7378_v10  ;;  %v4325_v24 = vmul.f32 %v4261_v52, %v4029_v17  ;;  %v4326_v27 = vmul.f32 %v4262_v53, %v4030_v54 }
 0x212   :  { %v4433_v61 = vsel %vm4345_vm0, %v4325_v24, 0.0  ;;  %v4435_v62 = vsel %vm4345_vm0, %v4326_v27, 0.0 }
 0x213   :  { %v3741_v41 = vpop.f32.mrf.mxu3  ;;  %v3704_v10 = vpop.f32.mrf.mxu0  ;;  %v4434_v63 = vadd.f32 %v4433_v61, %v4432_v42  ;;  %v4070_v61 = vunpack.c.h.bf16 %v4055_v18 }
 0x214   :  { %v3728_v55 = vpop.f32.mrf.mxu2  ;;  %v3717_v47 = vpop.f32.mrf.mxu1 }
 0x215   :  { %v3976_v1 = vpack.c.bf16 %v3741_v41, %v3728_v55  ;;  %v4436_v6 = vadd.f32 %v4435_v62, %v4434_v63  ;;  %v4141_v41 = vperm.slane %v4070_v61, 0  ;;  %v4056_v47 = vld [vmem:[#allocation5 + $0x38] sm:$0xff]  ;;  %v4144_v18 = vperm.slane %v4070_v61, 6 }
 0x217   :  { %v4031_v7 = vunpack.c.l.bf16 %v3976_v1  ;;  %v4032_v8 = vunpack.c.h.bf16 %v3976_v1 }
 0x219   :  { %v4327_v9 = vmul.f32 %v4263_v2, %v4031_v7  ;;  %v4328_v35 = vmul.f32 %v4264_v4, %v4032_v8  ;;  %v4142_v2 = vperm.slane %v4070_v61, 2  ;;  %v4269_v4 = vperm.slane %v4141_v41, 0 }
 0x21a   :  { %v4143_v7 = vperm.slane %v4070_v61, 4 }
 0x21b   :  { %v4437_v11 = vsel %vm4345_vm0, %v4327_v9, 0.0  ;;  %v4439_v13 = vsel %vm4345_vm0, %v4328_v35, 0.0  ;;  %v3743_v16 = vpop.f32.mrf.mxu3  ;;  %v4270_v35 = vperm.slane %v4142_v2, 0 }
 0x21c   :  { %v3730_v14 = vpop.f32.mrf.mxu2  ;;  %v4438_v15 = vadd.f32 %v4437_v11, %v4436_v6  ;;  %v4271_v19 = vperm.slane %v4143_v7, 0 }
 0x21e   :  { %v4440_v44 = vadd.f32 %v4439_v13, %v4438_v15  ;;  %v4071_v13 = vunpack.c.l.bf16 %v4056_v47 }
 0x22b   :  { %v3754_v21 = vpop.f32.mrf.mxu0  ;;  %v3767_v22 = vpop.f32.mrf.mxu1 }
 0x22c   :  { %v3977_v23 = vpack.c.bf16 %v3767_v22, %v3754_v21  ;;  %v4145_v22 = vperm.slane %v4071_v13, 0 }
 0x22e   :  { %v4033_v26 = vunpack.c.l.bf16 %v3977_v23  ;;  %v4034_v45 = vunpack.c.h.bf16 %v3977_v23 }
 0x230   :  { %v4329_v29 = vmul.f32 %v4265_v25, %v4033_v26  ;;  %v4330_v31 = vmul.f32 %v4266_v5, %v4034_v45  ;;  %v4272_v25 = vperm.slane %v4144_v18, 0 }
 0x232   :  { %v4441_v33 = vsel %vm4345_vm0, %v4329_v29, 0.0  ;;  %v4443_v60 = vsel %vm4345_vm0, %v4330_v31, 0.0  ;;  %v4146_v29 = vperm.slane %v4071_v13, 2  ;;  %v4273_v31 = vperm.slane %v4145_v22, 0 }
 0x233   :  { %v3793_v34 = vpop.f32.mrf.mxu3  ;;  %v3756_v36 = vpop.f32.mrf.mxu0  ;;  %v4442_v20 = vadd.f32 %v4441_v33, %v4440_v44 }
 0x234   :  { %v3780_v32 = vpop.f32.mrf.mxu2  ;;  %v3769_v3 = vpop.f32.mrf.mxu1  ;;  %v4147_v36 = vperm.slane %v4071_v13, 4 }
 0x235   :  { %v3978_v37 = vpack.c.bf16 %v3793_v34, %v3780_v32  ;;  %v4444_v42 = vadd.f32 %v4443_v60, %v4442_v20 }
 0x237   :  { %v4035_v43 = vunpack.c.l.bf16 %v3978_v37  ;;  %v4036_v46 = vunpack.c.h.bf16 %v3978_v37 }
 0x239   :  { %v4331_v12 = vmul.f32 %v4267_v38, %v4035_v43  ;;  %v4332_v48 = vmul.f32 %v4268_v40, %v4036_v46  ;;  %v4274_v38 = vperm.slane %v4146_v29, 0  ;;  %v4148_v46 = vperm.slane %v4071_v13, 6 }
 0x23b   :  { %v4445_v0 = vsel %vm4345_vm0, %v4331_v12, 0.0  ;;  %v4447_v49 = vsel %vm4345_vm0, %v4332_v48, 0.0  ;;  %v3795_v51 = vpop.f32.mrf.mxu3  ;;  %v4275_v12 = vperm.slane %v4147_v36, 0  ;;  %v4072_v48 = vunpack.c.h.bf16 %v4056_v47 }
 0x23c   :  { %v3782_v58 = vpop.f32.mrf.mxu2  ;;  %v4446_v50 = vadd.f32 %v4445_v0, %v4444_v42  ;;  %v4276_v51 = vperm.slane %v4148_v46, 0 }
 0x23d   :  { %v4151_v47 = vperm.slane %v4072_v48, 4 }
 0x23e   :  { %v4448_v52 = vadd.f32 %v4447_v49, %v4446_v50 }
 0x24b   :  { %v3806_v53 = vpop.f32.mrf.mxu0  ;;  %v3819_v17 = vpop.f32.mrf.mxu1 }
 0x24c   :  { %v3979_v62 = vpack.c.bf16 %v3819_v17, %v3806_v53  ;;  %v4149_v17 = vperm.slane %v4072_v48, 0 }
 0x24e   :  { %v4037_v1 = vunpack.c.l.bf16 %v3979_v62  ;;  %v4038_v9 = vunpack.c.h.bf16 %v3979_v62  ;;  %v4277_v41 = vperm.slane %v4149_v17, 0 }
 0x250   :  { %v4333_v11 = vmul.f32 %v4269_v4, %v4037_v1  ;;  %v4334_v39 = vmul.f32 %v4270_v35, %v4038_v9 }
 0x252   :  { %v4449_v57 = vsel %vm4345_vm0, %v4333_v11, 0.0  ;;  %v4451_v28 = vsel %vm4345_vm0, %v4334_v39, 0.0 }
 0x253   :  { %v3845_v56 = vpop.f32.mrf.mxu3  ;;  %v3808_v59 = vpop.f32.mrf.mxu0  ;;  %v4450_v26 = vadd.f32 %v4449_v57, %v4448_v52 }
 0x254   :  { %v3832_v54 = vpop.f32.mrf.mxu2  ;;  %v3821_v24 = vpop.f32.mrf.mxu1 }
 0x255   :  { %v3980_v6 = vpack.c.bf16 %v3845_v56, %v3832_v54  ;;  %v4452_v20 = vadd.f32 %v4451_v28, %v4450_v26  ;;  %v4150_v56 = vperm.slane %v4072_v48, 2 }
 0x257   :  { %v4039_v44 = vunpack.c.l.bf16 %v3980_v6  ;;  %v4040_v23 = vunpack.c.h.bf16 %v3980_v6  ;;  %v4152_v6 = vperm.slane %v4072_v48, 6 }
 0x259   :  { %v4335_v5 = vmul.f32 %v4271_v19, %v4039_v44  ;;  %v4336_v33 = vmul.f32 %v4272_v25, %v4040_v23  ;;  %v4280_v18 = vperm.slane %v4152_v6, 0 }
 0x25b   :  { %v3847_v55 = vpop.f32.mrf.mxu3  ;;  %v4453_v60 = vsel %vm4345_vm0, %v4335_v5, 0.0  ;;  %v4455_v42 = vsel %vm4345_vm0, %v4336_v33, 0.0 }
 0x25c   :  { %v3834_v27 = vpop.f32.mrf.mxu2  ;;  %v4454_v3 = vadd.f32 %v4453_v60, %v4452_v20 }
 0x25e   :  { %v4456_v58 = vadd.f32 %v4455_v42, %v4454_v3 }
 0x26b   :  { %v3858_v10 = vpop.f32.mrf.mxu0  ;;  %v3871_v63 = vpop.f32.mrf.mxu1 }
 0x26c   :  { %v3981_v21 = vpack.c.bf16 %v3871_v63, %v3858_v10  ;;  %v4278_v10 = vperm.slane %v4150_v56, 0 }
 0x26e   :  { %v4041_v30 = vunpack.c.l.bf16 %v3981_v21  ;;  %v4042_v37 = vunpack.c.h.bf16 %v3981_v21 }
 0x270   :  { %v4337_v40 = vmul.f32 %v4273_v31, %v4041_v30  ;;  %v4338_v0 = vmul.f32 %v4274_v38, %v4042_v37  ;;  %v4476_v31 = vstv %s7424_s3 }
 0x272   :  { %v4457_v49 = vsel %vm4345_vm0, %v4337_v40, 0.0  ;;  %v4459_v54 = vsel %vm4345_vm0, %v4338_v0, 0.0 }
 0x273   :  { %v3897_v14 = vpop.f32.mrf.mxu3  ;;  %v3860_v15 = vpop.f32.mrf.mxu0  ;;  %v4458_v53 = vadd.f32 %v4457_v49, %v4456_v58 }
 0x274   :  { %v3884_v8 = vpop.f32.mrf.mxu2  ;;  %v3873_v16 = vpop.f32.mrf.mxu1 }
 0x275   :  { %v3982_v34 = vpack.c.bf16 %v3897_v14, %v3884_v8  ;;  %v4460_v61 = vadd.f32 %v4459_v54, %v4458_v53  ;;  %v4279_v16 = vperm.slane %v4151_v47, 0 }
 0x277   :  { %v4043_v43 = vunpack.c.l.bf16 %v3982_v34  ;;  %v4044_v50 = vunpack.c.h.bf16 %v3982_v34 }
 0x279   :  { %v4339_v52 = vmul.f32 %v4275_v12, %v4043_v43  ;;  %v4340_v24 = vmul.f32 %v4276_v51, %v4044_v50 }
 0x27b   :  { %v3899_v32 = vpop.f32.mrf.mxu3  ;;  %v4461_v27 = vsel %vm4345_vm0, %v4339_v52, 0.0  ;;  %v4463_v4 = vsel %vm4345_vm0, %v4340_v24, 0.0 }
 0x27c   :  { %v3886_v45 = vpop.f32.mrf.mxu2  ;;  %v4462_v63 = vadd.f32 %v4461_v27, %v4460_v61 }
 0x27e   :  { %v4464_v35 = vadd.f32 %v4463_v4, %v4462_v63 }
 0x28b   :  { %v3910_v59 = vpop.f32.mrf.mxu0  ;;  %v3923_v55 = vpop.f32.mrf.mxu1 }
 0x28c   :  { %v3983_v62 = vpack.c.bf16 %v3923_v55, %v3910_v59 }
 0x28e   :  { %v4045_v1 = vunpack.c.l.bf16 %v3983_v62  ;;  %v4046_v2 = vunpack.c.h.bf16 %v3983_v62 }
 0x290   :  { %v4341_v7 = vmul.f32 %v4277_v41, %v4045_v1  ;;  %v4342_v8 = vmul.f32 %v4278_v10, %v4046_v2 }
 0x292   :  { %v3936_v9 = vpop.f32.mrf.mxu2  ;;  %v4465_v11 = vsel %vm4345_vm0, %v4341_v7, 0.0  ;;  %v4467_v21 = vsel %vm4345_vm0, %v4342_v8, 0.0 }
 0x293   :  { %v3949_v13 = vpop.f32.mrf.mxu3  ;;  %v3912_v14 = vpop.f32.mrf.mxu0  ;;  %v4466_v19 = vadd.f32 %v4465_v11, %v4464_v35 }
 0x294   :  { %v3984_v15 = vpack.c.bf16 %v3949_v13, %v3936_v9  ;;  %v3925_v44 = vpop.f32.mrf.mxu1 }
 0x295   :  { %v4468_v25 = vadd.f32 %v4467_v21, %v4466_v19 }
 0x296   :  { %v4047_v39 = vunpack.c.l.bf16 %v3984_v15  ;;  %v4048_v57 = vunpack.c.h.bf16 %v3984_v15 }
 0x298   :  { %v4343_v22 = vmul.f32 %v4279_v16, %v4047_v39  ;;  %v4344_v23 = vmul.f32 %v4280_v18, %v4048_v57 }
 0x29a   :  { %v3938_v5 = vpop.f32.mrf.mxu2  ;;  %v4469_v26 = vsel %vm4345_vm0, %v4343_v22, 0.0  ;;  %v4471_v30 = vsel %vm4345_vm0, %v4344_v23, 0.0 }
 0x29b   :  { %v3951_v45 = vpop.f32.mrf.mxu3  ;;  %v4470_v28 = vadd.f32 %v4469_v26, %v4468_v25 }
 0x29d   :  { %v4472_v29 = vadd.f32 %v4471_v30, %v4470_v28 }
 0x29f   :  { %4473 = vadd.xlane.f32.xlu0 %v4472_v29 }
 0x312   :  { %v4474_v32 = vpop.xlane.xlu0 %4473 }
 0x313   :  { %v4477_v33 = vadd.f32 %v4476_v31, %v4474_v32 }
 0x315   :  { %v4478_v60 = vpack.c.bf16 %v4477_v33, %v4477_v33 }
 0x317   :  { %4480 = vst.msk [vmem:[%s7425_s4] sm:$0x1] %vm4479_vm1, %v4478_v60 }
 0x318   :  { %4485 = vsyncpa [#allocation4], 1 }
 0x319   :  { %4486 = vsyncpa [#allocation6], 1 }

</bundles_post_ra>
